<compile_context>
chip_gen: v7x
topology: tpu7x:2x2x1
jax: 0.10.0
libtpu: 0.0.40
codegen_flags: <defaults>
</compile_context>

<pallas_src>
import numpy as np
import jax
import jax.numpy as jnp
from jax.experimental import pallas as pl
from jax.experimental.pallas import tpu as pltpu


# Offsets of the live image inside the shared VMEM scratch pad:
#  * sublane offset 8 keeps interior stores sublane-aligned and leaves a zero row above,
#  * lane offset 1 leaves a zero column on the left while keeping every 3x3-tap window
#    (lane starts 0/1/2) inside lane-tile 0 (no 128-lane-boundary straddle).
_R0 = 8
_C0 = 1


# ----------------------------------------------------------------------------
# The single fused decoder kernel.
# ----------------------------------------------------------------------------
def _decoder_kernel(params_ref,                         # SMEM (90,)
                    mats_ref,                           # VMEM (6, B, UP, UP) interp mats
                    x2_ref, x3_ref, x4_ref, x5_ref,     # VMEM pyramid inputs (B, H, W)
                    add_x2_ref, add_x3_ref, add_x4_ref, # VMEM outputs
                    pad_ref):                           # VMEM scratch (B, _R0+UP+8, 128)
    B = x2_ref.shape[0]
    UP = mats_ref.shape[2]

    # Single upfront clear.  Later interior stores have monotonically non-decreasing
    # extents, so every store covers the previous one and everything outside the live
    # extent (including the 1-wide guard ring the taps read) stays exactly zero.
    pad_ref[...] = jnp.zeros(pad_ref.shape, pad_ref.dtype)

    def conv_from_pad(H, W, cidx, relu=False, residual=None):
        """3x3 conv, padding=1, cross-correlation (= nn.Conv2d).  Assumes the live
        HxW image sits at (_R0, _C0) inside pad_ref with a zero ring around it."""
        base = cidx * 10
        taps = []
        for di in range(3):                     # 9 unrolled taps, all in lane-tile 0
            for dj in range(3):
                win = pad_ref[:, _R0 - 1 + di:_R0 - 1 + di + H,
                              _C0 - 1 + dj:_C0 - 1 + dj + W]
                taps.append(params_ref[base + 3 * di + dj] * win)
        taps[-1] = taps[-1] + params_ref[base + 9]      # fold bias into one leaf
        while len(taps) > 1:                            # log-depth tree accumulation
            nxt = [taps[i] + taps[i + 1] for i in range(0, len(taps) - 1, 2)]
            if len(taps) % 2:
                nxt.append(taps[-1])
            taps = nxt
        acc = taps[0]
        if relu:
            acc = jnp.maximum(acc, 0.0)
        if residual is not None:
            acc = acc + residual
        return acc

    def conv3x3(x, cidx, relu=False, residual=None):
        H, W = x.shape[1], x.shape[2]
        pad_ref[:, _R0:_R0 + H, _C0:_C0 + W] = x
        return conv_from_pad(H, W, cidx, relu=relu, residual=residual)

    def bdot(a, b):
        # batched (B,M,K) @ (B,K,N) on the MXU; HIGHEST => true f32 contraction.
        return jax.lax.dot_general(
            a, b, (((2,), (1,)), ((0,), (0,))),
            precision=jax.lax.Precision.HIGHEST,
            preferred_element_type=jnp.float32)

    def bm(x, mat_idx, cidx0, skip):
        """conv1 -> ReLU -> conv2 -> +x -> bilinear(align_corners=True) ->
        conv_upsample -> +skip (the cross-level add fused as the residual)."""
        H, W = x.shape[1], x.shape[2]
        Hout, Wout = skip.shape[1], skip.shape[2]
        h = conv3x3(x, cidx0 + 0, relu=True)
        h = conv3x3(h, cidx0 + 1, residual=x)
        # Zero-padded upsample: store h, re-read it as a (B, UP, UP) tile (everything
        # beyond the live extent in pad_ref is zero), then
        #     up_pad = R_pad @ h_pad @ C_pad^T
        # with zero-padded interpolation matrices.  up_pad holds the true bilinear
        # upsample in its top-left (Hout, Wout) corner and exact zeros elsewhere, so
        # storing the full UPxUP tile back re-establishes the zero-ring invariant.
        pad_ref[:, _R0:_R0 + H, _C0:_C0 + W] = h
        hp = pad_ref[:, _R0:_R0 + UP, _C0:_C0 + UP]           # (B, UP, UP)
        up = bdot(bdot(mats_ref[mat_idx], hp), mats_ref[mat_idx + 1])
        pad_ref[:, _R0:_R0 + UP, _C0:_C0 + UP] = up
        return conv_from_pad(Hout, Wout, cidx0 + 2, relu=False, residual=skip)

    add_x4 = bm(x5_ref[...], 0, 6, x4_ref[...])       # bm_5 (param slots 6..8)
    add_x4_ref[...] = add_x4
    add_x3 = bm(add_x4, 2, 3, x3_ref[...])            # bm_4 (param slots 3..5)
    add_x3_ref[...] = add_x3
    add_x2 = bm(add_x3, 4, 0, x2_ref[...])            # bm_3 (param slots 0..2)
    add_x2_ref[...] = add_x2


# ----------------------------------------------------------------------------
# Host-side helpers (all trace-time / constant work).
# ----------------------------------------------------------------------------
def _interp_matrix(n_out, n_in):
    """align_corners=True bilinear interpolation matrix (n_out, n_in), numpy."""
    if n_out == 1:
        src = np.zeros((1,), np.float64)
    else:
        src = np.arange(n_out, dtype=np.float64) * (float(n_in - 1) / float(n_out - 1))
    lo = np.clip(np.floor(src).astype(np.int64), 0, n_in - 1)
    hi = np.clip(lo + 1, 0, n_in - 1)
    frac = (src - lo).astype(np.float32)
    M = np.zeros((n_out, n_in), np.float32)
    rows = np.arange(n_out)
    M[rows, lo] += (1.0 - frac)
    M[rows, hi] += frac
    return M


def _flatten_params(params):
    """(90,) f32: [bm3 conv1 w(9)+b, conv2, conv_up, bm4 ..., bm5 ...]."""
    parts = []
    for name in ("bm3", "bm4", "bm5"):
        p = params[name]
        for c in ("1", "2", "3"):
            parts.append(jnp.reshape(p["w" + c], (-1)).astype(jnp.float32))
            parts.append(jnp.reshape(p["b" + c], (-1)).astype(jnp.float32))
    return jnp.concatenate(parts)


@jax.jit
def decoder_forward(x2, x3, x4, x5, params):
    B = x2.shape[0]
    s2 = (x2.shape[2], x2.shape[3])
    s3 = (x3.shape[2], x3.shape[3])
    s4 = (x4.shape[2], x4.shape[3])
    s5 = (x5.shape[2], x5.shape[3])

    # Single-clear pad scheme requires monotone non-decreasing sizes bm5 -> bm4 -> bm3.
    assert s5[0] <= s4[0] <= s3[0] <= s2[0] and s5[1] <= s4[1] <= s3[1] <= s2[1]
    UP = max(s2)                       # padded square size for the upsample matmuls
    assert _C0 + UP + 1 <= 128, "spatial extent too large for single-lane-tile layout"

    flat_params = _flatten_params(params)

    # Interpolation operators (compile-time numpy constants), zero-padded to (UP, UP)
    # and pre-broadcast over batch; packed into ONE input => one DMA instead of six.
    def pad_sq(m):
        out = np.zeros((UP, UP), np.float32)
        out[:m.shape[0], :m.shape[1]] = m
        return out

    R5 = _interp_matrix(s4[0], s5[0]); C5t = _interp_matrix(s4[1], s5[1]).T
    R4 = _interp_matrix(s3[0], s4[0]); C4t = _interp_matrix(s3[1], s4[1]).T
    R3 = _interp_matrix(s2[0], s3[0]); C3t = _interp_matrix(s2[1], s3[1]).T
    mats_np = np.stack([pad_sq(m) for m in (R5, C5t, R4, C4t, R3, C3t)])   # (6,UP,UP)
    mats_np = np.ascontiguousarray(np.broadcast_to(mats_np[:, None], (6, B, UP, UP)))
    mats = jnp.asarray(mats_np)

    pad_shape = (B, _R0 + UP + 8, 128)   # >=7 spare rows below, >=94 spare lanes right

    vmem = pl.BlockSpec(memory_space=pltpu.MemorySpace.VMEM)
    smem = pl.BlockSpec(memory_space=pltpu.MemorySpace.SMEM)

    add_x2, add_x3, add_x4 = pl.pallas_call(
        _decoder_kernel,
        out_shape=(
            jax.ShapeDtypeStruct((B,) + s2, jnp.float32),
            jax.ShapeDtypeStruct((B,) + s3, jnp.float32),
            jax.ShapeDtypeStruct((B,) + s4, jnp.float32),
        ),
        in_specs=[smem, vmem, vmem, vmem, vmem, vmem],
        out_specs=(vmem, vmem, vmem),
        scratch_shapes=[pltpu.VMEM(pad_shape, jnp.float32)],
    )(flat_params, mats,
      x2[:, 0].astype(jnp.float32), x3[:, 0].astype(jnp.float32),
      x4[:, 0].astype(jnp.float32), x5[:, 0].astype(jnp.float32))

    # Back to NCHW, matching the PyTorch module's return order.
    return add_x2[:, None], add_x3[:, None], add_x4[:, None]


# ----------------------------------------------------------------------------
# Deterministic parameter init (nn.Conv2d(1,1,3): w (1,1,3,3)->(3,3), b (1,))
# ----------------------------------------------------------------------------
def init_params(key):
    params = {}
    for name in ("bm3", "bm4", "bm5"):
        p = {}
        for cname in ("1", "2", "3"):
            key, kw, kb = jax.random.split(key, 3)
            p["w" + cname] = jax.random.normal(kw, (3, 3), jnp.float32) * 0.2
            p["b" + cname] = jax.random.normal(kb, (1,), jnp.float32) * 0.05
        params[name] = p
    return params


# ----------------------------------------------------------------------------
# Plain-JAX reference (independent formulation: pad+tap conv, gather-lerp bilinear)
# ----------------------------------------------------------------------------
def _ref_conv3x3(x, w, b):
    H, W = x.shape[1], x.shape[2]
    xp = jnp.pad(x, ((0, 0), (1, 1), (1, 1)))
    acc = jnp.zeros_like(x)
    for di in range(3):
        for dj in range(3):
            acc = acc + w[di, dj] * xp[:, di:di + H, dj:dj + W]
    return acc + b[0]


def _ref_bilinear(x, out_size):
    Hout, Wout = out_size
    Hin, Win = x.shape[1], x.shape[2]

    def coords(n_out, n_in):
        if n_out == 1:
            src = np.zeros((1,), np.float64)
        else:
            src = np.arange(n_out, dtype=np.float64) * (float(n_in - 1) / float(n_out - 1))
        lo = np.clip(np.floor(src).astype(np.int64), 0, n_in - 1)
        hi = np.clip(lo + 1, 0, n_in - 1)
        return lo, hi, (src - lo).astype(np.float32)

    rlo, rhi, rf = coords(Hout, Hin)
    clo, chi, cf = coords(Wout, Win)
    rf = rf[None, :, None]
    cf = cf[None, None, :]
    rows = x[:, rlo, :] * (1.0 - rf) + x[:, rhi, :] * rf           # (B, Hout, Win)
    return rows[:, :, clo] * (1.0 - cf) + rows[:, :, chi] * cf      # (B, Hout, Wout)


def _ref_bm(x, p, out_size):
    h = jnp.maximum(_ref_conv3x3(x, p["w1"], p["b1"]), 0.0)
    h = _ref_conv3x3(h, p["w2"], p["b2"]) + x
    up = _ref_bilinear(h, out_size)
    return _ref_conv3x3(up, p["w3"], p["b3"])


def _ref_decoder(x2, x3, x4, x5, params):
    a4 = _ref_bm(x5[:, 0], params["bm5"], x4.shape[2:]) + x4[:, 0]
    a3 = _ref_bm(a4, params["bm4"], x3.shape[2:]) + x3[:, 0]
    a2 = _ref_bm(a3, params["bm3"], x2.shape[2:]) + x2[:, 0]
    return a2, a3, a4


if __name__ == "__main__":
    key = jax.random.PRNGKey(0)
    kp, k2, k3, k4, k5 = jax.random.split(key, 5)
    params = init_params(kp)

    B = 2
    # Typical pyramid: x2 largest ... x5 smallest, single channel (per module def).
    x2 = jax.random.normal(k2, (B, 1, 32, 32), jnp.float32)
    x3 = jax.random.normal(k3, (B, 1, 16, 16), jnp.float32)
    x4 = jax.random.normal(k4, (B, 1, 8, 8), jnp.float32)
    x5 = jax.random.normal(k5, (B, 1, 4, 4), jnp.float32)

    add_x2, add_x3, add_x4 = decoder_forward(x2, x3, x4, x5, params)
    jax.block_until_ready((add_x2, add_x3, add_x4))

    assert add_x2.shape == (B, 1, 32, 32)
    assert add_x3.shape == (B, 1, 16, 16)
    assert add_x4.shape == (B, 1, 8, 8)

    # Numerical check vs independent plain-JAX reference.  Tolerance is tight (1e-3)
    # because the in-kernel upsample matmuls run at Precision.HIGHEST (true f32).
    r2, r3, r4 = _ref_decoder(x2, x3, x4, x5, params)
    np.testing.assert_allclose(np.asarray(add_x2[:, 0]), np.asarray(r2), rtol=1e-3, atol=1e-3)
    np.testing.assert_allclose(np.asarray(add_x3[:, 0]), np.asarray(r3), rtol=1e-3, atol=1e-3)
    np.testing.assert_allclose(np.asarray(add_x4[:, 0]), np.asarray(r4), rtol=1e-3, atol=1e-3)

    print("KERNEL_OK")
</pallas_src>

<mosaic_0001>
module attributes {stable_mosaic.version = 11 : i64} {
  func.func @_decoder_kernel(%arg0: memref<90xf32, #tpu.memory_space<smem>>, %arg1: memref<6x2x32x32xf32, #tpu.memory_space<vmem>>, %arg2: memref<2x32x32xf32, #tpu.memory_space<vmem>>, %arg3: memref<2x16x16xf32, #tpu.memory_space<vmem>>, %arg4: memref<2x8x8xf32, #tpu.memory_space<vmem>>, %arg5: memref<2x4x4xf32, #tpu.memory_space<vmem>>, %arg6: memref<2x32x32xf32, #tpu.memory_space<vmem>>, %arg7: memref<2x16x16xf32, #tpu.memory_space<vmem>>, %arg8: memref<2x8x8xf32, #tpu.memory_space<vmem>>, %arg9: memref<2x48x128xf32, #tpu.memory_space<vmem>>) attributes {dimension_semantics = [], scalar_prefetch = 0 : i64, scratch_operands = 1 : i64, tpu.core_type = #tpu.core_type<tc>} {
    %cst = arith.constant 0.000000e+00 : f32
    %0 = vector.broadcast %cst : f32 to vector<2x48x128xf32>
    %c0 = arith.constant 0 : index
    %c0_0 = arith.constant 0 : index
    %c0_1 = arith.constant 0 : index
    %1 = vector.load %arg9[%c0, %c0_0, %c0_1] : memref<2x48x128xf32, #tpu.memory_space<vmem>>, vector<2x48x128xf32>
    tpu.vector_store %arg9[%c0, %c0_0, %c0_1], %0 {strides = array<i32>} : memref<2x48x128xf32, #tpu.memory_space<vmem>>, vector<2x48x128xf32>,
    %c0_2 = arith.constant 0 : index
    %c0_3 = arith.constant 0 : index
    %c0_4 = arith.constant 0 : index
    %2 = vector.load %arg5[%c0_2, %c0_3, %c0_4] : memref<2x4x4xf32, #tpu.memory_space<vmem>>, vector<2x4x4xf32>
    %c0_5 = arith.constant 0 : index
    %c0_6 = arith.constant 0 : index
    %c0_7 = arith.constant 0 : index
    %3 = vector.load %arg4[%c0_5, %c0_6, %c0_7] : memref<2x8x8xf32, #tpu.memory_space<vmem>>, vector<2x8x8xf32>
    %c0_8 = arith.constant 0 : index
    %c8 = arith.constant 8 : index
    %c1 = arith.constant 1 : index
    %4 = vector.load %arg9[%c0_8, %c8, %c1] : memref<2x48x128xf32, #tpu.memory_space<vmem>>, vector<2x4x4xf32>
    tpu.vector_store %arg9[%c0_8, %c8, %c1], %2 {strides = array<i32>} : memref<2x48x128xf32, #tpu.memory_space<vmem>>, vector<2x4x4xf32>,
    %c0_9 = arith.constant 0 : index
    %c7 = arith.constant 7 : index
    %c0_10 = arith.constant 0 : index
    %5 = vector.load %arg9[%c0_9, %c7, %c0_10] : memref<2x48x128xf32, #tpu.memory_space<vmem>>, vector<2x4x4xf32>
    %c60 = arith.constant 60 : index
    %6 = memref.load %arg0[%c60] : memref<90xf32, #tpu.memory_space<smem>>
    %7 = vector.broadcast %6 : f32 to vector<2x4x4xf32>
    %8 = arith.mulf %7, %5 : vector<2x4x4xf32>
    %c0_11 = arith.constant 0 : index
    %c7_12 = arith.constant 7 : index
    %c1_13 = arith.constant 1 : index
    %9 = vector.load %arg9[%c0_11, %c7_12, %c1_13] : memref<2x48x128xf32, #tpu.memory_space<vmem>>, vector<2x4x4xf32>
    %c61 = arith.constant 61 : index
    %10 = memref.load %arg0[%c61] : memref<90xf32, #tpu.memory_space<smem>>
    %11 = vector.broadcast %10 : f32 to vector<2x4x4xf32>
    %12 = arith.mulf %11, %9 : vector<2x4x4xf32>
    %c0_14 = arith.constant 0 : index
    %c7_15 = arith.constant 7 : index
    %c2 = arith.constant 2 : index
    %13 = vector.load %arg9[%c0_14, %c7_15, %c2] : memref<2x48x128xf32, #tpu.memory_space<vmem>>, vector<2x4x4xf32>
    %c62 = arith.constant 62 : index
    %14 = memref.load %arg0[%c62] : memref<90xf32, #tpu.memory_space<smem>>
    %15 = vector.broadcast %14 : f32 to vector<2x4x4xf32>
    %16 = arith.mulf %15, %13 : vector<2x4x4xf32>
    %c0_16 = arith.constant 0 : index
    %c8_17 = arith.constant 8 : index
    %c0_18 = arith.constant 0 : index
    %17 = vector.load %arg9[%c0_16, %c8_17, %c0_18] : memref<2x48x128xf32, #tpu.memory_space<vmem>>, vector<2x4x4xf32>
    %c63 = arith.constant 63 : index
    %18 = memref.load %arg0[%c63] : memref<90xf32, #tpu.memory_space<smem>>
    %19 = vector.broadcast %18 : f32 to vector<2x4x4xf32>
    %20 = arith.mulf %19, %17 : vector<2x4x4xf32>
    %c0_19 = arith.constant 0 : index
    %c8_20 = arith.constant 8 : index
    %c1_21 = arith.constant 1 : index
    %21 = vector.load %arg9[%c0_19, %c8_20, %c1_21] : memref<2x48x128xf32, #tpu.memory_space<vmem>>, vector<2x4x4xf32>
    %c64 = arith.constant 64 : index
    %22 = memref.load %arg0[%c64] : memref<90xf32, #tpu.memory_space<smem>>
    %23 = vector.broadcast %22 : f32 to vector<2x4x4xf32>
    %24 = arith.mulf %23, %21 : vector<2x4x4xf32>
    %c0_22 = arith.constant 0 : index
    %c8_23 = arith.constant 8 : index
    %c2_24 = arith.constant 2 : index
    %25 = vector.load %arg9[%c0_22, %c8_23, %c2_24] : memref<2x48x128xf32, #tpu.memory_space<vmem>>, vector<2x4x4xf32>
    %c65 = arith.constant 65 : index
    %26 = memref.load %arg0[%c65] : memref<90xf32, #tpu.memory_space<smem>>
    %27 = vector.broadcast %26 : f32 to vector<2x4x4xf32>
    %28 = arith.mulf %27, %25 : vector<2x4x4xf32>
    %c0_25 = arith.constant 0 : index
    %c9 = arith.constant 9 : index
    %c0_26 = arith.constant 0 : index
    %29 = vector.load %arg9[%c0_25, %c9, %c0_26] : memref<2x48x128xf32, #tpu.memory_space<vmem>>, vector<2x4x4xf32>
    %c66 = arith.constant 66 : index
    %30 = memref.load %arg0[%c66] : memref<90xf32, #tpu.memory_space<smem>>
    %31 = vector.broadcast %30 : f32 to vector<2x4x4xf32>
    %32 = arith.mulf %31, %29 : vector<2x4x4xf32>
    %c0_27 = arith.constant 0 : index
    %c9_28 = arith.constant 9 : index
    %c1_29 = arith.constant 1 : index
    %33 = vector.load %arg9[%c0_27, %c9_28, %c1_29] : memref<2x48x128xf32, #tpu.memory_space<vmem>>, vector<2x4x4xf32>
    %c67 = arith.constant 67 : index
    %34 = memref.load %arg0[%c67] : memref<90xf32, #tpu.memory_space<smem>>
    %35 = vector.broadcast %34 : f32 to vector<2x4x4xf32>
    %36 = arith.mulf %35, %33 : vector<2x4x4xf32>
    %c0_30 = arith.constant 0 : index
    %c9_31 = arith.constant 9 : index
    %c2_32 = arith.constant 2 : index
    %37 = vector.load %arg9[%c0_30, %c9_31, %c2_32] : memref<2x48x128xf32, #tpu.memory_space<vmem>>, vector<2x4x4xf32>
    %c68 = arith.constant 68 : index
    %38 = memref.load %arg0[%c68] : memref<90xf32, #tpu.memory_space<smem>>
    %39 = vector.broadcast %38 : f32 to vector<2x4x4xf32>
    %40 = arith.mulf %39, %37 : vector<2x4x4xf32>
    %c69 = arith.constant 69 : index
    %41 = memref.load %arg0[%c69] : memref<90xf32, #tpu.memory_space<smem>>
    %42 = vector.broadcast %41 : f32 to vector<2x4x4xf32>
    %43 = arith.addf %40, %42 : vector<2x4x4xf32>
    %44 = arith.addf %8, %12 : vector<2x4x4xf32>
    %45 = arith.addf %16, %20 : vector<2x4x4xf32>
    %46 = arith.addf %24, %28 : vector<2x4x4xf32>
    %47 = arith.addf %32, %36 : vector<2x4x4xf32>
    %48 = arith.addf %44, %45 : vector<2x4x4xf32>
    %49 = arith.addf %46, %47 : vector<2x4x4xf32>
    %50 = arith.addf %48, %49 : vector<2x4x4xf32>
    %51 = arith.addf %50, %43 : vector<2x4x4xf32>
    %cst_33 = arith.constant 0.000000e+00 : f32
    %52 = vector.broadcast %cst_33 : f32 to vector<2x4x4xf32>
    %53 = arith.maximumf %51, %52 : vector<2x4x4xf32>
    %c0_34 = arith.constant 0 : index
    %c8_35 = arith.constant 8 : index
    %c1_36 = arith.constant 1 : index
    %54 = vector.load %arg9[%c0_34, %c8_35, %c1_36] : memref<2x48x128xf32, #tpu.memory_space<vmem>>, vector<2x4x4xf32>
    tpu.vector_store %arg9[%c0_34, %c8_35, %c1_36], %53 {strides = array<i32>} : memref<2x48x128xf32, #tpu.memory_space<vmem>>, vector<2x4x4xf32>,
    %c0_37 = arith.constant 0 : index
    %c7_38 = arith.constant 7 : index
    %c0_39 = arith.constant 0 : index
    %55 = vector.load %arg9[%c0_37, %c7_38, %c0_39] : memref<2x48x128xf32, #tpu.memory_space<vmem>>, vector<2x4x4xf32>
    %c70 = arith.constant 70 : index
    %56 = memref.load %arg0[%c70] : memref<90xf32, #tpu.memory_space<smem>>
    %57 = vector.broadcast %56 : f32 to vector<2x4x4xf32>
    %58 = arith.mulf %57, %55 : vector<2x4x4xf32>
    %c0_40 = arith.constant 0 : index
    %c7_41 = arith.constant 7 : index
    %c1_42 = arith.constant 1 : index
    %59 = vector.load %arg9[%c0_40, %c7_41, %c1_42] : memref<2x48x128xf32, #tpu.memory_space<vmem>>, vector<2x4x4xf32>
    %c71 = arith.constant 71 : index
    %60 = memref.load %arg0[%c71] : memref<90xf32, #tpu.memory_space<smem>>
    %61 = vector.broadcast %60 : f32 to vector<2x4x4xf32>
    %62 = arith.mulf %61, %59 : vector<2x4x4xf32>
    %c0_43 = arith.constant 0 : index
    %c7_44 = arith.constant 7 : index
    %c2_45 = arith.constant 2 : index
    %63 = vector.load %arg9[%c0_43, %c7_44, %c2_45] : memref<2x48x128xf32, #tpu.memory_space<vmem>>, vector<2x4x4xf32>
    %c72 = arith.constant 72 : index
    %64 = memref.load %arg0[%c72] : memref<90xf32, #tpu.memory_space<smem>>
    %65 = vector.broadcast %64 : f32 to vector<2x4x4xf32>
    %66 = arith.mulf %65, %63 : vector<2x4x4xf32>
    %c0_46 = arith.constant 0 : index
    %c8_47 = arith.constant 8 : index
    %c0_48 = arith.constant 0 : index
    %67 = vector.load %arg9[%c0_46, %c8_47, %c0_48] : memref<2x48x128xf32, #tpu.memory_space<vmem>>, vector<2x4x4xf32>
    %c73 = arith.constant 73 : index
    %68 = memref.load %arg0[%c73] : memref<90xf32, #tpu.memory_space<smem>>
    %69 = vector.broadcast %68 : f32 to vector<2x4x4xf32>
    %70 = arith.mulf %69, %67 : vector<2x4x4xf32>
    %c0_49 = arith.constant 0 : index
    %c8_50 = arith.constant 8 : index
    %c1_51 = arith.constant 1 : index
    %71 = vector.load %arg9[%c0_49, %c8_50, %c1_51] : memref<2x48x128xf32, #tpu.memory_space<vmem>>, vector<2x4x4xf32>
    %c74 = arith.constant 74 : index
    %72 = memref.load %arg0[%c74] : memref<90xf32, #tpu.memory_space<smem>>
    %73 = vector.broadcast %72 : f32 to vector<2x4x4xf32>
    %74 = arith.mulf %73, %71 : vector<2x4x4xf32>
    %c0_52 = arith.constant 0 : index
    %c8_53 = arith.constant 8 : index
    %c2_54 = arith.constant 2 : index
    %75 = vector.load %arg9[%c0_52, %c8_53, %c2_54] : memref<2x48x128xf32, #tpu.memory_space<vmem>>, vector<2x4x4xf32>
    %c75 = arith.constant 75 : index
    %76 = memref.load %arg0[%c75] : memref<90xf32, #tpu.memory_space<smem>>
    %77 = vector.broadcast %76 : f32 to vector<2x4x4xf32>
    %78 = arith.mulf %77, %75 : vector<2x4x4xf32>
    %c0_55 = arith.constant 0 : index
    %c9_56 = arith.constant 9 : index
    %c0_57 = arith.constant 0 : index
    %79 = vector.load %arg9[%c0_55, %c9_56, %c0_57] : memref<2x48x128xf32, #tpu.memory_space<vmem>>, vector<2x4x4xf32>
    %c76 = arith.constant 76 : index
    %80 = memref.load %arg0[%c76] : memref<90xf32, #tpu.memory_space<smem>>
    %81 = vector.broadcast %80 : f32 to vector<2x4x4xf32>
    %82 = arith.mulf %81, %79 : vector<2x4x4xf32>
    %c0_58 = arith.constant 0 : index
    %c9_59 = arith.constant 9 : index
    %c1_60 = arith.constant 1 : index
    %83 = vector.load %arg9[%c0_58, %c9_59, %c1_60] : memref<2x48x128xf32, #tpu.memory_space<vmem>>, vector<2x4x4xf32>
    %c77 = arith.constant 77 : index
    %84 = memref.load %arg0[%c77] : memref<90xf32, #tpu.memory_space<smem>>
    %85 = vector.broadcast %84 : f32 to vector<2x4x4xf32>
    %86 = arith.mulf %85, %83 : vector<2x4x4xf32>
    %c0_61 = arith.constant 0 : index
    %c9_62 = arith.constant 9 : index
    %c2_63 = arith.constant 2 : index
    %87 = vector.load %arg9[%c0_61, %c9_62, %c2_63] : memref<2x48x128xf32, #tpu.memory_space<vmem>>, vector<2x4x4xf32>
    %c78 = arith.constant 78 : index
    %88 = memref.load %arg0[%c78] : memref<90xf32, #tpu.memory_space<smem>>
    %89 = vector.broadcast %88 : f32 to vector<2x4x4xf32>
    %90 = arith.mulf %89, %87 : vector<2x4x4xf32>
    %c79 = arith.constant 79 : index
    %91 = memref.load %arg0[%c79] : memref<90xf32, #tpu.memory_space<smem>>
    %92 = vector.broadcast %91 : f32 to vector<2x4x4xf32>
    %93 = arith.addf %90, %92 : vector<2x4x4xf32>
    %94 = arith.addf %58, %62 : vector<2x4x4xf32>
    %95 = arith.addf %66, %70 : vector<2x4x4xf32>
    %96 = arith.addf %74, %78 : vector<2x4x4xf32>
    %97 = arith.addf %82, %86 : vector<2x4x4xf32>
    %98 = arith.addf %94, %95 : vector<2x4x4xf32>
    %99 = arith.addf %96, %97 : vector<2x4x4xf32>
    %100 = arith.addf %98, %99 : vector<2x4x4xf32>
    %101 = arith.addf %100, %93 : vector<2x4x4xf32>
    %102 = arith.addf %101, %2 : vector<2x4x4xf32>
    %c0_64 = arith.constant 0 : index
    %c8_65 = arith.constant 8 : index
    %c1_66 = arith.constant 1 : index
    %103 = vector.load %arg9[%c0_64, %c8_65, %c1_66] : memref<2x48x128xf32, #tpu.memory_space<vmem>>, vector<2x4x4xf32>
    tpu.vector_store %arg9[%c0_64, %c8_65, %c1_66], %102 {strides = array<i32>} : memref<2x48x128xf32, #tpu.memory_space<vmem>>, vector<2x4x4xf32>,
    %c0_67 = arith.constant 0 : index
    %c8_68 = arith.constant 8 : index
    %c1_69 = arith.constant 1 : index
    %104 = vector.load %arg9[%c0_67, %c8_68, %c1_69] : memref<2x48x128xf32, #tpu.memory_space<vmem>>, vector<2x32x32xf32>
    %c0_70 = arith.constant 0 : index
    %c0_71 = arith.constant 0 : index
    %c0_72 = arith.constant 0 : index
    %c0_73 = arith.constant 0 : index
    %105 = vector.load %arg1[%c0_70, %c0_71, %c0_72, %c0_73] : memref<6x2x32x32xf32, #tpu.memory_space<vmem>>, vector<1x2x32x32xf32>
    %106 = vector.shape_cast %105 : vector<1x2x32x32xf32> to vector<2x32x32xf32>
    %cst_74 = arith.constant dense<0.000000e+00> : vector<2x32x32xf32>
    %107 = tpu.matmul %106, %104, %cst_74 {dimension_numbers = #tpu.dot_dimension_numbers<[2], [1], [1], [2], [0, 0, 0, 1, 1, 2], [0], [0]>, precision = #tpu.contract_precision<fp32>} : vector<2x32x32xf32>, vector<2x32x32xf32>, vector<2x32x32xf32> -> vector<2x32x32xf32>
    %c1_75 = arith.constant 1 : index
    %c0_76 = arith.constant 0 : index
    %c0_77 = arith.constant 0 : index
    %c0_78 = arith.constant 0 : index
    %108 = vector.load %arg1[%c1_75, %c0_76, %c0_77, %c0_78] : memref<6x2x32x32xf32, #tpu.memory_space<vmem>>, vector<1x2x32x32xf32>
    %109 = vector.shape_cast %108 : vector<1x2x32x32xf32> to vector<2x32x32xf32>
    %cst_79 = arith.constant dense<0.000000e+00> : vector<2x32x32xf32>
    %110 = tpu.matmul %107, %109, %cst_79 {dimension_numbers = #tpu.dot_dimension_numbers<[2], [1], [1], [2], [0, 0, 0, 1, 1, 2], [0], [0]>, precision = #tpu.contract_precision<fp32>} : vector<2x32x32xf32>, vector<2x32x32xf32>, vector<2x32x32xf32> -> vector<2x32x32xf32>
    %c0_80 = arith.constant 0 : index
    %c8_81 = arith.constant 8 : index
    %c1_82 = arith.constant 1 : index
    %111 = vector.load %arg9[%c0_80, %c8_81, %c1_82] : memref<2x48x128xf32, #tpu.memory_space<vmem>>, vector<2x32x32xf32>
    tpu.vector_store %arg9[%c0_80, %c8_81, %c1_82], %110 {strides = array<i32>} : memref<2x48x128xf32, #tpu.memory_space<vmem>>, vector<2x32x32xf32>,
    %c0_83 = arith.constant 0 : index
    %c7_84 = arith.constant 7 : index
    %c0_85 = arith.constant 0 : index
    %112 = vector.load %arg9[%c0_83, %c7_84, %c0_85] : memref<2x48x128xf32, #tpu.memory_space<vmem>>, vector<2x8x8xf32>
    %c80 = arith.constant 80 : index
    %113 = memref.load %arg0[%c80] : memref<90xf32, #tpu.memory_space<smem>>
    %114 = vector.broadcast %113 : f32 to vector<2x8x8xf32>
    %115 = arith.mulf %114, %112 : vector<2x8x8xf32>
    %c0_86 = arith.constant 0 : index
    %c7_87 = arith.constant 7 : index
    %c1_88 = arith.constant 1 : index
    %116 = vector.load %arg9[%c0_86, %c7_87, %c1_88] : memref<2x48x128xf32, #tpu.memory_space<vmem>>, vector<2x8x8xf32>
    %c81 = arith.constant 81 : index
    %117 = memref.load %arg0[%c81] : memref<90xf32, #tpu.memory_space<smem>>
    %118 = vector.broadcast %117 : f32 to vector<2x8x8xf32>
    %119 = arith.mulf %118, %116 : vector<2x8x8xf32>
    %c0_89 = arith.constant 0 : index
    %c7_90 = arith.constant 7 : index
    %c2_91 = arith.constant 2 : index
    %120 = vector.load %arg9[%c0_89, %c7_90, %c2_91] : memref<2x48x128xf32, #tpu.memory_space<vmem>>, vector<2x8x8xf32>
    %c82 = arith.constant 82 : index
    %121 = memref.load %arg0[%c82] : memref<90xf32, #tpu.memory_space<smem>>
    %122 = vector.broadcast %121 : f32 to vector<2x8x8xf32>
    %123 = arith.mulf %122, %120 : vector<2x8x8xf32>
    %c0_92 = arith.constant 0 : index
    %c8_93 = arith.constant 8 : index
    %c0_94 = arith.constant 0 : index
    %124 = vector.load %arg9[%c0_92, %c8_93, %c0_94] : memref<2x48x128xf32, #tpu.memory_space<vmem>>, vector<2x8x8xf32>
    %c83 = arith.constant 83 : index
    %125 = memref.load %arg0[%c83] : memref<90xf32, #tpu.memory_space<smem>>
    %126 = vector.broadcast %125 : f32 to vector<2x8x8xf32>
    %127 = arith.mulf %126, %124 : vector<2x8x8xf32>
    %c0_95 = arith.constant 0 : index
    %c8_96 = arith.constant 8 : index
    %c1_97 = arith.constant 1 : index
    %128 = vector.load %arg9[%c0_95, %c8_96, %c1_97] : memref<2x48x128xf32, #tpu.memory_space<vmem>>, vector<2x8x8xf32>
    %c84 = arith.constant 84 : index
    %129 = memref.load %arg0[%c84] : memref<90xf32, #tpu.memory_space<smem>>
    %130 = vector.broadcast %129 : f32 to vector<2x8x8xf32>
    %131 = arith.mulf %130, %128 : vector<2x8x8xf32>
    %c0_98 = arith.constant 0 : index
    %c8_99 = arith.constant 8 : index
    %c2_100 = arith.constant 2 : index
    %132 = vector.load %arg9[%c0_98, %c8_99, %c2_100] : memref<2x48x128xf32, #tpu.memory_space<vmem>>, vector<2x8x8xf32>
    %c85 = arith.constant 85 : index
    %133 = memref.load %arg0[%c85] : memref<90xf32, #tpu.memory_space<smem>>
    %134 = vector.broadcast %133 : f32 to vector<2x8x8xf32>
    %135 = arith.mulf %134, %132 : vector<2x8x8xf32>
    %c0_101 = arith.constant 0 : index
    %c9_102 = arith.constant 9 : index
    %c0_103 = arith.constant 0 : index
    %136 = vector.load %arg9[%c0_101, %c9_102, %c0_103] : memref<2x48x128xf32, #tpu.memory_space<vmem>>, vector<2x8x8xf32>
    %c86 = arith.constant 86 : index
    %137 = memref.load %arg0[%c86] : memref<90xf32, #tpu.memory_space<smem>>
    %138 = vector.broadcast %137 : f32 to vector<2x8x8xf32>
    %139 = arith.mulf %138, %136 : vector<2x8x8xf32>
    %c0_104 = arith.constant 0 : index
    %c9_105 = arith.constant 9 : index
    %c1_106 = arith.constant 1 : index
    %140 = vector.load %arg9[%c0_104, %c9_105, %c1_106] : memref<2x48x128xf32, #tpu.memory_space<vmem>>, vector<2x8x8xf32>
    %c87 = arith.constant 87 : index
    %141 = memref.load %arg0[%c87] : memref<90xf32, #tpu.memory_space<smem>>
    %142 = vector.broadcast %141 : f32 to vector<2x8x8xf32>
    %143 = arith.mulf %142, %140 : vector<2x8x8xf32>
    %c0_107 = arith.constant 0 : index
    %c9_108 = arith.constant 9 : index
    %c2_109 = arith.constant 2 : index
    %144 = vector.load %arg9[%c0_107, %c9_108, %c2_109] : memref<2x48x128xf32, #tpu.memory_space<vmem>>, vector<2x8x8xf32>
    %c88 = arith.constant 88 : index
    %145 = memref.load %arg0[%c88] : memref<90xf32, #tpu.memory_space<smem>>
    %146 = vector.broadcast %145 : f32 to vector<2x8x8xf32>
    %147 = arith.mulf %146, %144 : vector<2x8x8xf32>
    %c89 = arith.constant 89 : index
    %148 = memref.load %arg0[%c89] : memref<90xf32, #tpu.memory_space<smem>>
    %149 = vector.broadcast %148 : f32 to vector<2x8x8xf32>
    %150 = arith.addf %147, %149 : vector<2x8x8xf32>
    %151 = arith.addf %115, %119 : vector<2x8x8xf32>
    %152 = arith.addf %123, %127 : vector<2x8x8xf32>
    %153 = arith.addf %131, %135 : vector<2x8x8xf32>
    %154 = arith.addf %139, %143 : vector<2x8x8xf32>
    %155 = arith.addf %151, %152 : vector<2x8x8xf32>
    %156 = arith.addf %153, %154 : vector<2x8x8xf32>
    %157 = arith.addf %155, %156 : vector<2x8x8xf32>
    %158 = arith.addf %157, %150 : vector<2x8x8xf32>
    %159 = arith.addf %158, %3 : vector<2x8x8xf32>
    %c0_110 = arith.constant 0 : index
    %c0_111 = arith.constant 0 : index
    %c0_112 = arith.constant 0 : index
    %160 = vector.load %arg8[%c0_110, %c0_111, %c0_112] : memref<2x8x8xf32, #tpu.memory_space<vmem>>, vector<2x8x8xf32>
    tpu.vector_store %arg8[%c0_110, %c0_111, %c0_112], %159 {strides = array<i32>} : memref<2x8x8xf32, #tpu.memory_space<vmem>>, vector<2x8x8xf32>,
    %c0_113 = arith.constant 0 : index
    %c0_114 = arith.constant 0 : index
    %c0_115 = arith.constant 0 : index
    %161 = vector.load %arg3[%c0_113, %c0_114, %c0_115] : memref<2x16x16xf32, #tpu.memory_space<vmem>>, vector<2x16x16xf32>
    %c0_116 = arith.constant 0 : index
    %c8_117 = arith.constant 8 : index
    %c1_118 = arith.constant 1 : index
    %162 = vector.load %arg9[%c0_116, %c8_117, %c1_118] : memref<2x48x128xf32, #tpu.memory_space<vmem>>, vector<2x8x8xf32>
    tpu.vector_store %arg9[%c0_116, %c8_117, %c1_118], %159 {strides = array<i32>} : memref<2x48x128xf32, #tpu.memory_space<vmem>>, vector<2x8x8xf32>,
    %c0_119 = arith.constant 0 : index
    %c7_120 = arith.constant 7 : index
    %c0_121 = arith.constant 0 : index
    %163 = vector.load %arg9[%c0_119, %c7_120, %c0_121] : memref<2x48x128xf32, #tpu.memory_space<vmem>>, vector<2x8x8xf32>
    %c30 = arith.constant 30 : index
    %164 = memref.load %arg0[%c30] : memref<90xf32, #tpu.memory_space<smem>>
    %165 = vector.broadcast %164 : f32 to vector<2x8x8xf32>
    %166 = arith.mulf %165, %163 : vector<2x8x8xf32>
    %c0_122 = arith.constant 0 : index
    %c7_123 = arith.constant 7 : index
    %c1_124 = arith.constant 1 : index
    %167 = vector.load %arg9[%c0_122, %c7_123, %c1_124] : memref<2x48x128xf32, #tpu.memory_space<vmem>>, vector<2x8x8xf32>
    %c31 = arith.constant 31 : index
    %168 = memref.load %arg0[%c31] : memref<90xf32, #tpu.memory_space<smem>>
    %169 = vector.broadcast %168 : f32 to vector<2x8x8xf32>
    %170 = arith.mulf %169, %167 : vector<2x8x8xf32>
    %c0_125 = arith.constant 0 : index
    %c7_126 = arith.constant 7 : index
    %c2_127 = arith.constant 2 : index
    %171 = vector.load %arg9[%c0_125, %c7_126, %c2_127] : memref<2x48x128xf32, #tpu.memory_space<vmem>>, vector<2x8x8xf32>
    %c32 = arith.constant 32 : index
    %172 = memref.load %arg0[%c32] : memref<90xf32, #tpu.memory_space<smem>>
    %173 = vector.broadcast %172 : f32 to vector<2x8x8xf32>
    %174 = arith.mulf %173, %171 : vector<2x8x8xf32>
    %c0_128 = arith.constant 0 : index
    %c8_129 = arith.constant 8 : index
    %c0_130 = arith.constant 0 : index
    %175 = vector.load %arg9[%c0_128, %c8_129, %c0_130] : memref<2x48x128xf32, #tpu.memory_space<vmem>>, vector<2x8x8xf32>
    %c33 = arith.constant 33 : index
    %176 = memref.load %arg0[%c33] : memref<90xf32, #tpu.memory_space<smem>>
    %177 = vector.broadcast %176 : f32 to vector<2x8x8xf32>
    %178 = arith.mulf %177, %175 : vector<2x8x8xf32>
    %c0_131 = arith.constant 0 : index
    %c8_132 = arith.constant 8 : index
    %c1_133 = arith.constant 1 : index
    %179 = vector.load %arg9[%c0_131, %c8_132, %c1_133] : memref<2x48x128xf32, #tpu.memory_space<vmem>>, vector<2x8x8xf32>
    %c34 = arith.constant 34 : index
    %180 = memref.load %arg0[%c34] : memref<90xf32, #tpu.memory_space<smem>>
    %181 = vector.broadcast %180 : f32 to vector<2x8x8xf32>
    %182 = arith.mulf %181, %179 : vector<2x8x8xf32>
    %c0_134 = arith.constant 0 : index
    %c8_135 = arith.constant 8 : index
    %c2_136 = arith.constant 2 : index
    %183 = vector.load %arg9[%c0_134, %c8_135, %c2_136] : memref<2x48x128xf32, #tpu.memory_space<vmem>>, vector<2x8x8xf32>
    %c35 = arith.constant 35 : index
    %184 = memref.load %arg0[%c35] : memref<90xf32, #tpu.memory_space<smem>>
    %185 = vector.broadcast %184 : f32 to vector<2x8x8xf32>
    %186 = arith.mulf %185, %183 : vector<2x8x8xf32>
    %c0_137 = arith.constant 0 : index
    %c9_138 = arith.constant 9 : index
    %c0_139 = arith.constant 0 : index
    %187 = vector.load %arg9[%c0_137, %c9_138, %c0_139] : memref<2x48x128xf32, #tpu.memory_space<vmem>>, vector<2x8x8xf32>
    %c36 = arith.constant 36 : index
    %188 = memref.load %arg0[%c36] : memref<90xf32, #tpu.memory_space<smem>>
    %189 = vector.broadcast %188 : f32 to vector<2x8x8xf32>
    %190 = arith.mulf %189, %187 : vector<2x8x8xf32>
    %c0_140 = arith.constant 0 : index
    %c9_141 = arith.constant 9 : index
    %c1_142 = arith.constant 1 : index
    %191 = vector.load %arg9[%c0_140, %c9_141, %c1_142] : memref<2x48x128xf32, #tpu.memory_space<vmem>>, vector<2x8x8xf32>
    %c37 = arith.constant 37 : index
    %192 = memref.load %arg0[%c37] : memref<90xf32, #tpu.memory_space<smem>>
    %193 = vector.broadcast %192 : f32 to vector<2x8x8xf32>
    %194 = arith.mulf %193, %191 : vector<2x8x8xf32>
    %c0_143 = arith.constant 0 : index
    %c9_144 = arith.constant 9 : index
    %c2_145 = arith.constant 2 : index
    %195 = vector.load %arg9[%c0_143, %c9_144, %c2_145] : memref<2x48x128xf32, #tpu.memory_space<vmem>>, vector<2x8x8xf32>
    %c38 = arith.constant 38 : index
    %196 = memref.load %arg0[%c38] : memref<90xf32, #tpu.memory_space<smem>>
    %197 = vector.broadcast %196 : f32 to vector<2x8x8xf32>
    %198 = arith.mulf %197, %195 : vector<2x8x8xf32>
    %c39 = arith.constant 39 : index
    %199 = memref.load %arg0[%c39] : memref<90xf32, #tpu.memory_space<smem>>
    %200 = vector.broadcast %199 : f32 to vector<2x8x8xf32>
    %201 = arith.addf %198, %200 : vector<2x8x8xf32>
    %202 = arith.addf %166, %170 : vector<2x8x8xf32>
    %203 = arith.addf %174, %178 : vector<2x8x8xf32>
    %204 = arith.addf %182, %186 : vector<2x8x8xf32>
    %205 = arith.addf %190, %194 : vector<2x8x8xf32>
    %206 = arith.addf %202, %203 : vector<2x8x8xf32>
    %207 = arith.addf %204, %205 : vector<2x8x8xf32>
    %208 = arith.addf %206, %207 : vector<2x8x8xf32>
    %209 = arith.addf %208, %201 : vector<2x8x8xf32>
    %cst_146 = arith.constant 0.000000e+00 : f32
    %210 = vector.broadcast %cst_146 : f32 to vector<2x8x8xf32>
    %211 = arith.maximumf %209, %210 : vector<2x8x8xf32>
    %c0_147 = arith.constant 0 : index
    %c8_148 = arith.constant 8 : index
    %c1_149 = arith.constant 1 : index
    %212 = vector.load %arg9[%c0_147, %c8_148, %c1_149] : memref<2x48x128xf32, #tpu.memory_space<vmem>>, vector<2x8x8xf32>
    tpu.vector_store %arg9[%c0_147, %c8_148, %c1_149], %211 {strides = array<i32>} : memref<2x48x128xf32, #tpu.memory_space<vmem>>, vector<2x8x8xf32>,
    %c0_150 = arith.constant 0 : index
    %c7_151 = arith.constant 7 : index
    %c0_152 = arith.constant 0 : index
    %213 = vector.load %arg9[%c0_150, %c7_151, %c0_152] : memref<2x48x128xf32, #tpu.memory_space<vmem>>, vector<2x8x8xf32>
    %c40 = arith.constant 40 : index
    %214 = memref.load %arg0[%c40] : memref<90xf32, #tpu.memory_space<smem>>
    %215 = vector.broadcast %214 : f32 to vector<2x8x8xf32>
    %216 = arith.mulf %215, %213 : vector<2x8x8xf32>
    %c0_153 = arith.constant 0 : index
    %c7_154 = arith.constant 7 : index
    %c1_155 = arith.constant 1 : index
    %217 = vector.load %arg9[%c0_153, %c7_154, %c1_155] : memref<2x48x128xf32, #tpu.memory_space<vmem>>, vector<2x8x8xf32>
    %c41 = arith.constant 41 : index
    %218 = memref.load %arg0[%c41] : memref<90xf32, #tpu.memory_space<smem>>
    %219 = vector.broadcast %218 : f32 to vector<2x8x8xf32>
    %220 = arith.mulf %219, %217 : vector<2x8x8xf32>
    %c0_156 = arith.constant 0 : index
    %c7_157 = arith.constant 7 : index
    %c2_158 = arith.constant 2 : index
    %221 = vector.load %arg9[%c0_156, %c7_157, %c2_158] : memref<2x48x128xf32, #tpu.memory_space<vmem>>, vector<2x8x8xf32>
    %c42 = arith.constant 42 : index
    %222 = memref.load %arg0[%c42] : memref<90xf32, #tpu.memory_space<smem>>
    %223 = vector.broadcast %222 : f32 to vector<2x8x8xf32>
    %224 = arith.mulf %223, %221 : vector<2x8x8xf32>
    %c0_159 = arith.constant 0 : index
    %c8_160 = arith.constant 8 : index
    %c0_161 = arith.constant 0 : index
    %225 = vector.load %arg9[%c0_159, %c8_160, %c0_161] : memref<2x48x128xf32, #tpu.memory_space<vmem>>, vector<2x8x8xf32>
    %c43 = arith.constant 43 : index
    %226 = memref.load %arg0[%c43] : memref<90xf32, #tpu.memory_space<smem>>
    %227 = vector.broadcast %226 : f32 to vector<2x8x8xf32>
    %228 = arith.mulf %227, %225 : vector<2x8x8xf32>
    %c0_162 = arith.constant 0 : index
    %c8_163 = arith.constant 8 : index
    %c1_164 = arith.constant 1 : index
    %229 = vector.load %arg9[%c0_162, %c8_163, %c1_164] : memref<2x48x128xf32, #tpu.memory_space<vmem>>, vector<2x8x8xf32>
    %c44 = arith.constant 44 : index
    %230 = memref.load %arg0[%c44] : memref<90xf32, #tpu.memory_space<smem>>
    %231 = vector.broadcast %230 : f32 to vector<2x8x8xf32>
    %232 = arith.mulf %231, %229 : vector<2x8x8xf32>
    %c0_165 = arith.constant 0 : index
    %c8_166 = arith.constant 8 : index
    %c2_167 = arith.constant 2 : index
    %233 = vector.load %arg9[%c0_165, %c8_166, %c2_167] : memref<2x48x128xf32, #tpu.memory_space<vmem>>, vector<2x8x8xf32>
    %c45 = arith.constant 45 : index
    %234 = memref.load %arg0[%c45] : memref<90xf32, #tpu.memory_space<smem>>
    %235 = vector.broadcast %234 : f32 to vector<2x8x8xf32>
    %236 = arith.mulf %235, %233 : vector<2x8x8xf32>
    %c0_168 = arith.constant 0 : index
    %c9_169 = arith.constant 9 : index
    %c0_170 = arith.constant 0 : index
    %237 = vector.load %arg9[%c0_168, %c9_169, %c0_170] : memref<2x48x128xf32, #tpu.memory_space<vmem>>, vector<2x8x8xf32>
    %c46 = arith.constant 46 : index
    %238 = memref.load %arg0[%c46] : memref<90xf32, #tpu.memory_space<smem>>
    %239 = vector.broadcast %238 : f32 to vector<2x8x8xf32>
    %240 = arith.mulf %239, %237 : vector<2x8x8xf32>
    %c0_171 = arith.constant 0 : index
    %c9_172 = arith.constant 9 : index
    %c1_173 = arith.constant 1 : index
    %241 = vector.load %arg9[%c0_171, %c9_172, %c1_173] : memref<2x48x128xf32, #tpu.memory_space<vmem>>, vector<2x8x8xf32>
    %c47 = arith.constant 47 : index
    %242 = memref.load %arg0[%c47] : memref<90xf32, #tpu.memory_space<smem>>
    %243 = vector.broadcast %242 : f32 to vector<2x8x8xf32>
    %244 = arith.mulf %243, %241 : vector<2x8x8xf32>
    %c0_174 = arith.constant 0 : index
    %c9_175 = arith.constant 9 : index
    %c2_176 = arith.constant 2 : index
    %245 = vector.load %arg9[%c0_174, %c9_175, %c2_176] : memref<2x48x128xf32, #tpu.memory_space<vmem>>, vector<2x8x8xf32>
    %c48 = arith.constant 48 : index
    %246 = memref.load %arg0[%c48] : memref<90xf32, #tpu.memory_space<smem>>
    %247 = vector.broadcast %246 : f32 to vector<2x8x8xf32>
    %248 = arith.mulf %247, %245 : vector<2x8x8xf32>
    %c49 = arith.constant 49 : index
    %249 = memref.load %arg0[%c49] : memref<90xf32, #tpu.memory_space<smem>>
    %250 = vector.broadcast %249 : f32 to vector<2x8x8xf32>
    %251 = arith.addf %248, %250 : vector<2x8x8xf32>
    %252 = arith.addf %216, %220 : vector<2x8x8xf32>
    %253 = arith.addf %224, %228 : vector<2x8x8xf32>
    %254 = arith.addf %232, %236 : vector<2x8x8xf32>
    %255 = arith.addf %240, %244 : vector<2x8x8xf32>
    %256 = arith.addf %252, %253 : vector<2x8x8xf32>
    %257 = arith.addf %254, %255 : vector<2x8x8xf32>
    %258 = arith.addf %256, %257 : vector<2x8x8xf32>
    %259 = arith.addf %258, %251 : vector<2x8x8xf32>
    %260 = arith.addf %259, %159 : vector<2x8x8xf32>
    %c0_177 = arith.constant 0 : index
    %c8_178 = arith.constant 8 : index
    %c1_179 = arith.constant 1 : index
    %261 = vector.load %arg9[%c0_177, %c8_178, %c1_179] : memref<2x48x128xf32, #tpu.memory_space<vmem>>, vector<2x8x8xf32>
    tpu.vector_store %arg9[%c0_177, %c8_178, %c1_179], %260 {strides = array<i32>} : memref<2x48x128xf32, #tpu.memory_space<vmem>>, vector<2x8x8xf32>,
    %c0_180 = arith.constant 0 : index
    %c8_181 = arith.constant 8 : index
    %c1_182 = arith.constant 1 : index
    %262 = vector.load %arg9[%c0_180, %c8_181, %c1_182] : memref<2x48x128xf32, #tpu.memory_space<vmem>>, vector<2x32x32xf32>
    %c2_183 = arith.constant 2 : index
    %c0_184 = arith.constant 0 : index
    %c0_185 = arith.constant 0 : index
    %c0_186 = arith.constant 0 : index
    %263 = vector.load %arg1[%c2_183, %c0_184, %c0_185, %c0_186] : memref<6x2x32x32xf32, #tpu.memory_space<vmem>>, vector<1x2x32x32xf32>
    %264 = vector.shape_cast %263 : vector<1x2x32x32xf32> to vector<2x32x32xf32>
    %cst_187 = arith.constant dense<0.000000e+00> : vector<2x32x32xf32>
    %265 = tpu.matmul %264, %262, %cst_187 {dimension_numbers = #tpu.dot_dimension_numbers<[2], [1], [1], [2], [0, 0, 0, 1, 1, 2], [0], [0]>, precision = #tpu.contract_precision<fp32>} : vector<2x32x32xf32>, vector<2x32x32xf32>, vector<2x32x32xf32> -> vector<2x32x32xf32>
    %c3 = arith.constant 3 : index
    %c0_188 = arith.constant 0 : index
    %c0_189 = arith.constant 0 : index
    %c0_190 = arith.constant 0 : index
    %266 = vector.load %arg1[%c3, %c0_188, %c0_189, %c0_190] : memref<6x2x32x32xf32, #tpu.memory_space<vmem>>, vector<1x2x32x32xf32>
    %267 = vector.shape_cast %266 : vector<1x2x32x32xf32> to vector<2x32x32xf32>
    %cst_191 = arith.constant dense<0.000000e+00> : vector<2x32x32xf32>
    %268 = tpu.matmul %265, %267, %cst_191 {dimension_numbers = #tpu.dot_dimension_numbers<[2], [1], [1], [2], [0, 0, 0, 1, 1, 2], [0], [0]>, precision = #tpu.contract_precision<fp32>} : vector<2x32x32xf32>, vector<2x32x32xf32>, vector<2x32x32xf32> -> vector<2x32x32xf32>
    %c0_192 = arith.constant 0 : index
    %c8_193 = arith.constant 8 : index
    %c1_194 = arith.constant 1 : index
    %269 = vector.load %arg9[%c0_192, %c8_193, %c1_194] : memref<2x48x128xf32, #tpu.memory_space<vmem>>, vector<2x32x32xf32>
    tpu.vector_store %arg9[%c0_192, %c8_193, %c1_194], %268 {strides = array<i32>} : memref<2x48x128xf32, #tpu.memory_space<vmem>>, vector<2x32x32xf32>,
    %c0_195 = arith.constant 0 : index
    %c7_196 = arith.constant 7 : index
    %c0_197 = arith.constant 0 : index
    %270 = vector.load %arg9[%c0_195, %c7_196, %c0_197] : memref<2x48x128xf32, #tpu.memory_space<vmem>>, vector<2x16x16xf32>
    %c50 = arith.constant 50 : index
    %271 = memref.load %arg0[%c50] : memref<90xf32, #tpu.memory_space<smem>>
    %272 = vector.broadcast %271 : f32 to vector<2x16x16xf32>
    %273 = arith.mulf %272, %270 : vector<2x16x16xf32>
    %c0_198 = arith.constant 0 : index
    %c7_199 = arith.constant 7 : index
    %c1_200 = arith.constant 1 : index
    %274 = vector.load %arg9[%c0_198, %c7_199, %c1_200] : memref<2x48x128xf32, #tpu.memory_space<vmem>>, vector<2x16x16xf32>
    %c51 = arith.constant 51 : index
    %275 = memref.load %arg0[%c51] : memref<90xf32, #tpu.memory_space<smem>>
    %276 = vector.broadcast %275 : f32 to vector<2x16x16xf32>
    %277 = arith.mulf %276, %274 : vector<2x16x16xf32>
    %c0_201 = arith.constant 0 : index
    %c7_202 = arith.constant 7 : index
    %c2_203 = arith.constant 2 : index
    %278 = vector.load %arg9[%c0_201, %c7_202, %c2_203] : memref<2x48x128xf32, #tpu.memory_space<vmem>>, vector<2x16x16xf32>
    %c52 = arith.constant 52 : index
    %279 = memref.load %arg0[%c52] : memref<90xf32, #tpu.memory_space<smem>>
    %280 = vector.broadcast %279 : f32 to vector<2x16x16xf32>
    %281 = arith.mulf %280, %278 : vector<2x16x16xf32>
    %c0_204 = arith.constant 0 : index
    %c8_205 = arith.constant 8 : index
    %c0_206 = arith.constant 0 : index
    %282 = vector.load %arg9[%c0_204, %c8_205, %c0_206] : memref<2x48x128xf32, #tpu.memory_space<vmem>>, vector<2x16x16xf32>
    %c53 = arith.constant 53 : index
    %283 = memref.load %arg0[%c53] : memref<90xf32, #tpu.memory_space<smem>>
    %284 = vector.broadcast %283 : f32 to vector<2x16x16xf32>
    %285 = arith.mulf %284, %282 : vector<2x16x16xf32>
    %c0_207 = arith.constant 0 : index
    %c8_208 = arith.constant 8 : index
    %c1_209 = arith.constant 1 : index
    %286 = vector.load %arg9[%c0_207, %c8_208, %c1_209] : memref<2x48x128xf32, #tpu.memory_space<vmem>>, vector<2x16x16xf32>
    %c54 = arith.constant 54 : index
    %287 = memref.load %arg0[%c54] : memref<90xf32, #tpu.memory_space<smem>>
    %288 = vector.broadcast %287 : f32 to vector<2x16x16xf32>
    %289 = arith.mulf %288, %286 : vector<2x16x16xf32>
    %c0_210 = arith.constant 0 : index
    %c8_211 = arith.constant 8 : index
    %c2_212 = arith.constant 2 : index
    %290 = vector.load %arg9[%c0_210, %c8_211, %c2_212] : memref<2x48x128xf32, #tpu.memory_space<vmem>>, vector<2x16x16xf32>
    %c55 = arith.constant 55 : index
    %291 = memref.load %arg0[%c55] : memref<90xf32, #tpu.memory_space<smem>>
    %292 = vector.broadcast %291 : f32 to vector<2x16x16xf32>
    %293 = arith.mulf %292, %290 : vector<2x16x16xf32>
    %c0_213 = arith.constant 0 : index
    %c9_214 = arith.constant 9 : index
    %c0_215 = arith.constant 0 : index
    %294 = vector.load %arg9[%c0_213, %c9_214, %c0_215] : memref<2x48x128xf32, #tpu.memory_space<vmem>>, vector<2x16x16xf32>
    %c56 = arith.constant 56 : index
    %295 = memref.load %arg0[%c56] : memref<90xf32, #tpu.memory_space<smem>>
    %296 = vector.broadcast %295 : f32 to vector<2x16x16xf32>
    %297 = arith.mulf %296, %294 : vector<2x16x16xf32>
    %c0_216 = arith.constant 0 : index
    %c9_217 = arith.constant 9 : index
    %c1_218 = arith.constant 1 : index
    %298 = vector.load %arg9[%c0_216, %c9_217, %c1_218] : memref<2x48x128xf32, #tpu.memory_space<vmem>>, vector<2x16x16xf32>
    %c57 = arith.constant 57 : index
    %299 = memref.load %arg0[%c57] : memref<90xf32, #tpu.memory_space<smem>>
    %300 = vector.broadcast %299 : f32 to vector<2x16x16xf32>
    %301 = arith.mulf %300, %298 : vector<2x16x16xf32>
    %c0_219 = arith.constant 0 : index
    %c9_220 = arith.constant 9 : index
    %c2_221 = arith.constant 2 : index
    %302 = vector.load %arg9[%c0_219, %c9_220, %c2_221] : memref<2x48x128xf32, #tpu.memory_space<vmem>>, vector<2x16x16xf32>
    %c58 = arith.constant 58 : index
    %303 = memref.load %arg0[%c58] : memref<90xf32, #tpu.memory_space<smem>>
    %304 = vector.broadcast %303 : f32 to vector<2x16x16xf32>
    %305 = arith.mulf %304, %302 : vector<2x16x16xf32>
    %c59 = arith.constant 59 : index
    %306 = memref.load %arg0[%c59] : memref<90xf32, #tpu.memory_space<smem>>
    %307 = vector.broadcast %306 : f32 to vector<2x16x16xf32>
    %308 = arith.addf %305, %307 : vector<2x16x16xf32>
    %309 = arith.addf %273, %277 : vector<2x16x16xf32>
    %310 = arith.addf %281, %285 : vector<2x16x16xf32>
    %311 = arith.addf %289, %293 : vector<2x16x16xf32>
    %312 = arith.addf %297, %301 : vector<2x16x16xf32>
    %313 = arith.addf %309, %310 : vector<2x16x16xf32>
    %314 = arith.addf %311, %312 : vector<2x16x16xf32>
    %315 = arith.addf %313, %314 : vector<2x16x16xf32>
    %316 = arith.addf %315, %308 : vector<2x16x16xf32>
    %317 = arith.addf %316, %161 : vector<2x16x16xf32>
    %c0_222 = arith.constant 0 : index
    %c0_223 = arith.constant 0 : index
    %c0_224 = arith.constant 0 : index
    %318 = vector.load %arg7[%c0_222, %c0_223, %c0_224] : memref<2x16x16xf32, #tpu.memory_space<vmem>>, vector<2x16x16xf32>
    tpu.vector_store %arg7[%c0_222, %c0_223, %c0_224], %317 {strides = array<i32>} : memref<2x16x16xf32, #tpu.memory_space<vmem>>, vector<2x16x16xf32>,
    %c0_225 = arith.constant 0 : index
    %c0_226 = arith.constant 0 : index
    %c0_227 = arith.constant 0 : index
    %319 = vector.load %arg2[%c0_225, %c0_226, %c0_227] : memref<2x32x32xf32, #tpu.memory_space<vmem>>, vector<2x32x32xf32>
    %c0_228 = arith.constant 0 : index
    %c8_229 = arith.constant 8 : index
    %c1_230 = arith.constant 1 : index
    %320 = vector.load %arg9[%c0_228, %c8_229, %c1_230] : memref<2x48x128xf32, #tpu.memory_space<vmem>>, vector<2x16x16xf32>
    tpu.vector_store %arg9[%c0_228, %c8_229, %c1_230], %317 {strides = array<i32>} : memref<2x48x128xf32, #tpu.memory_space<vmem>>, vector<2x16x16xf32>,
    %c0_231 = arith.constant 0 : index
    %c7_232 = arith.constant 7 : index
    %c0_233 = arith.constant 0 : index
    %321 = vector.load %arg9[%c0_231, %c7_232, %c0_233] : memref<2x48x128xf32, #tpu.memory_space<vmem>>, vector<2x16x16xf32>
    %c0_234 = arith.constant 0 : index
    %322 = memref.load %arg0[%c0_234] : memref<90xf32, #tpu.memory_space<smem>>
    %323 = vector.broadcast %322 : f32 to vector<2x16x16xf32>
    %324 = arith.mulf %323, %321 : vector<2x16x16xf32>
    %c0_235 = arith.constant 0 : index
    %c7_236 = arith.constant 7 : index
    %c1_237 = arith.constant 1 : index
    %325 = vector.load %arg9[%c0_235, %c7_236, %c1_237] : memref<2x48x128xf32, #tpu.memory_space<vmem>>, vector<2x16x16xf32>
    %c1_238 = arith.constant 1 : index
    %326 = memref.load %arg0[%c1_238] : memref<90xf32, #tpu.memory_space<smem>>
    %327 = vector.broadcast %326 : f32 to vector<2x16x16xf32>
    %328 = arith.mulf %327, %325 : vector<2x16x16xf32>
    %c0_239 = arith.constant 0 : index
    %c7_240 = arith.constant 7 : index
    %c2_241 = arith.constant 2 : index
    %329 = vector.load %arg9[%c0_239, %c7_240, %c2_241] : memref<2x48x128xf32, #tpu.memory_space<vmem>>, vector<2x16x16xf32>
    %c2_242 = arith.constant 2 : index
    %330 = memref.load %arg0[%c2_242] : memref<90xf32, #tpu.memory_space<smem>>
    %331 = vector.broadcast %330 : f32 to vector<2x16x16xf32>
    %332 = arith.mulf %331, %329 : vector<2x16x16xf32>
    %c0_243 = arith.constant 0 : index
    %c8_244 = arith.constant 8 : index
    %c0_245 = arith.constant 0 : index
    %333 = vector.load %arg9[%c0_243, %c8_244, %c0_245] : memref<2x48x128xf32, #tpu.memory_space<vmem>>, vector<2x16x16xf32>
    %c3_246 = arith.constant 3 : index
    %334 = memref.load %arg0[%c3_246] : memref<90xf32, #tpu.memory_space<smem>>
    %335 = vector.broadcast %334 : f32 to vector<2x16x16xf32>
    %336 = arith.mulf %335, %333 : vector<2x16x16xf32>
    %c0_247 = arith.constant 0 : index
    %c8_248 = arith.constant 8 : index
    %c1_249 = arith.constant 1 : index
    %337 = vector.load %arg9[%c0_247, %c8_248, %c1_249] : memref<2x48x128xf32, #tpu.memory_space<vmem>>, vector<2x16x16xf32>
    %c4 = arith.constant 4 : index
    %338 = memref.load %arg0[%c4] : memref<90xf32, #tpu.memory_space<smem>>
    %339 = vector.broadcast %338 : f32 to vector<2x16x16xf32>
    %340 = arith.mulf %339, %337 : vector<2x16x16xf32>
    %c0_250 = arith.constant 0 : index
    %c8_251 = arith.constant 8 : index
    %c2_252 = arith.constant 2 : index
    %341 = vector.load %arg9[%c0_250, %c8_251, %c2_252] : memref<2x48x128xf32, #tpu.memory_space<vmem>>, vector<2x16x16xf32>
    %c5 = arith.constant 5 : index
    %342 = memref.load %arg0[%c5] : memref<90xf32, #tpu.memory_space<smem>>
    %343 = vector.broadcast %342 : f32 to vector<2x16x16xf32>
    %344 = arith.mulf %343, %341 : vector<2x16x16xf32>
    %c0_253 = arith.constant 0 : index
    %c9_254 = arith.constant 9 : index
    %c0_255 = arith.constant 0 : index
    %345 = vector.load %arg9[%c0_253, %c9_254, %c0_255] : memref<2x48x128xf32, #tpu.memory_space<vmem>>, vector<2x16x16xf32>
    %c6 = arith.constant 6 : index
    %346 = memref.load %arg0[%c6] : memref<90xf32, #tpu.memory_space<smem>>
    %347 = vector.broadcast %346 : f32 to vector<2x16x16xf32>
    %348 = arith.mulf %347, %345 : vector<2x16x16xf32>
    %c0_256 = arith.constant 0 : index
    %c9_257 = arith.constant 9 : index
    %c1_258 = arith.constant 1 : index
    %349 = vector.load %arg9[%c0_256, %c9_257, %c1_258] : memref<2x48x128xf32, #tpu.memory_space<vmem>>, vector<2x16x16xf32>
    %c7_259 = arith.constant 7 : index
    %350 = memref.load %arg0[%c7_259] : memref<90xf32, #tpu.memory_space<smem>>
    %351 = vector.broadcast %350 : f32 to vector<2x16x16xf32>
    %352 = arith.mulf %351, %349 : vector<2x16x16xf32>
    %c0_260 = arith.constant 0 : index
    %c9_261 = arith.constant 9 : index
    %c2_262 = arith.constant 2 : index
    %353 = vector.load %arg9[%c0_260, %c9_261, %c2_262] : memref<2x48x128xf32, #tpu.memory_space<vmem>>, vector<2x16x16xf32>
    %c8_263 = arith.constant 8 : index
    %354 = memref.load %arg0[%c8_263] : memref<90xf32, #tpu.memory_space<smem>>
    %355 = vector.broadcast %354 : f32 to vector<2x16x16xf32>
    %356 = arith.mulf %355, %353 : vector<2x16x16xf32>
    %c9_264 = arith.constant 9 : index
    %357 = memref.load %arg0[%c9_264] : memref<90xf32, #tpu.memory_space<smem>>
    %358 = vector.broadcast %357 : f32 to vector<2x16x16xf32>
    %359 = arith.addf %356, %358 : vector<2x16x16xf32>
    %360 = arith.addf %324, %328 : vector<2x16x16xf32>
    %361 = arith.addf %332, %336 : vector<2x16x16xf32>
    %362 = arith.addf %340, %344 : vector<2x16x16xf32>
    %363 = arith.addf %348, %352 : vector<2x16x16xf32>
    %364 = arith.addf %360, %361 : vector<2x16x16xf32>
    %365 = arith.addf %362, %363 : vector<2x16x16xf32>
    %366 = arith.addf %364, %365 : vector<2x16x16xf32>
    %367 = arith.addf %366, %359 : vector<2x16x16xf32>
    %cst_265 = arith.constant 0.000000e+00 : f32
    %368 = vector.broadcast %cst_265 : f32 to vector<2x16x16xf32>
    %369 = arith.maximumf %367, %368 : vector<2x16x16xf32>
    %c0_266 = arith.constant 0 : index
    %c8_267 = arith.constant 8 : index
    %c1_268 = arith.constant 1 : index
    %370 = vector.load %arg9[%c0_266, %c8_267, %c1_268] : memref<2x48x128xf32, #tpu.memory_space<vmem>>, vector<2x16x16xf32>
    tpu.vector_store %arg9[%c0_266, %c8_267, %c1_268], %369 {strides = array<i32>} : memref<2x48x128xf32, #tpu.memory_space<vmem>>, vector<2x16x16xf32>,
    %c0_269 = arith.constant 0 : index
    %c7_270 = arith.constant 7 : index
    %c0_271 = arith.constant 0 : index
    %371 = vector.load %arg9[%c0_269, %c7_270, %c0_271] : memref<2x48x128xf32, #tpu.memory_space<vmem>>, vector<2x16x16xf32>
    %c10 = arith.constant 10 : index
    %372 = memref.load %arg0[%c10] : memref<90xf32, #tpu.memory_space<smem>>
    %373 = vector.broadcast %372 : f32 to vector<2x16x16xf32>
    %374 = arith.mulf %373, %371 : vector<2x16x16xf32>
    %c0_272 = arith.constant 0 : index
    %c7_273 = arith.constant 7 : index
    %c1_274 = arith.constant 1 : index
    %375 = vector.load %arg9[%c0_272, %c7_273, %c1_274] : memref<2x48x128xf32, #tpu.memory_space<vmem>>, vector<2x16x16xf32>
    %c11 = arith.constant 11 : index
    %376 = memref.load %arg0[%c11] : memref<90xf32, #tpu.memory_space<smem>>
    %377 = vector.broadcast %376 : f32 to vector<2x16x16xf32>
    %378 = arith.mulf %377, %375 : vector<2x16x16xf32>
    %c0_275 = arith.constant 0 : index
    %c7_276 = arith.constant 7 : index
    %c2_277 = arith.constant 2 : index
    %379 = vector.load %arg9[%c0_275, %c7_276, %c2_277] : memref<2x48x128xf32, #tpu.memory_space<vmem>>, vector<2x16x16xf32>
    %c12 = arith.constant 12 : index
    %380 = memref.load %arg0[%c12] : memref<90xf32, #tpu.memory_space<smem>>
    %381 = vector.broadcast %380 : f32 to vector<2x16x16xf32>
    %382 = arith.mulf %381, %379 : vector<2x16x16xf32>
    %c0_278 = arith.constant 0 : index
    %c8_279 = arith.constant 8 : index
    %c0_280 = arith.constant 0 : index
    %383 = vector.load %arg9[%c0_278, %c8_279, %c0_280] : memref<2x48x128xf32, #tpu.memory_space<vmem>>, vector<2x16x16xf32>
    %c13 = arith.constant 13 : index
    %384 = memref.load %arg0[%c13] : memref<90xf32, #tpu.memory_space<smem>>
    %385 = vector.broadcast %384 : f32 to vector<2x16x16xf32>
    %386 = arith.mulf %385, %383 : vector<2x16x16xf32>
    %c0_281 = arith.constant 0 : index
    %c8_282 = arith.constant 8 : index
    %c1_283 = arith.constant 1 : index
    %387 = vector.load %arg9[%c0_281, %c8_282, %c1_283] : memref<2x48x128xf32, #tpu.memory_space<vmem>>, vector<2x16x16xf32>
    %c14 = arith.constant 14 : index
    %388 = memref.load %arg0[%c14] : memref<90xf32, #tpu.memory_space<smem>>
    %389 = vector.broadcast %388 : f32 to vector<2x16x16xf32>
    %390 = arith.mulf %389, %387 : vector<2x16x16xf32>
    %c0_284 = arith.constant 0 : index
    %c8_285 = arith.constant 8 : index
    %c2_286 = arith.constant 2 : index
    %391 = vector.load %arg9[%c0_284, %c8_285, %c2_286] : memref<2x48x128xf32, #tpu.memory_space<vmem>>, vector<2x16x16xf32>
    %c15 = arith.constant 15 : index
    %392 = memref.load %arg0[%c15] : memref<90xf32, #tpu.memory_space<smem>>
    %393 = vector.broadcast %392 : f32 to vector<2x16x16xf32>
    %394 = arith.mulf %393, %391 : vector<2x16x16xf32>
    %c0_287 = arith.constant 0 : index
    %c9_288 = arith.constant 9 : index
    %c0_289 = arith.constant 0 : index
    %395 = vector.load %arg9[%c0_287, %c9_288, %c0_289] : memref<2x48x128xf32, #tpu.memory_space<vmem>>, vector<2x16x16xf32>
    %c16 = arith.constant 16 : index
    %396 = memref.load %arg0[%c16] : memref<90xf32, #tpu.memory_space<smem>>
    %397 = vector.broadcast %396 : f32 to vector<2x16x16xf32>
    %398 = arith.mulf %397, %395 : vector<2x16x16xf32>
    %c0_290 = arith.constant 0 : index
    %c9_291 = arith.constant 9 : index
    %c1_292 = arith.constant 1 : index
    %399 = vector.load %arg9[%c0_290, %c9_291, %c1_292] : memref<2x48x128xf32, #tpu.memory_space<vmem>>, vector<2x16x16xf32>
    %c17 = arith.constant 17 : index
    %400 = memref.load %arg0[%c17] : memref<90xf32, #tpu.memory_space<smem>>
    %401 = vector.broadcast %400 : f32 to vector<2x16x16xf32>
    %402 = arith.mulf %401, %399 : vector<2x16x16xf32>
    %c0_293 = arith.constant 0 : index
    %c9_294 = arith.constant 9 : index
    %c2_295 = arith.constant 2 : index
    %403 = vector.load %arg9[%c0_293, %c9_294, %c2_295] : memref<2x48x128xf32, #tpu.memory_space<vmem>>, vector<2x16x16xf32>
    %c18 = arith.constant 18 : index
    %404 = memref.load %arg0[%c18] : memref<90xf32, #tpu.memory_space<smem>>
    %405 = vector.broadcast %404 : f32 to vector<2x16x16xf32>
    %406 = arith.mulf %405, %403 : vector<2x16x16xf32>
    %c19 = arith.constant 19 : index
    %407 = memref.load %arg0[%c19] : memref<90xf32, #tpu.memory_space<smem>>
    %408 = vector.broadcast %407 : f32 to vector<2x16x16xf32>
    %409 = arith.addf %406, %408 : vector<2x16x16xf32>
    %410 = arith.addf %374, %378 : vector<2x16x16xf32>
    %411 = arith.addf %382, %386 : vector<2x16x16xf32>
    %412 = arith.addf %390, %394 : vector<2x16x16xf32>
    %413 = arith.addf %398, %402 : vector<2x16x16xf32>
    %414 = arith.addf %410, %411 : vector<2x16x16xf32>
    %415 = arith.addf %412, %413 : vector<2x16x16xf32>
    %416 = arith.addf %414, %415 : vector<2x16x16xf32>
    %417 = arith.addf %416, %409 : vector<2x16x16xf32>
    %418 = arith.addf %417, %317 : vector<2x16x16xf32>
    %c0_296 = arith.constant 0 : index
    %c8_297 = arith.constant 8 : index
    %c1_298 = arith.constant 1 : index
    %419 = vector.load %arg9[%c0_296, %c8_297, %c1_298] : memref<2x48x128xf32, #tpu.memory_space<vmem>>, vector<2x16x16xf32>
    tpu.vector_store %arg9[%c0_296, %c8_297, %c1_298], %418 {strides = array<i32>} : memref<2x48x128xf32, #tpu.memory_space<vmem>>, vector<2x16x16xf32>,
    %c0_299 = arith.constant 0 : index
    %c8_300 = arith.constant 8 : index
    %c1_301 = arith.constant 1 : index
    %420 = vector.load %arg9[%c0_299, %c8_300, %c1_301] : memref<2x48x128xf32, #tpu.memory_space<vmem>>, vector<2x32x32xf32>
    %c4_302 = arith.constant 4 : index
    %c0_303 = arith.constant 0 : index
    %c0_304 = arith.constant 0 : index
    %c0_305 = arith.constant 0 : index
    %421 = vector.load %arg1[%c4_302, %c0_303, %c0_304, %c0_305] : memref<6x2x32x32xf32, #tpu.memory_space<vmem>>, vector<1x2x32x32xf32>
    %422 = vector.shape_cast %421 : vector<1x2x32x32xf32> to vector<2x32x32xf32>
    %cst_306 = arith.constant dense<0.000000e+00> : vector<2x32x32xf32>
    %423 = tpu.matmul %422, %420, %cst_306 {dimension_numbers = #tpu.dot_dimension_numbers<[2], [1], [1], [2], [0, 0, 0, 1, 1, 2], [0], [0]>, precision = #tpu.contract_precision<fp32>} : vector<2x32x32xf32>, vector<2x32x32xf32>, vector<2x32x32xf32> -> vector<2x32x32xf32>
    %c5_307 = arith.constant 5 : index
    %c0_308 = arith.constant 0 : index
    %c0_309 = arith.constant 0 : index
    %c0_310 = arith.constant 0 : index
    %424 = vector.load %arg1[%c5_307, %c0_308, %c0_309, %c0_310] : memref<6x2x32x32xf32, #tpu.memory_space<vmem>>, vector<1x2x32x32xf32>
    %425 = vector.shape_cast %424 : vector<1x2x32x32xf32> to vector<2x32x32xf32>
    %cst_311 = arith.constant dense<0.000000e+00> : vector<2x32x32xf32>
    %426 = tpu.matmul %423, %425, %cst_311 {dimension_numbers = #tpu.dot_dimension_numbers<[2], [1], [1], [2], [0, 0, 0, 1, 1, 2], [0], [0]>, precision = #tpu.contract_precision<fp32>} : vector<2x32x32xf32>, vector<2x32x32xf32>, vector<2x32x32xf32> -> vector<2x32x32xf32>
    %c0_312 = arith.constant 0 : index
    %c8_313 = arith.constant 8 : index
    %c1_314 = arith.constant 1 : index
    %427 = vector.load %arg9[%c0_312, %c8_313, %c1_314] : memref<2x48x128xf32, #tpu.memory_space<vmem>>, vector<2x32x32xf32>
    tpu.vector_store %arg9[%c0_312, %c8_313, %c1_314], %426 {strides = array<i32>} : memref<2x48x128xf32, #tpu.memory_space<vmem>>, vector<2x32x32xf32>,
    %c0_315 = arith.constant 0 : index
    %c7_316 = arith.constant 7 : index
    %c0_317 = arith.constant 0 : index
    %428 = vector.load %arg9[%c0_315, %c7_316, %c0_317] : memref<2x48x128xf32, #tpu.memory_space<vmem>>, vector<2x32x32xf32>
    %c20 = arith.constant 20 : index
    %429 = memref.load %arg0[%c20] : memref<90xf32, #tpu.memory_space<smem>>
    %430 = vector.broadcast %429 : f32 to vector<2x32x32xf32>
    %431 = arith.mulf %430, %428 : vector<2x32x32xf32>
    %c0_318 = arith.constant 0 : index
    %c7_319 = arith.constant 7 : index
    %c1_320 = arith.constant 1 : index
    %432 = vector.load %arg9[%c0_318, %c7_319, %c1_320] : memref<2x48x128xf32, #tpu.memory_space<vmem>>, vector<2x32x32xf32>
    %c21 = arith.constant 21 : index
    %433 = memref.load %arg0[%c21] : memref<90xf32, #tpu.memory_space<smem>>
    %434 = vector.broadcast %433 : f32 to vector<2x32x32xf32>
    %435 = arith.mulf %434, %432 : vector<2x32x32xf32>
    %c0_321 = arith.constant 0 : index
    %c7_322 = arith.constant 7 : index
    %c2_323 = arith.constant 2 : index
    %436 = vector.load %arg9[%c0_321, %c7_322, %c2_323] : memref<2x48x128xf32, #tpu.memory_space<vmem>>, vector<2x32x32xf32>
    %c22 = arith.constant 22 : index
    %437 = memref.load %arg0[%c22] : memref<90xf32, #tpu.memory_space<smem>>
    %438 = vector.broadcast %437 : f32 to vector<2x32x32xf32>
    %439 = arith.mulf %438, %436 : vector<2x32x32xf32>
    %c0_324 = arith.constant 0 : index
    %c8_325 = arith.constant 8 : index
    %c0_326 = arith.constant 0 : index
    %440 = vector.load %arg9[%c0_324, %c8_325, %c0_326] : memref<2x48x128xf32, #tpu.memory_space<vmem>>, vector<2x32x32xf32>
    %c23 = arith.constant 23 : index
    %441 = memref.load %arg0[%c23] : memref<90xf32, #tpu.memory_space<smem>>
    %442 = vector.broadcast %441 : f32 to vector<2x32x32xf32>
    %443 = arith.mulf %442, %440 : vector<2x32x32xf32>
    %c0_327 = arith.constant 0 : index
    %c8_328 = arith.constant 8 : index
    %c1_329 = arith.constant 1 : index
    %444 = vector.load %arg9[%c0_327, %c8_328, %c1_329] : memref<2x48x128xf32, #tpu.memory_space<vmem>>, vector<2x32x32xf32>
    %c24 = arith.constant 24 : index
    %445 = memref.load %arg0[%c24] : memref<90xf32, #tpu.memory_space<smem>>
    %446 = vector.broadcast %445 : f32 to vector<2x32x32xf32>
    %447 = arith.mulf %446, %444 : vector<2x32x32xf32>
    %c0_330 = arith.constant 0 : index
    %c8_331 = arith.constant 8 : index
    %c2_332 = arith.constant 2 : index
    %448 = vector.load %arg9[%c0_330, %c8_331, %c2_332] : memref<2x48x128xf32, #tpu.memory_space<vmem>>, vector<2x32x32xf32>
    %c25 = arith.constant 25 : index
    %449 = memref.load %arg0[%c25] : memref<90xf32, #tpu.memory_space<smem>>
    %450 = vector.broadcast %449 : f32 to vector<2x32x32xf32>
    %451 = arith.mulf %450, %448 : vector<2x32x32xf32>
    %c0_333 = arith.constant 0 : index
    %c9_334 = arith.constant 9 : index
    %c0_335 = arith.constant 0 : index
    %452 = vector.load %arg9[%c0_333, %c9_334, %c0_335] : memref<2x48x128xf32, #tpu.memory_space<vmem>>, vector<2x32x32xf32>
    %c26 = arith.constant 26 : index
    %453 = memref.load %arg0[%c26] : memref<90xf32, #tpu.memory_space<smem>>
    %454 = vector.broadcast %453 : f32 to vector<2x32x32xf32>
    %455 = arith.mulf %454, %452 : vector<2x32x32xf32>
    %c0_336 = arith.constant 0 : index
    %c9_337 = arith.constant 9 : index
    %c1_338 = arith.constant 1 : index
    %456 = vector.load %arg9[%c0_336, %c9_337, %c1_338] : memref<2x48x128xf32, #tpu.memory_space<vmem>>, vector<2x32x32xf32>
    %c27 = arith.constant 27 : index
    %457 = memref.load %arg0[%c27] : memref<90xf32, #tpu.memory_space<smem>>
    %458 = vector.broadcast %457 : f32 to vector<2x32x32xf32>
    %459 = arith.mulf %458, %456 : vector<2x32x32xf32>
    %c0_339 = arith.constant 0 : index
    %c9_340 = arith.constant 9 : index
    %c2_341 = arith.constant 2 : index
    %460 = vector.load %arg9[%c0_339, %c9_340, %c2_341] : memref<2x48x128xf32, #tpu.memory_space<vmem>>, vector<2x32x32xf32>
    %c28 = arith.constant 28 : index
    %461 = memref.load %arg0[%c28] : memref<90xf32, #tpu.memory_space<smem>>
    %462 = vector.broadcast %461 : f32 to vector<2x32x32xf32>
    %463 = arith.mulf %462, %460 : vector<2x32x32xf32>
    %c29 = arith.constant 29 : index
    %464 = memref.load %arg0[%c29] : memref<90xf32, #tpu.memory_space<smem>>
    %465 = vector.broadcast %464 : f32 to vector<2x32x32xf32>
    %466 = arith.addf %463, %465 : vector<2x32x32xf32>
    %467 = arith.addf %431, %435 : vector<2x32x32xf32>
    %468 = arith.addf %439, %443 : vector<2x32x32xf32>
    %469 = arith.addf %447, %451 : vector<2x32x32xf32>
    %470 = arith.addf %455, %459 : vector<2x32x32xf32>
    %471 = arith.addf %467, %468 : vector<2x32x32xf32>
    %472 = arith.addf %469, %470 : vector<2x32x32xf32>
    %473 = arith.addf %471, %472 : vector<2x32x32xf32>
    %474 = arith.addf %473, %466 : vector<2x32x32xf32>
    %475 = arith.addf %474, %319 : vector<2x32x32xf32>
    %c0_342 = arith.constant 0 : index
    %c0_343 = arith.constant 0 : index
    %c0_344 = arith.constant 0 : index
    %476 = vector.load %arg6[%c0_342, %c0_343, %c0_344] : memref<2x32x32xf32, #tpu.memory_space<vmem>>, vector<2x32x32xf32>
    tpu.vector_store %arg6[%c0_342, %c0_343, %c0_344], %475 {strides = array<i32>} : memref<2x32x32xf32, #tpu.memory_space<vmem>>, vector<2x32x32xf32>,
    return
  }
}

</mosaic_0001>

<bundles_post_ra>
// kernel: decoder_forward.1
= control target key start
LH: loop header
LB: loop body
LE: loop exit
PB: predicated region body
PF: predicated region fallthrough
CT: control target
= control target key end

     0   :  { %14 = vsyncpa [#allocation6], 0  ;;  %s14828_s0 = inlined_call_operand.vmem [shape: f32[90], index: 0, kind: input, shape index: {}]   ;;  %s14829_s1 = inlined_call_operand.hbm [shape: f32[6,2,32,32], index: 1, kind: input, shape index: {}]   ;;  %s14830_s2 = inlined_call_operand.vmem [shape: f32[2,32,32], index: 2, kind: input, shape index: {}]   ;;  %s14831_s3 = inlined_call_operand.vmem [shape: f32[2,16,16], index: 3, kind: input, shape index: {}]   ;;  %s14832_s4 = inlined_call_operand.vmem [shape: f32[2,8,8], index: 4, kind: input, shape index: {}]   ;;  %s14833_s5 = inlined_call_operand.vmem [shape: f32[2,4,4], index: 5, kind: input, shape index: {}]   ;;  %s14834_s6 = inlined_call_operand.hbm [shape: f32[2,32,32], index: 6, kind: output, shape index: {0}]   ;;  %s14835_s7 = inlined_call_operand.hbm [shape: f32[2,16,16], index: 7, kind: output, shape index: {1}]   ;;  %s14836_s8 = inlined_call_operand.hbm [shape: f32[2,8,8], index: 8, kind: output, shape index: {2}]  }
   0x1   :  { %15 = vsyncpa [#allocation4], 0 }
   0x2   :  { %16 = vsyncpa [#allocation5], 0 }
   0x3   :  { %17 = vsyncpa [#allocation10], 0  ;;  %s24_s29 = sshll.u32 %s14828_s0, 4  ;;  %s25_s29 = int_to_ptr.vmem [resolvable:$true] %s24_s29 }
   0x4   :  { %s12394_s30 = scalar_lea.vmem %s25_s29, 16  ;;  %p12399_p1 = scmp.lt.s32.totalorder %s25_s29, %s25_s29 }
   0x5   :  { %p12395_p0 = scmp.ne.s32.totalorder %s25_s29, %s12394_s30  ;;  %p12400_p2 = scmp.lt.s32.totalorder %s12394_s30, %s12394_s30 }
   0x7   :  { %p12401_p3 = por %p12400_p2, %p12399_p1 }
   0x9   :  { %p12402_p4 = pnand %p12401_p3, %p12395_p0 }
   0xb   :  { %12405 = shalt.err (!%p12402_p4)
}
   0xc   :  { %s12502_s9 = smov [#allocation3]   ;;  %s12503_s10 = smov [#allocation7]  }
   0xd   :  { %27 = dma.vmem_to_smem %s25_s29, 16, %s12502_s9, [#allocation6]  }
   0xe   :  { %s33_s11 = sshll.u32 %s12503_s10, 4  ;;  %s12406_s14 = scalar_lea.hbm %s14829_s1, 6144  ;;  %s34_s11 = int_to_ptr.vmem [resolvable:$true] %s33_s11 }
   0xf   :  { %p12407_p5 = scmp.ne.s32.totalorder %s14829_s1, %s12406_s14  ;;  %p12410_p6 = scmp.lt.u32.totalorder %s12406_s14, %s14829_s1 }
  0x11   :  { %p12412_p7 = pnand %p12410_p6, %p12407_p5 }
  0x13   :  { %12415 = shalt.err (!%p12412_p7)
}
  0x14   :  { %s12416_s18 = scalar_lea.vmem %s34_s11, 6144  ;;  %p12421_p9 = scmp.lt.s32.totalorder %s34_s11, %s34_s11 }
  0x15   :  { %p12417_p8 = scmp.ne.s32.totalorder %s34_s11, %s12416_s18  ;;  %p12422_p10 = scmp.lt.s32.totalorder %s12416_s18, %s12416_s18 }
  0x17   :  { %p12423_p11 = por %p12422_p10, %p12421_p9 }
  0x19   :  { %p12424_p12 = pnand %p12423_p11, %p12417_p8 }
  0x1b   :  { %12427 = shalt.err (!%p12424_p12)
}
  0x1c   :  { %s12504_s19 = smov 128   ;;  %s12505_s20 = smov 8  }
  0x1d   :  { %39 = dma.hbm_to_vmem [thread:$0]  %s14829_s1, 6144, %s34_s11, [#allocation4], %s12504_s19, %s12504_s19, %s12505_s20  }
  0x1e   :  { %12494 = dma.done.wait [#allocation6], 16  }
  0x1f   :  { %12495 = vsyncadd [#allocation6], 4294967280 }
  0x20   :  { %12496 = dma.done.wait [#allocation4], 6144  }
  0x21   :  { %12497 = vsyncadd [#allocation4], 4294961152 }
  0x22   :  { %54 = sfence }
  0x23   :  { %v12580_v0 = vld [vmem:[%s14833_s5] sm:$0xf]  ;;  %s12506_s25 = smov 1   ;;  %v12587_v1 = vld [vmem:[%s14833_s5 + $0x4] sm:$0xf]  ;;  %v12507_v2 = vmov 0.0  }
  0x24   :  { %73 = vrot.lane.b32.xlu0 %v12580_v0, %s12506_s25  ;;  %55 = vst [vmem:[#allocation2] sm:$0xff] %v12507_v2  ;;  %56 = vst [vmem:[#allocation2 + $0x8] sm:$0xff] %v12507_v2  ;;  %vm79_vm0 = vcmask 35848   ;;  %s9885_s1 = sld [smem:[#allocation3 + $0x43]]  ;;  %s9881_s5 = sld [smem:[#allocation3 + $0x3f]]  ;;  %vm390_vm1 = vcmask 261120  }
  0x25   :  { %57 = vst [vmem:[#allocation2 + $0x10] sm:$0xff] %v12507_v2  ;;  %58 = vst [vmem:[#allocation2 + $0x18] sm:$0xff] %v12507_v2  ;;  %s9883_s28 = sld [smem:[#allocation3 + $0x41]]  ;;  %s12508_s29 = smov 127   ;;  %vm2952_vm2 = vcmask 269320   ;;  %vm3089_vm3 = vcmask 64512  }
  0x26   :  { %59 = vst [vmem:[#allocation2 + $0x20] sm:$0xff] %v12507_v2  ;;  %60 = vst [vmem:[#allocation2 + $0x28] sm:$0xff] %v12507_v2  ;;  %s12509_s30 = smov 2   ;;  %s9884_s9 = sld [smem:[#allocation3 + $0x42]]  ;;  %vm3104_vm4 = vcmask 72712   ;;  %vm6221_vm5 = vcmask 130048  }
  0x27   :  { %61 = vst [vmem:[#allocation2 + $0x30] sm:$0xff] %v12507_v2  ;;  %62 = vst [vmem:[#allocation2 + $0x38] sm:$0xff] %v12507_v2  ;;  %s9879_s10 = sld [smem:[#allocation3 + $0x3d]]  ;;  %s9880_s11 = sld [smem:[#allocation3 + $0x3e]]  ;;  %vm6250_vm6 = vcmask 138248  }
  0x28   :  { %63 = vst [vmem:[#allocation2 + $0x40] sm:$0xff] %v12507_v2  ;;  %64 = vst [vmem:[#allocation2 + $0x48] sm:$0xff] %v12507_v2  ;;  %75 = vrot.lane.b32.xlu0 %v12587_v1, %s12506_s25  ;;  %s12510_s12 = smov 126   ;;  %s9882_s13 = sld [smem:[#allocation3 + $0x40]] }
  0x29   :  { %65 = vst [vmem:[#allocation2 + $0x50] sm:$0xff] %v12507_v2  ;;  %66 = vst [vmem:[#allocation2 + $0x58] sm:$0xff] %v12507_v2  ;;  %s9886_s14 = sld [smem:[#allocation3 + $0x44]]  ;;  %s9887_s15 = sld [smem:[#allocation3 + $0x45]] }
  0x2a   :  { %v117_v5 = vstv %s9885_s1  ;;  %v99_v6 = vstv %s9881_s5  ;;  %s9878_s16 = sld [smem:[#allocation3 + $0x3c]]  ;;  %s9895_s0 = sld [smem:[#allocation3 + $0x4d]] }
  0x2b   :  { %v107_v11 = vstv %s9883_s28  ;;  %s9891_s17 = sld [smem:[#allocation3 + $0x49]]  ;;  %s9893_s18 = sld [smem:[#allocation3 + $0x4b]] }
  0x2c   :  { %v113_v18 = vstv %s9884_s9  ;;  %s9894_s21 = sld [smem:[#allocation3 + $0x4c]]  ;;  %s9889_s22 = sld [smem:[#allocation3 + $0x47]] }
  0x2d   :  { %v89_v23 = vstv %s9879_s10  ;;  %v93_v25 = vstv %s9880_s11  ;;  %s9890_s23 = sld [smem:[#allocation3 + $0x48]]  ;;  %s9892_s24 = sld [smem:[#allocation3 + $0x4a]] }
  0x2e   :  { %v103_v37 = vstv %s9882_s13  ;;  %s9896_s26 = sld [smem:[#allocation3 + $0x4e]]  ;;  %s9897_s27 = sld [smem:[#allocation3 + $0x4f]] }
  0x2f   :  { %v121_v40 = vstv %s9886_s14  ;;  %v125_v47 = vstv %s9887_s15  ;;  %s9888_s1 = sld [smem:[#allocation3 + $0x46]]  ;;  %s9905_s5 = sld [smem:[#allocation3 + $0x57]] }
  0x30   :  { %v85_v55 = vstv %s9878_s16  ;;  %s9901_s28 = sld [smem:[#allocation3 + $0x53]]  ;;  %s9903_s9 = sld [smem:[#allocation3 + $0x55]] }
  0x31   :  { %s9904_s10 = sld [smem:[#allocation3 + $0x56]]  ;;  %s9899_s11 = sld [smem:[#allocation3 + $0x51]] }
  0x32   :  { %s9900_s13 = sld [smem:[#allocation3 + $0x52]]  ;;  %s9902_s14 = sld [smem:[#allocation3 + $0x54]] }
  0x33   :  { %s9906_s15 = sld [smem:[#allocation3 + $0x58]]  ;;  %s9907_s16 = sld [smem:[#allocation3 + $0x59]] }
  0x96   :  { %v74_v3 = vpop.permute.xlu0 %73 }
  0x97   :  { %80 = vst.msk [vmem:[#allocation2 + $0x8] sm:$0xf] %vm79_vm0, %v74_v3 }
  0x9a   :  { %v76_v4 = vpop.permute.xlu0 %75 }
  0x9b   :  { %81 = vst.msk [vmem:[#allocation2 + $0x38] sm:$0xf] %vm79_vm0, %v76_v4 }
  0x9e   :  { %v110_v7 = vld [vmem:[#allocation2 + $0x9] sm:$0xf] }
  0x9f   :  { %v96_v8 = vld [vmem:[#allocation2 + $0x8] sm:$0xf]  ;;  %v118_v9 = vmul.f32 %v117_v5, %v110_v7  ;;  %v114_v19 = vmul.f32 %v113_v18, %v110_v7  ;;  %v122_v46 = vmul.f32 %v121_v40, %v110_v7 }
  0xa0   :  { %v100_v10 = vmul.f32 %v99_v6, %v96_v8  ;;  %v108_v14 = vmul.f32 %v107_v11, %v96_v8  ;;  %v82_v22 = vld [vmem:[#allocation2 + $0x7] sm:$0xf]  ;;  %v104_v39 = vmul.f32 %v103_v37, %v96_v8 }
  0xa1   :  { %160 = vrot.lane.b32.xlu1 %v118_v9, %s12508_s29  ;;  %v90_v28 = vmul.f32 %v89_v23, %v82_v22  ;;  %v94_v31 = vmul.f32 %v93_v25, %v82_v22  ;;  %v126_v51 = vadd.f32 %v125_v47, %v122_v46  ;;  %v86_v58 = vmul.f32 %v85_v55, %v82_v22 }
  0xa2   :  { %140 = vrot.lane.b32.xlu0 %v100_v10, %s12509_s30  ;;  %v111_v12 = vld [vmem:[#allocation2 + $0x39] sm:$0xf] }
  0xa3   :  { %v119_v13 = vmul.f32 %v117_v5, %v111_v12  ;;  %v97_v15 = vld [vmem:[#allocation2 + $0x38] sm:$0xf]  ;;  %v115_v24 = vmul.f32 %v113_v18, %v111_v12  ;;  %v123_v52 = vmul.f32 %v121_v40, %v111_v12 }
  0xa4   :  { %v101_v16 = vmul.f32 %v99_v6, %v97_v15  ;;  %v109_v17 = vmul.f32 %v107_v11, %v97_v15  ;;  %v83_v29 = vld [vmem:[#allocation2 + $0x37] sm:$0xf]  ;;  %v105_v44 = vmul.f32 %v103_v37, %v97_v15  ;;  %v231_v37 = vstv %s9890_s23  ;;  %s9915_s23 = sld [smem:[#allocation3 + $0x25]] }
  0xa5   :  { %162 = vrot.lane.b32.xlu1 %v119_v13, %s12508_s29  ;;  %v91_v33 = vmul.f32 %v89_v23, %v83_v29  ;;  %v95_v35 = vmul.f32 %v93_v25, %v83_v29  ;;  %v127_v53 = vadd.f32 %v125_v47, %v123_v52  ;;  %v87_v62 = vmul.f32 %v85_v55, %v83_v29 }
  0xa6   :  { %150 = vrot.lane.b32.xlu0 %v108_v14, %s12508_s29  ;;  %v245_v25 = vstv %s9893_s18  ;;  %v251_v29 = vstv %s9894_s21  ;;  %s9926_s18 = sld [smem:[#allocation3 + $0x30]]  ;;  %s9927_s21 = sld [smem:[#allocation3 + $0x31]] }
  0xa9   :  { %142 = vrot.lane.b32.xlu1 %v101_v16, %s12509_s30  ;;  %v255_v16 = vstv %s9895_s0  ;;  %s9898_s0 = sld [smem:[#allocation3 + $0x50]] }
  0xad   :  { %152 = vrot.lane.b32.xlu1 %v109_v17, %s12508_s29 }
 0x113   :  { %v161_v20 = vpop.permute.xlu1 %160 }
 0x114   :  { %v166_v21 = vadd.f32 %v161_v20, %v114_v19  ;;  %v141_v30 = vpop.permute.xlu0 %140  ;;  %v237_v20 = vstv %s9891_s17  ;;  %s9922_s17 = sld [smem:[#allocation3 + $0x2c]] }
 0x115   :  { %v146_v32 = vadd.f32 %v141_v30, %v94_v31 }
 0x116   :  { %180 = vrot.lane.b32.xlu0 %v166_v21, %s12506_s25 }
 0x117   :  { %v163_v26 = vpop.permute.xlu1 %162 }
 0x118   :  { %v167_v27 = vadd.f32 %v163_v26, %v115_v24  ;;  %v151_v38 = vpop.permute.xlu0 %150 }
 0x119   :  { %v156_v41 = vadd.f32 %v151_v38, %v104_v39 }
 0x11a   :  { %182 = vrot.lane.b32.xlu1 %v167_v27, %s12506_s25  ;;  %130 = vrot.lane.b32.xlu0 %v90_v28, %s12508_s29 }
 0x11b   :  { %v143_v34 = vpop.permute.xlu1 %142 }
 0x11c   :  { %v147_v36 = vadd.f32 %v143_v34, %v95_v35  ;;  %v227_v34 = vstv %s9889_s22  ;;  %s9918_s22 = sld [smem:[#allocation3 + $0x28]] }
 0x11e   :  { %132 = vrot.lane.b32.xlu1 %v91_v33, %s12508_s29  ;;  %170 = vrot.lane.b32.xlu0 %v146_v32, %s12510_s12 }
 0x11f   :  { %v153_v42 = vpop.permute.xlu1 %152 }
 0x120   :  { %v157_v48 = vadd.f32 %v153_v42, %v105_v44 }
 0x122   :  { %172 = vrot.lane.b32.xlu1 %v147_v36, %s12510_s12 }
 0x188   :  { %v181_v43 = vpop.permute.xlu0 %180 }
 0x189   :  { %v186_v45 = vadd.f32 %v181_v43, %v156_v41 }
 0x18b   :  { %190 = vrot.lane.b32.xlu0 %v186_v45, %s12508_s29 }
 0x18c   :  { %v183_v49 = vpop.permute.xlu1 %182  ;;  %v131_v54 = vpop.permute.xlu0 %130 }
 0x18d   :  { %v187_v50 = vadd.f32 %v183_v49, %v157_v48  ;;  %v136_v59 = vadd.f32 %v131_v54, %v86_v58  ;;  %v241_v48 = vstv %s9892_s24  ;;  %v263_v58 = vstv %s9897_s27  ;;  %s9911_s24 = sld [smem:[#allocation3 + $0x21]]  ;;  %s9909_s27 = sld [smem:[#allocation3 + $0x1f]] }
 0x18f   :  { %192 = vrot.lane.b32.xlu1 %v187_v50, %s12508_s29  ;;  %200 = vrot.lane.b32.xlu0 %v126_v51, %s12510_s12  ;;  %v259_v51 = vstv %s9896_s26  ;;  %s9913_s26 = sld [smem:[#allocation3 + $0x23]] }
 0x190   :  { %v133_v56 = vpop.permute.xlu1 %132  ;;  %v171_v57 = vpop.permute.xlu0 %170 }
 0x191   :  { %v176_v63 = vadd.f32 %v171_v57, %v136_v59  ;;  %v137_v3 = vadd.f32 %v133_v56, %v87_v62 }
 0x193   :  { %202 = vrot.lane.b32.xlu1 %v127_v53, %s12510_s12 }
 0x194   :  { %v173_v60 = vpop.permute.xlu1 %172 }
 0x195   :  { %v177_v7 = vadd.f32 %v173_v60, %v137_v3 }
 0x1fd   :  { %v191_v61 = vpop.permute.xlu0 %190 }
 0x1fe   :  { %v196_v4 = vadd.f32 %v191_v61, %v176_v63 }
 0x201   :  { %v193_v5 = vpop.permute.xlu1 %192  ;;  %v201_v6 = vpop.permute.xlu0 %200 }
 0x202   :  { %v206_v8 = vadd.f32 %v201_v6, %v196_v4  ;;  %v197_v9 = vadd.f32 %v193_v5, %v177_v7  ;;  %v223_v5 = vstv %s9888_s1  ;;  %s9910_s1 = sld [smem:[#allocation3 + $0x20]] }
 0x204   :  { %v208_v10 = vmax.f32 %v206_v8, 0.0 }
 0x205   :  { %v203_v11 = vpop.permute.xlu1 %202 }
 0x206   :  { %v207_v12 = vadd.f32 %v203_v11, %v197_v9  ;;  %212 = vrot.lane.b32.xlu0 %v208_v10, %s12506_s25 }
 0x208   :  { %v209_v13 = vmax.f32 %v207_v12, 0.0 }
 0x20a   :  { %214 = vrot.lane.b32.xlu1 %v209_v13, %s12506_s25 }
 0x278   :  { %v213_v14 = vpop.permute.xlu0 %212 }
 0x279   :  { %218 = vst.msk [vmem:[#allocation2 + $0x8] sm:$0xf] %vm79_vm0, %v213_v14 }
 0x27c   :  { %v215_v15 = vpop.permute.xlu1 %214 }
 0x27d   :  { %219 = vst.msk [vmem:[#allocation2 + $0x38] sm:$0xf] %vm79_vm0, %v215_v15 }
 0x280   :  { %v248_v17 = vld [vmem:[#allocation2 + $0x9] sm:$0xf] }
 0x281   :  { %v256_v18 = vmul.f32 %v255_v16, %v248_v17  ;;  %v234_v19 = vld [vmem:[#allocation2 + $0x8] sm:$0xf]  ;;  %v252_v30 = vmul.f32 %v251_v29, %v248_v17  ;;  %v260_v57 = vmul.f32 %v259_v51, %v248_v17 }
 0x282   :  { %v238_v23 = vmul.f32 %v237_v20, %v234_v19  ;;  %v246_v27 = vmul.f32 %v245_v25, %v234_v19  ;;  %v220_v33 = vld [vmem:[#allocation2 + $0x7] sm:$0xf]  ;;  %v242_v50 = vmul.f32 %v241_v48, %v234_v19 }
 0x283   :  { %298 = vrot.lane.b32.xlu0 %v256_v18, %s12508_s29  ;;  %v228_v39 = vmul.f32 %v227_v34, %v220_v33  ;;  %v232_v42 = vmul.f32 %v231_v37, %v220_v33  ;;  %v264_v62 = vadd.f32 %v263_v58, %v260_v57  ;;  %v224_v8 = vmul.f32 %v223_v5, %v220_v33 }
 0x284   :  { %v249_v21 = vld [vmem:[#allocation2 + $0x39] sm:$0xf] }
 0x285   :  { %v257_v22 = vmul.f32 %v255_v16, %v249_v21  ;;  %v235_v24 = vld [vmem:[#allocation2 + $0x38] sm:$0xf]  ;;  %v253_v35 = vmul.f32 %v251_v29, %v249_v21  ;;  %v261_v63 = vmul.f32 %v259_v51, %v249_v21 }
 0x286   :  { %v239_v26 = vmul.f32 %v237_v20, %v235_v24  ;;  %v247_v28 = vmul.f32 %v245_v25, %v235_v24  ;;  %v221_v40 = vld [vmem:[#allocation2 + $0x37] sm:$0xf]  ;;  %v243_v55 = vmul.f32 %v241_v48, %v235_v24  ;;  %v366_v25 = vld [vmem:[#allocation7] sm:$0xff] }
 0x287   :  { %300 = vrot.lane.b32.xlu1 %v257_v22, %s12508_s29  ;;  %278 = vrot.lane.b32.xlu0 %v238_v23, %s12509_s30  ;;  %v229_v44 = vmul.f32 %v227_v34, %v221_v40  ;;  %v233_v46 = vmul.f32 %v231_v37, %v221_v40  ;;  %v265_v3 = vadd.f32 %v263_v58, %v261_v63 }
 0x288   :  { %v225_v12 = vmul.f32 %v223_v5, %v221_v40  ;;  %v373_v5 = vld [vmem:[#allocation7 + $0x38] sm:$0xff] }
 0x28b   :  { %280 = vrot.lane.b32.xlu1 %v239_v26, %s12509_s30  ;;  %288 = vrot.lane.b32.xlu0 %v246_v27, %s12508_s29  ;;  %v392_v26 = vsel %vm390_vm1, %v366_v25, 0 }
 0x28f   :  { %290 = vrot.lane.b32.xlu1 %v247_v28, %s12508_s29 }
 0x2f5   :  { %v299_v31 = vpop.permute.xlu0 %298 }
 0x2f6   :  { %v304_v32 = vadd.f32 %v299_v31, %v252_v30  ;;  %v370_v30 = vld [vmem:[#allocation7 + $0x20] sm:$0xff] }
 0x2f7   :  { %v1034_v31 = vsel %vm390_vm1, %v370_v30, 0 }
 0x2f8   :  { %318 = vrot.lane.b32.xlu0 %v304_v32, %s12506_s25  ;;  %v12662_v33 = vand.u32 4294901760, %v1034_v31 }
 0x2f9   :  { %v301_v36 = vpop.permute.xlu1 %300  ;;  %v279_v41 = vpop.permute.xlu0 %278 }
 0x2fa   :  { %v305_v38 = vadd.f32 %v301_v36, %v253_v35  ;;  %v284_v43 = vadd.f32 %v279_v41, %v232_v42  ;;  %v12665_v36 = vsub.f32 %v1034_v31, %v12662_v33 }
 0x2fc   :  { %320 = vrot.lane.b32.xlu1 %v305_v38, %s12506_s25  ;;  %268 = vrot.lane.b32.xlu0 %v228_v39, %s12508_s29  ;;  %v1116_v37 = vand.u32 4294901760, %v12665_v36 }
 0x2fd   :  { %v281_v45 = vpop.permute.xlu1 %280  ;;  %v289_v49 = vpop.permute.xlu0 %288 }
 0x2fe   :  { %v285_v47 = vadd.f32 %v281_v45, %v233_v46  ;;  %v294_v52 = vadd.f32 %v289_v49, %v242_v50  ;;  %v1117_v39 = vsub.f32 %v12665_v36, %v1116_v37  ;;  %v368_v46 = vld [vmem:[#allocation7 + $0x10] sm:$0xff] }
 0x2ff   :  { %v398_v51 = vsel %vm390_vm1, %v368_v46, 0 }
 0x300   :  { %270 = vrot.lane.b32.xlu1 %v229_v44, %s12508_s29  ;;  %308 = vrot.lane.b32.xlu0 %v284_v43, %s12510_s12  ;;  %v1118_v40 = vand.u32 4294901760, %v1117_v39  ;;  %v367_v43 = vld [vmem:[#allocation7 + $0x8] sm:$0xff] }
 0x301   :  { %v291_v53 = vpop.permute.xlu1 %290  ;;  %v395_v48 = vsel %vm390_vm1, %v367_v43, 0 }
 0x302   :  { %v295_v59 = vadd.f32 %v291_v53, %v243_v55  ;;  %10635 = vmatprep.mubr.f32.mxu1 %v1118_v40  ;;  %v12677_v53 = vand.u32 4294901760, %v395_v48 }
 0x304   :  { %310 = vrot.lane.b32.xlu1 %v285_v47, %s12510_s12 }
 0x36a   :  { %v319_v54 = vpop.permute.xlu0 %318 }
 0x36b   :  { %v324_v56 = vadd.f32 %v319_v54, %v294_v52  ;;  %v369_v52 = vld [vmem:[#allocation7 + $0x18] sm:$0xff] }
 0x36c   :  { %v401_v57 = vsel %vm390_vm1, %v369_v52, 0 }
 0x36d   :  { %328 = vrot.lane.b32.xlu0 %v324_v56, %s12508_s29  ;;  %v371_v56 = vld [vmem:[#allocation7 + $0x28] sm:$0xff] }
 0x36e   :  { %v321_v60 = vpop.permute.xlu1 %320  ;;  %v269_v4 = vpop.permute.xlu0 %268 }
 0x36f   :  { %v325_v61 = vadd.f32 %v321_v60, %v295_v59  ;;  %v274_v9 = vadd.f32 %v269_v4, %v224_v8  ;;  %v372_v60 = vld [vmem:[#allocation7 + $0x30] sm:$0xff]  ;;  %v12692_v4 = vand.u32 4294901760, %v401_v57 }
 0x371   :  { %330 = vrot.lane.b32.xlu1 %v325_v61, %s12508_s29  ;;  %338 = vrot.lane.b32.xlu0 %v264_v62, %s12510_s12  ;;  %v12687_v61 = vsub.f32 %v395_v48, %v12677_v53  ;;  %v1037_v62 = vsel %vm390_vm1, %v371_v56, 0 }
 0x372   :  { %v271_v6 = vpop.permute.xlu1 %270  ;;  %v309_v7 = vpop.permute.xlu0 %308 }
 0x373   :  { %v314_v13 = vadd.f32 %v309_v7, %v274_v9  ;;  %v275_v14 = vadd.f32 %v271_v6, %v225_v12  ;;  %v1040_v7 = vsel %vm390_vm1, %v372_v60, 0  ;;  %v1043_v12 = vsel %vm390_vm1, %v373_v5, 0 }
 0x375   :  { %340 = vrot.lane.b32.xlu1 %v265_v3, %s12510_s12 }
 0x376   :  { %v311_v10 = vpop.permute.xlu1 %310 }
 0x377   :  { %v315_v18 = vadd.f32 %v311_v10, %v275_v14  ;;  %v12700_v10 = vand.u32 4294901760, %v1037_v62 }
 0x3df   :  { %v329_v11 = vpop.permute.xlu0 %328 }
 0x3e0   :  { %v334_v15 = vadd.f32 %v329_v11, %v314_v13  ;;  %v484_v11 = vand.u32 4294901760, %v12687_v61 }
 0x3e3   :  { %v331_v16 = vpop.permute.xlu1 %330  ;;  %v339_v17 = vpop.permute.xlu0 %338 }
 0x3e4   :  { %v344_v19 = vadd.f32 %v339_v17, %v334_v15  ;;  %v335_v20 = vadd.f32 %v331_v16, %v315_v18  ;;  %v12708_v16 = vsub.f32 %v401_v57, %v12692_v4  ;;  %v12710_v17 = vand.u32 4294901760, %v1040_v7 }
 0x3e6   :  { %v346_v21 = vadd.f32 %v344_v19, %v12580_v0  ;;  %v12650_v0 = vand.u32 4294901760, %v392_v26  ;;  %v504_v31 = vand.u32 4294901760, %v12708_v16 }
 0x3e7   :  { %v341_v22 = vpop.permute.xlu1 %340 }
 0x3e8   :  { %v345_v23 = vadd.f32 %v341_v22, %v335_v20  ;;  %350 = vrot.lane.b32.xlu0 %v346_v21, %s12506_s25  ;;  %v12654_v28 = vsub.f32 %v392_v26, %v12650_v0  ;;  %v12720_v22 = vsub.f32 %v1037_v62, %v12700_v10 }
 0x3ea   :  { %v347_v24 = vadd.f32 %v345_v23, %v12587_v1  ;;  %v474_v29 = vand.u32 4294901760, %v12654_v28  ;;  %v12722_v23 = vand.u32 4294901760, %v1043_v12 }
 0x3ec   :  { %352 = vrot.lane.b32.xlu1 %v347_v24, %s12506_s25  ;;  %v475_v32 = vsub.f32 %v12654_v28, %v474_v29  ;;  %v12749_v43 = vsub.f32 %v1043_v12, %v12722_v23 }
 0x3ee   :  { %v476_v35 = vand.u32 4294901760, %v475_v32  ;;  %v1146_v5 = vand.u32 4294901760, %v12749_v43 }
 0x3f0   :  { %12380 = vrot.lane.b32.xlu1 %v12507_v2, %s12508_s29  ;;  %10551 = vmatprep.mubr.f32.mxu0 %v476_v35 }
 0x3f4   :  { %12385 = vrot.lane.b32.xlu1 %v12507_v2, %s12508_s29 }
 0x45a   :  { %v351_v27 = vpop.permute.xlu0 %350 }
 0x45b   :  { %356 = vst.msk [vmem:[#allocation2 + $0x8] sm:$0xf] %vm79_vm0, %v351_v27  ;;  %v485_v27 = vsub.f32 %v12687_v61, %v484_v11 }
 0x45d   :  { %v486_v46 = vand.u32 4294901760, %v485_v27 }
 0x45e   :  { %v353_v1 = vpop.permute.xlu1 %352 }
 0x45f   :  { %357 = vst.msk [vmem:[#allocation2 + $0x38] sm:$0xf] %vm79_vm0, %v353_v1 }
 0x462   :  { %v358_v34 = vld [vmem:[#allocation2 + $0x8] sm:$0xff]  ;;  %v12381_v41 = vpop.permute.xlu1 %12380 }
 0x463   :  { %378 = vrot.lane.b32.xlu0 %v358_v34, %s12508_s29  ;;  %v12382_v47 = vunpack.i.l.bf16 %v12381_v41  ;;  %v12383_v54 = vunpack.i.h.bf16 %v12381_v41  ;;  %v12739_v34 = vsub.f32 %v1040_v7, %v12710_v17 }
 0x465   :  { %v407_v55 = vand.u32 4294901760, %v12382_v47  ;;  %v1049_v63 = vand.u32 4294901760, %v12383_v54  ;;  %v1136_v52 = vand.u32 4294901760, %v12739_v34 }
 0x466   :  { %v362_v38 = vld [vmem:[#allocation2 + $0x38] sm:$0xff]  ;;  %v12386_v42 = vpop.permute.xlu1 %12385 }
 0x467   :  { %1021 = vrot.lane.b32.xlu0 %v362_v38, %s12508_s29  ;;  %v12388_v44 = vunpack.i.h.bf16 %v12386_v42  ;;  %v12387_v45 = vunpack.i.l.bf16 %v12386_v42  ;;  %v12690_v3 = vsub.f32 %v12382_v47, %v407_v55  ;;  %v12704_v13 = vsub.f32 %v12383_v54, %v1049_v63 }
 0x468   :  { %v1126_v42 = vand.u32 4294901760, %v12720_v22  ;;  %v1137_v27 = vsub.f32 %v12739_v34, %v1136_v52 }
 0x469   :  { %v413_v49 = vand.u32 4294901760, %v12388_v44  ;;  %v410_v50 = vand.u32 4294901760, %v12387_v45  ;;  %v522_v15 = vand.u32 4294901760, %v12690_v3  ;;  %v1164_v32 = vand.u32 4294901760, %v12704_v13 }
 0x46b   :  { %12390 = vrot.lane.b32.xlu0 %v12507_v2, %s12508_s29  ;;  %v12679_v2 = vand.u32 4294901760, %v398_v51  ;;  %v12682_v58 = vsub.f32 %v12388_v44, %v413_v49  ;;  %v12684_v59 = vsub.f32 %v12387_v45, %v410_v50  ;;  %v12724_v24 = vpack.c.bf16 %v413_v49, %v410_v50 }
 0x46c   :  { %v523_v30 = vsub.f32 %v12690_v3, %v522_v15  ;;  %v505_v50 = vsub.f32 %v12708_v16, %v504_v31 }
 0x46d   :  { %v12695_v6 = vsub.f32 %v398_v51, %v12679_v2  ;;  %v529_v8 = vand.u32 4294901760, %v12684_v59  ;;  %v536_v9 = vand.u32 4294901760, %v12682_v58  ;;  %v1165_v51 = vsub.f32 %v12704_v13, %v1164_v32 }
 0x46e   :  { %v524_v49 = vand.u32 4294901760, %v523_v30 }
 0x46f   :  { %v494_v19 = vand.u32 4294901760, %v12695_v6  ;;  %v530_v20 = vsub.f32 %v12684_v59, %v529_v8  ;;  %v537_v21 = vsub.f32 %v12682_v58, %v536_v9 }
 0x471   :  { %v495_v39 = vsub.f32 %v12695_v6, %v494_v19  ;;  %v531_v40 = vand.u32 4294901760, %v530_v20  ;;  %v538_v41 = vand.u32 4294901760, %v537_v21  ;;  %v506_v20 = vand.u32 4294901760, %v505_v50 }
 0x472   :  { %v1166_v21 = vand.u32 4294901760, %v1165_v51 }
 0x473   :  { %v11563_v60 = vpack.c.bf16 %v538_v41, %v531_v40  ;;  %v496_v62 = vand.u32 4294901760, %v495_v39 }
 0x4d5   :  { %v379_v14 = vpop.permute.xlu0 %378 }
 0x4d6   :  { %v404_v18 = vand.u32 4294901760, %v379_v14 }
 0x4d8   :  { %v12726_v25 = vpack.c.bf16 %v407_v55, %v404_v18  ;;  %v12728_v26 = vsub.f32 %v379_v14, %v404_v18 }
 0x4d9   :  { %v1022_v1 = vpop.permute.xlu0 %1021 }
 0x4da   :  { %v515_v35 = vand.u32 4294901760, %v12728_v26  ;;  %v1046_v38 = vand.u32 4294901760, %v1022_v1  ;;  %11552 = vmatprep.subr.bf16.mxu0 %v12726_v25  ;;  %v11567_v50 = vpack.c.bf16 %v12690_v3, %v12728_v26  ;;  %v11587_v3 = vpack.c.bf16 %v536_v9, %v529_v8 }
 0x4db   :  { %11554 = vmatpush3.bf16.msra.mxu0 %v12726_v25 }
 0x4dc   :  { %v12751_v44 = vpack.c.bf16 %v1049_v63, %v1046_v38  ;;  %v12753_v45 = vsub.f32 %v1022_v1, %v1046_v38  ;;  %11556 = vmatprep.subr.bf16.mxu0 %v12724_v24  ;;  %v516_v47 = vsub.f32 %v12728_v26, %v515_v35  ;;  %v1127_v63 = vsub.f32 %v12720_v22, %v1126_v42 }
 0x4dd   :  { %v12391_v48 = vpop.permute.xlu0 %12390 }
 0x4de   :  { %v1157_v54 = vand.u32 4294901760, %v12753_v45  ;;  %v12393_v55 = vunpack.i.h.bf16 %v12391_v48  ;;  %v12392_v56 = vunpack.i.l.bf16 %v12391_v48  ;;  %11600 = vmatprep.subr.bf16.mxu1 %v12751_v44  ;;  %v517_v57 = vand.u32 4294901760, %v516_v47 }
 0x4df   :  { %11558 = vmatpush3.bf16.msra.mxu0 %v12724_v24  ;;  %11602 = vmatpush3.bf16.msra.mxu1 %v12751_v44  ;;  %v1128_v40 = vand.u32 4294901760, %v1127_v63  ;;  %v1147_v47 = vsub.f32 %v12749_v43, %v1146_v5  ;;  %v11571_v63 = vpack.c.bf16 %v12682_v58, %v12684_v59 }
 0x4e0   :  { %v1055_v7 = vand.u32 4294901760, %v12393_v55  ;;  %v1052_v12 = vand.u32 4294901760, %v12392_v56  ;;  %v11559_v14 = vpack.c.bf16 %v524_v49, %v517_v57  ;;  %v1158_v18 = vsub.f32 %v12753_v45, %v1157_v54 }
 0x4e2   :  { %v12780_v1 = vsub.f32 %v12393_v55, %v1055_v7  ;;  %v12782_v30 = vpack.c.bf16 %v1055_v7, %v1052_v12  ;;  %v12784_v38 = vsub.f32 %v12392_v56, %v1052_v12  ;;  %10552 = vmatmul.mubr.f32.vlgmr.msra.gmra.mrb[0].mxu0 %v486_v46  ;;  %11560 = vmatprep.subr.bf16.mxu0 %v11559_v14  ;;  %v1159_v39 = vand.u32 4294901760, %v1158_v18 }
 0x4e3   :  { %11562 = vmatpush3.bf16.msra.mxu0 %v11559_v14  ;;  %10554 = vmatprep.mubr.f32.mxu0 %v496_v62  ;;  %v1138_v46 = vand.u32 4294901760, %v1137_v27  ;;  %v1148_v56 = vand.u32 4294901760, %v1147_v47  ;;  %v11583_v14 = vpack.c.bf16 %v522_v15, %v515_v35  ;;  %v1667_v35 = vld [vmem:[#allocation7 + $0x78] sm:$0xff] }
 0x4e4   :  { %11564 = vmatprep.subr.bf16.mxu0 %v11563_v60  ;;  %11604 = vmatprep.subr.bf16.mxu1 %v12782_v30  ;;  %v11607_v41 = vpack.c.bf16 %v1166_v21, %v1159_v39  ;;  %v1171_v48 = vand.u32 4294901760, %v12784_v38  ;;  %v1178_v49 = vand.u32 4294901760, %v12780_v1  ;;  %v11619_v12 = vpack.c.bf16 %v12780_v1, %v12784_v38 }
 0x4e5   :  { %11606 = vmatpush3.bf16.msra.mxu1 %v12782_v30 }
 0x4e6   :  { %10555 = vmatmul.mubr.f32.gmra.mrb[2].mxu0 %v506_v20  ;;  %11608 = vmatprep.subr.bf16.mxu1 %v11607_v41  ;;  %v1172_v51 = vsub.f32 %v12784_v38, %v1171_v48  ;;  %v1179_v55 = vsub.f32 %v12780_v1, %v1178_v49 }
 0x4e7   :  { %11566 = vmatpush3.bf16.msra.mxu0 %v11563_v60  ;;  %10565 = vmatprep.mubr.f32.mxu0 %v12650_v0  ;;  %v11615_v60 = vpack.c.bf16 %v12704_v13, %v12753_v45  ;;  %v2316_v45 = vand.u32 4294901760, %v1667_v35 }
 0x4e8   :  { %11568 = vmatprep.subr.bf16.mxu0 %v11567_v50  ;;  %10636 = vmatmul.mubr.f32.vlgmr.msra.gmra.mrb[0].mxu1 %v1128_v40  ;;  %v1173_v57 = vand.u32 4294901760, %v1172_v51  ;;  %v1180_v62 = vand.u32 4294901760, %v1179_v55 }
 0x4e9   :  { %11610 = vmatpush3.bf16.msra.mxu1 %v11607_v41  ;;  %10638 = vmatprep.mubr.f32.mxu1 %v1138_v46  ;;  %v2438_v40 = vsub.f32 %v1667_v35, %v2316_v45 }
 0x4ea   :  { %10566 = vmatmul.mubr.f32.vlgmr.msra.gmra.mrb[0].mxu0 %v12677_v53  ;;  %v11611_v7 = vpack.c.bf16 %v1180_v62, %v1173_v57 }
 0x4eb   :  { %11570 = vmatpush3.bf16.msra.mxu0 %v11567_v50  ;;  %10568 = vmatprep.mubr.f32.mxu0 %v12679_v2  ;;  %v2439_v46 = vand.u32 4294901760, %v2438_v40 }
 0x4ec   :  { %11572 = vmatprep.subr.bf16.mxu0 %v11571_v63  ;;  %10639 = vmatmul.mubr.f32.gmra.mrb[2].mxu1 %v1148_v56 }
 0x4ed   :  { %11612 = vmatprep.subr.bf16.mxu1 %v11611_v7  ;;  %10649 = vmatprep.mubr.f32.mxu1 %v12662_v33  ;;  %v2440_v56 = vsub.f32 %v2438_v40, %v2439_v46 }
 0x4ee   :  { %11614 = vmatpush3.bf16.msra.mxu1 %v11611_v7  ;;  %10569 = vmatmul.mubr.f32.gmra.mrb[2].mxu0 %v12692_v4 }
 0x4ef   :  { %11616 = vmatprep.subr.bf16.mxu1 %v11615_v60  ;;  %11574 = vmatpush3.bf16.msra.mxu0 %v11571_v63  ;;  %v2441_v62 = vand.u32 4294901760, %v2440_v56 }
 0x4f0   :  { %11576 = vmatprep.subr.bf16.mxu0 %v12726_v25  ;;  %10579 = vmatprep.mubr.f32.mxu0 %v12654_v28  ;;  %v11631_v28 = vpack.c.bf16 %v1164_v32, %v1157_v54 }
 0x4f1   :  { %10650 = vmatmul.mubr.f32.vlgmr.msra.gmra.mrb[0].mxu1 %v12700_v10 }
 0x4f2   :  { %11618 = vmatpush3.bf16.msra.mxu1 %v11615_v60  ;;  %10580 = vmatmul.mubr.f32.vlgmr.msra.gmra.mrb[0].mxu0 %v12687_v61  ;;  %v1662_v61 = vld [vmem:[#allocation7 + $0x50] sm:$0xff] }
 0x4f3   :  { %11620 = vmatprep.subr.bf16.mxu1 %v11619_v12  ;;  %11578 = vmatpush3.bf16.msra.mxu0 %v12726_v25 }
 0x4f4   :  { %10652 = vmatprep.mubr.f32.mxu1 %v12710_v17  ;;  %11580 = vmatprep.subr.bf16.mxu0 %v12724_v24 }
 0x4f5   :  { %10653 = vmatmul.mubr.f32.gmra.mrb[2].mxu1 %v12722_v23  ;;  %10582 = vmatprep.mubr.f32.mxu0 %v12695_v6 }
 0x4f6   :  { %11622 = vmatpush3.bf16.msra.mxu1 %v11619_v12  ;;  %10583 = vmatmul.mubr.f32.gmra.mrb[2].mxu0 %v12708_v16 }
 0x4f7   :  { %11624 = vmatprep.subr.bf16.mxu1 %v12751_v44  ;;  %11582 = vmatpush3.bf16.msra.mxu0 %v12724_v24 }
 0x4f8   :  { %10663 = vmatprep.mubr.f32.mxu1 %v12665_v36  ;;  %11584 = vmatprep.subr.bf16.mxu0 %v11583_v14  ;;  %v1661_v36 = vld [vmem:[#allocation7 + $0x48] sm:$0xff] }
 0x4f9   :  { %10664 = vmatmul.mubr.f32.vlgmr.msra.gmra.mrb[0].mxu1 %v12720_v22  ;;  %10593 = vmatprep.mubr.f32.mxu0 %v474_v29  ;;  %v11635_v29 = vpack.c.bf16 %v1178_v49, %v1171_v48 }
 0x4fa   :  { %11626 = vmatpush3.bf16.msra.mxu1 %v12751_v44  ;;  %10594 = vmatmul.mubr.f32.vlgmr.msra.gmra.mrb[0].mxu0 %v484_v11  ;;  %v1665_v11 = vld [vmem:[#allocation7 + $0x68] sm:$0xff] }
 0x4fb   :  { %11628 = vmatprep.subr.bf16.mxu1 %v12782_v30  ;;  %11586 = vmatpush3.bf16.msra.mxu0 %v11583_v14  ;;  %v2310_v16 = vand.u32 4294901760, %v1665_v11 }
 0x4fc   :  { %10666 = vmatprep.mubr.f32.mxu1 %v12739_v34  ;;  %11588 = vmatprep.subr.bf16.mxu0 %v11587_v3  ;;  %v1666_v34 = vld [vmem:[#allocation7 + $0x70] sm:$0xff] }
 0x4fd   :  { %10667 = vmatmul.mubr.f32.gmra.mrb[2].mxu1 %v12749_v43  ;;  %10596 = vmatprep.mubr.f32.mxu0 %v494_v19 }
 0x4fe   :  { %11630 = vmatpush3.bf16.msra.mxu1 %v12782_v30  ;;  %10597 = vmatmul.mubr.f32.gmra.mrb[2].mxu0 %v504_v31  ;;  %v2424_v31 = vsub.f32 %v1665_v11, %v2310_v16 }
 0x4ff   :  { %11632 = vmatprep.subr.bf16.mxu1 %v11631_v28  ;;  %11590 = vmatpush3.bf16.msra.mxu0 %v11587_v3 }
 0x500   :  { %10677 = vmatprep.mubr.f32.mxu1 %v1116_v37  ;;  %11592 = vmatprep.subr.bf16.mxu0 %v12726_v25  ;;  %v2425_v54 = vand.u32 4294901760, %v2424_v31 }
 0x501   :  { %10678 = vmatmul.mubr.f32.vlgmr.msra.gmra.mrb[0].mxu1 %v1126_v42  ;;  %10607 = vmatprep.mubr.f32.mxu0 %v12650_v0 }
 0x502   :  { %11634 = vmatpush3.bf16.msra.mxu1 %v11631_v28  ;;  %10608 = vmatmul.mubr.f32.vlgmr.msra.gmra.mrb[0].mxu0 %v12677_v53  ;;  %v2426_v1 = vsub.f32 %v2424_v31, %v2425_v54 }
 0x503   :  { %11636 = vmatprep.subr.bf16.mxu1 %v11635_v29  ;;  %11594 = vmatpush3.bf16.msra.mxu0 %v12726_v25 }
 0x504   :  { %10680 = vmatprep.mubr.f32.mxu1 %v1136_v52  ;;  %11596 = vmatprep.subr.bf16.mxu0 %v12724_v24  ;;  %v2427_v47 = vand.u32 4294901760, %v2426_v1 }
 0x505   :  { %10681 = vmatmul.mubr.f32.gmra.mrb[2].mxu1 %v1146_v5  ;;  %10610 = vmatprep.mubr.f32.mxu0 %v12679_v2 }
 0x506   :  { %11638 = vmatpush3.bf16.msra.mxu1 %v11635_v29  ;;  %10611 = vmatmul.mubr.f32.gmra.mrb[2].mxu0 %v12692_v4 }
 0x507   :  { %11640 = vmatprep.subr.bf16.mxu1 %v12751_v44  ;;  %11598 = vmatpush3.bf16.msra.mxu0 %v12724_v24 }
 0x508   :  { %10691 = vmatprep.mubr.f32.mxu1 %v12662_v33  ;;  %10621 = vmatprep.mubr.f32.mxu0 %v12650_v0  ;;  %v1660_v0 = vld [vmem:[#allocation7 + $0x40] sm:$0xff] }
 0x509   :  { %10692 = vmatmul.mubr.f32.vlgmr.msra.gmra.mrb[0].mxu1 %v12700_v10  ;;  %v1681_v37 = vand.u32 4294901760, %v1660_v0 }
 0x50a   :  { %11642 = vmatpush3.bf16.msra.mxu1 %v12751_v44  ;;  %10622 = vmatmul.mubr.f32.vlgmr.msra.gmra.mrb[0].mxu0 %v12677_v53  ;;  %v1684_v53 = vand.u32 4294901760, %v1661_v36  ;;  %v2313_v44 = vand.u32 4294901760, %v1666_v34 }
 0x50b   :  { %11644 = vmatprep.subr.bf16.mxu1 %v12782_v30  ;;  %10694 = vmatprep.mubr.f32.mxu1 %v12710_v17 }
 0x50c   :  { %10624 = vmatprep.mubr.f32.mxu0 %v12679_v2  ;;  %v12887_v58 = vpack.c.bf16 %v1684_v53, %v1681_v37  ;;  %v12889_v2 = vsub.f32 %v1660_v0, %v1681_v37  ;;  %v12891_v59 = vsub.f32 %v1661_v36, %v1684_v53  ;;  %v12909_v21 = vpack.c.bf16 %v2316_v45, %v2313_v44 }
 0x50d   :  { %10695 = vmatmul.mubr.f32.gmra.mrb[2].mxu1 %v12722_v23 }
 0x50e   :  { %11646 = vmatpush3.bf16.msra.mxu1 %v12782_v30  ;;  %10625 = vmatmul.mubr.f32.gmra.mrb[2].mxu0 %v12692_v4  ;;  %v1663_v4 = vld [vmem:[#allocation7 + $0x58] sm:$0xff]  ;;  %v1792_v8 = vand.u32 4294901760, %v12889_v2  ;;  %v1799_v9 = vand.u32 4294901760, %v12891_v59  ;;  %v2431_v30 = vsub.f32 %v1666_v34, %v2313_v44  ;;  %v12920_v55 = vpack.c.bf16 %v12891_v59, %v12889_v2 }
 0x50f   :  { %10705 = vmatprep.mubr.f32.mxu1 %v12662_v33  ;;  %11648 = vmatprep.subr.bf16.mxu0 %v12887_v58  ;;  %v1687_v33 = vand.u32 4294901760, %v1662_v61  ;;  %v1690_v6 = vand.u32 4294901760, %v1663_v4 }
 0x510   :  { %11650 = vmatpush3.bf16.msra.mxu0 %v12887_v58  ;;  %v1800_v19 = vsub.f32 %v12891_v59, %v1799_v9  ;;  %v2432_v48 = vand.u32 4294901760, %v2431_v30  ;;  %v12929_v12 = vpack.c.bf16 %v2438_v40, %v2431_v30  ;;  %v12931_v14 = vpack.c.bf16 %v1799_v9, %v1792_v8 }
 0x511   :  { %10706 = vmatmul.mubr.f32.vlgmr.msra.gmra.mrb[0].mxu1 %v12700_v10  ;;  %v1664_v10 = vld [vmem:[#allocation7 + $0x60] sm:$0xff]  ;;  %v12897_v13 = vpack.c.bf16 %v1690_v6, %v1687_v33  ;;  %v1805_v22 = vsub.f32 %v1662_v61, %v1687_v33 }
 0x512   :  { %10708 = vmatprep.mubr.f32.mxu1 %v12710_v17  ;;  %v2307_v15 = vand.u32 4294901760, %v1664_v10  ;;  %v1793_v17 = vsub.f32 %v12889_v2, %v1792_v8  ;;  %v1801_v32 = vand.u32 4294901760, %v1800_v19  ;;  %v2433_v51 = vsub.f32 %v2431_v30, %v2432_v48 }
 0x513   :  { %11652 = vmatprep.subr.bf16.mxu0 %v12897_v13  ;;  %v1806_v42 = vand.u32 4294901760, %v1805_v22  ;;  %v12937_v29 = vpack.c.bf16 %v2439_v46, %v2432_v48 }
 0x514   :  { %v12902_v24 = vpack.c.bf16 %v2310_v16, %v2307_v15  ;;  %v1794_v25 = vand.u32 4294901760, %v1793_v17  ;;  %v2417_v26 = vsub.f32 %v1664_v10, %v2307_v15  ;;  %11654 = vmatpush3.bf16.msra.mxu0 %v12897_v13  ;;  %v2434_v57 = vand.u32 4294901760, %v2433_v51 }
 0x515   :  { %10709 = vmatmul.mubr.f32.gmra.mrb[2].mxu1 %v12722_v23  ;;  %v1812_v23 = vsub.f32 %v1663_v4, %v1690_v6  ;;  %v1807_v18 = vsub.f32 %v1805_v22, %v1806_v42 }
 0x516   :  { %11696 = vmatprep.subr.bf16.mxu1 %v12902_v24  ;;  %v2418_v52 = vand.u32 4294901760, %v2417_v26  ;;  %v12907_v5 = vpack.c.bf16 %v1801_v32, %v1794_v25  ;;  %v12923_v63 = vpack.c.bf16 %v2441_v62, %v2434_v57  ;;  %v12927_v60 = vpack.c.bf16 %v2424_v31, %v2417_v26 }
 0x517   :  { %v1813_v43 = vand.u32 4294901760, %v1812_v23  ;;  %11698 = vmatpush3.bf16.msra.mxu1 %v12902_v24  ;;  %v1808_v38 = vand.u32 4294901760, %v1807_v18  ;;  %v12925_v7 = vpack.c.bf16 %v1812_v23, %v1805_v22 }
 0x518   :  { %v2419_v27 = vsub.f32 %v2417_v26, %v2418_v52  ;;  %11656 = vmatprep.subr.bf16.mxu0 %v12907_v5  ;;  %11700 = vmatprep.subr.bf16.mxu1 %v12909_v21  ;;  %v12935_v28 = vpack.c.bf16 %v2425_v54, %v2418_v52 }
 0x519   :  { %v1814_v20 = vsub.f32 %v1812_v23, %v1813_v43  ;;  %v12933_v3 = vpack.c.bf16 %v1813_v43, %v1806_v42 }
 0x51a   :  { %v2420_v41 = vand.u32 4294901760, %v2419_v27 }
 0x51b   :  { %v1815_v39 = vand.u32 4294901760, %v1814_v20  ;;  %11702 = vmatpush3.bf16.msra.mxu1 %v12909_v21 }
 0x51c   :  { %v12916_v50 = vpack.c.bf16 %v2427_v47, %v2420_v41 }
 0x51d   :  { %v12914_v49 = vpack.c.bf16 %v1815_v39, %v1808_v38 }
 0x51e   :  { %11704 = vmatprep.subr.bf16.mxu1 %v12916_v50 }
 0x5dd   :  { %v10623_v0 = vpop.f32.mrb[0].mxu0 }
 0x5de   :  { %v1672_v36 = vsel %vm390_vm1, %v10623_v0, 0  ;;  %v995_v37 = vpop.f32.mrb[1].mxu0 }
 0x5df   :  { %v12940_v53 = vand.u32 4294901760, %v1672_v36  ;;  %v1669_v2 = vsel %vm390_vm1, %v995_v37, 0 }
 0x5e0   :  { %v12943_v59 = vand.u32 4294901760, %v1669_v2 }
 0x5e1   :  { %v12946_v61 = vsub.f32 %v1672_v36, %v12940_v53  ;;  %v10626_v4 = vpop.f32.mrb[2].mxu0 }
 0x5e2   :  { %v12949_v33 = vsub.f32 %v1669_v2, %v12943_v59  ;;  %v1678_v6 = vsel %vm390_vm1, %v10626_v4, 0  ;;  %v1007_v8 = vpop.f32.mrb[3].mxu0 }
 0x5e3   :  { %v1761_v9 = vand.u32 4294901760, %v12946_v61  ;;  %v12953_v10 = vand.u32 4294901760, %v1678_v6  ;;  %v1675_v11 = vsel %vm390_vm1, %v1007_v8, 0 }
 0x5e4   :  { %v1751_v15 = vand.u32 4294901760, %v12949_v33  ;;  %v12957_v16 = vand.u32 4294901760, %v1675_v11  ;;  %v10707_v17 = vpop.f32.mrb[0].mxu1 }
 0x5e5   :  { %v1762_v19 = vsub.f32 %v12946_v61, %v1761_v9  ;;  %v12963_v22 = vsub.f32 %v1678_v6, %v12953_v10  ;;  %v2298_v23 = vsel %vm390_vm1, %v10707_v17, 0  ;;  %v1637_v25 = vpop.f32.mrb[1].mxu1 }
 0x5e6   :  { %v12967_v26 = vsub.f32 %v1675_v11, %v12957_v16  ;;  %v12969_v31 = vand.u32 4294901760, %v2298_v23  ;;  %v2295_v32 = vsel %vm390_vm1, %v1637_v25, 0  ;;  %v1752_v34 = vsub.f32 %v12949_v33, %v1751_v15 }
 0x5e7   :  { %v1781_v35 = vand.u32 4294901760, %v12963_v22  ;;  %v12976_v42 = vand.u32 4294901760, %v2295_v32  ;;  %v1763_v54 = vand.u32 4294901760, %v1762_v19  ;;  %v2992_v19 = vstv %s9904_s10  ;;  %s9908_s10 = sld [smem:[#allocation3 + $0x1e]] }
 0x5e8   :  { %v1771_v43 = vand.u32 4294901760, %v12967_v26  ;;  %v12980_v44 = vsub.f32 %v2298_v23, %v12969_v31  ;;  %v10710_v45 = vpop.f32.mrb[2].mxu1  ;;  %v1753_v52 = vand.u32 4294901760, %v1752_v34 }
 0x5e9   :  { %v12983_v18 = vsub.f32 %v2295_v32, %v12976_v42  ;;  %v2304_v20 = vsel %vm390_vm1, %v10710_v45, 0  ;;  %v1649_v27 = vpop.f32.mrb[3].mxu1  ;;  %v1782_v1 = vsub.f32 %v12963_v22, %v1781_v35  ;;  %v2972_v32 = vstv %s9900_s13  ;;  %s9921_s13 = sld [smem:[#allocation3 + $0x2b]] }
 0x5ea   :  { %v2387_v30 = vand.u32 4294901760, %v12980_v44  ;;  %v12990_v38 = vand.u32 4294901760, %v2304_v20  ;;  %v2301_v39 = vsel %vm390_vm1, %v1649_v27, 0  ;;  %10719 = vmatprep.mubr.f32.mxu0 %v1753_v52  ;;  %v1772_v40 = vsub.f32 %v12967_v26, %v1771_v43 }
 0x5eb   :  { %v2377_v41 = vand.u32 4294901760, %v12983_v18  ;;  %v12997_v47 = vand.u32 4294901760, %v2301_v39  ;;  %10720 = vmatmul.mubr.f32.vlgmr.msra.gmra.mrb[4].mxu0 %v1763_v54  ;;  %v1783_v57 = vand.u32 4294901760, %v1782_v1 }
 0x5ec   :  { %v2388_v48 = vsub.f32 %v12980_v44, %v2387_v30  ;;  %v13003_v46 = vsub.f32 %v2304_v20, %v12990_v38  ;;  %11658 = vmatpush3.bf16.msra.mxu0 %v12907_v5  ;;  %v1773_v51 = vand.u32 4294901760, %v1772_v40  ;;  %v3000_v40 = vstv %s9906_s15  ;;  %s9924_s15 = sld [smem:[#allocation3 + $0x2e]] }
 0x5ed   :  { %v13007_v56 = vsub.f32 %v2301_v39, %v12997_v47  ;;  %11660 = vmatprep.subr.bf16.mxu0 %v12914_v49  ;;  %v2378_v62 = vsub.f32 %v12983_v18, %v2377_v41 }
 0x5ee   :  { %v2407_v0 = vand.u32 4294901760, %v13003_v46  ;;  %10722 = vmatprep.mubr.f32.mxu0 %v1773_v51  ;;  %v2389_v2 = vand.u32 4294901760, %v2388_v48 }
 0x5ef   :  { %v2397_v36 = vand.u32 4294901760, %v13007_v56  ;;  %10723 = vmatmul.mubr.f32.gmra.mrb[6].mxu0 %v1783_v57  ;;  %v2379_v37 = vand.u32 4294901760, %v2378_v62 }
 0x5f0   :  { %11662 = vmatpush3.bf16.msra.mxu0 %v12914_v49  ;;  %10733 = vmatprep.mubr.f32.mxu0 %v12943_v59  ;;  %v2408_v5 = vsub.f32 %v13003_v46, %v2407_v0 }
 0x5f1   :  { %10803 = vmatprep.mubr.f32.mxu1 %v2379_v37  ;;  %11664 = vmatprep.subr.bf16.mxu0 %v12920_v55  ;;  %v2398_v4 = vsub.f32 %v13007_v56, %v2397_v36 }
 0x5f2   :  { %10804 = vmatmul.mubr.f32.vlgmr.msra.gmra.mrb[4].mxu1 %v2389_v2  ;;  %v2409_v49 = vand.u32 4294901760, %v2408_v5 }
 0x5f3   :  { %11706 = vmatpush3.bf16.msra.mxu1 %v12916_v50  ;;  %10734 = vmatmul.mubr.f32.vlgmr.msra.gmra.mrb[4].mxu0 %v12940_v53  ;;  %v2399_v6 = vand.u32 4294901760, %v2398_v4 }
 0x5f4   :  { %10736 = vmatprep.mubr.f32.mxu0 %v12957_v16  ;;  %11666 = vmatpush3.bf16.msra.mxu0 %v12920_v55 }
 0x5f5   :  { %10806 = vmatprep.mubr.f32.mxu1 %v2399_v6  ;;  %11708 = vmatprep.subr.bf16.mxu1 %v12923_v63  ;;  %v2964_v6 = vstv %s9898_s0  ;;  %s9920_s0 = sld [smem:[#allocation3 + $0x2a]] }
 0x5f6   :  { %10807 = vmatmul.mubr.f32.gmra.mrb[6].mxu1 %v2409_v49  ;;  %11668 = vmatprep.subr.bf16.mxu0 %v12925_v7 }
 0x5f7   :  { %11710 = vmatpush3.bf16.msra.mxu1 %v12923_v63  ;;  %10817 = vmatprep.mubr.f32.mxu1 %v12976_v42 }
 0x5f8   :  { %10737 = vmatmul.mubr.f32.gmra.mrb[6].mxu0 %v12953_v10  ;;  %11712 = vmatprep.subr.bf16.mxu1 %v12927_v60 }
 0x5f9   :  { %11670 = vmatpush3.bf16.msra.mxu0 %v12925_v7  ;;  %10747 = vmatprep.mubr.f32.mxu0 %v12949_v33 }
 0x5fa   :  { %10818 = vmatmul.mubr.f32.vlgmr.msra.gmra.mrb[4].mxu1 %v12969_v31  ;;  %11672 = vmatprep.subr.bf16.mxu0 %v12887_v58 }
 0x5fb   :  { %10820 = vmatprep.mubr.f32.mxu1 %v12997_v47  ;;  %11714 = vmatpush3.bf16.msra.mxu1 %v12927_v60 }
 0x5fc   :  { %10748 = vmatmul.mubr.f32.vlgmr.msra.gmra.mrb[4].mxu0 %v12946_v61  ;;  %11716 = vmatprep.subr.bf16.mxu1 %v12929_v12  ;;  %v2978_v61 = vstv %s9901_s28  ;;  %s9916_s28 = sld [smem:[#allocation3 + $0x26]] }
 0x5fd   :  { %10750 = vmatprep.mubr.f32.mxu0 %v12967_v26  ;;  %11674 = vmatpush3.bf16.msra.mxu0 %v12887_v58 }
 0x5fe   :  { %10821 = vmatmul.mubr.f32.gmra.mrb[6].mxu1 %v12990_v38  ;;  %11676 = vmatprep.subr.bf16.mxu0 %v12897_v13 }
 0x5ff   :  { %11718 = vmatpush3.bf16.msra.mxu1 %v12929_v12  ;;  %10831 = vmatprep.mubr.f32.mxu1 %v12983_v18 }
 0x600   :  { %10751 = vmatmul.mubr.f32.gmra.mrb[6].mxu0 %v12963_v22  ;;  %11720 = vmatprep.subr.bf16.mxu1 %v12902_v24 }
 0x601   :  { %11678 = vmatpush3.bf16.msra.mxu0 %v12897_v13  ;;  %10761 = vmatprep.mubr.f32.mxu0 %v1751_v15 }
 0x602   :  { %10832 = vmatmul.mubr.f32.vlgmr.msra.gmra.mrb[4].mxu1 %v12980_v44  ;;  %11680 = vmatprep.subr.bf16.mxu0 %v12931_v14 }
 0x603   :  { %10834 = vmatprep.mubr.f32.mxu1 %v13007_v56  ;;  %11722 = vmatpush3.bf16.msra.mxu1 %v12902_v24  ;;  %v3004_v56 = vstv %s9907_s16  ;;  %s9919_s16 = sld [smem:[#allocation3 + $0x29]] }
 0x604   :  { %10762 = vmatmul.mubr.f32.vlgmr.msra.gmra.mrb[4].mxu0 %v1761_v9  ;;  %11724 = vmatprep.subr.bf16.mxu1 %v12909_v21  ;;  %v2986_v9 = vstv %s9903_s9  ;;  %s9917_s9 = sld [smem:[#allocation3 + $0x27]] }
 0x605   :  { %10764 = vmatprep.mubr.f32.mxu0 %v1771_v43  ;;  %11682 = vmatpush3.bf16.msra.mxu0 %v12931_v14 }
 0x606   :  { %10835 = vmatmul.mubr.f32.gmra.mrb[6].mxu1 %v13003_v46  ;;  %11684 = vmatprep.subr.bf16.mxu0 %v12933_v3 }
 0x607   :  { %11726 = vmatpush3.bf16.msra.mxu1 %v12909_v21  ;;  %10845 = vmatprep.mubr.f32.mxu1 %v2377_v41 }
 0x608   :  { %10765 = vmatmul.mubr.f32.gmra.mrb[6].mxu0 %v1781_v35  ;;  %11728 = vmatprep.subr.bf16.mxu1 %v12935_v28 }
 0x609   :  { %11686 = vmatpush3.bf16.msra.mxu0 %v12933_v3  ;;  %10775 = vmatprep.mubr.f32.mxu0 %v12943_v59 }
 0x60a   :  { %10846 = vmatmul.mubr.f32.vlgmr.msra.gmra.mrb[4].mxu1 %v2387_v30  ;;  %11688 = vmatprep.subr.bf16.mxu0 %v12887_v58  ;;  %v2982_v30 = vstv %s9902_s14  ;;  %s9923_s14 = sld [smem:[#allocation3 + $0x2d]] }
 0x60b   :  { %10848 = vmatprep.mubr.f32.mxu1 %v2397_v36  ;;  %11730 = vmatpush3.bf16.msra.mxu1 %v12935_v28  ;;  %v2996_v28 = vstv %s9905_s5  ;;  %s9912_s5 = sld [smem:[#allocation3 + $0x22]] }
 0x60c   :  { %10776 = vmatmul.mubr.f32.vlgmr.msra.gmra.mrb[4].mxu0 %v12940_v53  ;;  %11732 = vmatprep.subr.bf16.mxu1 %v12937_v29 }
 0x60d   :  { %10778 = vmatprep.mubr.f32.mxu0 %v12957_v16  ;;  %11690 = vmatpush3.bf16.msra.mxu0 %v12887_v58 }
 0x60e   :  { %10849 = vmatmul.mubr.f32.gmra.mrb[6].mxu1 %v2407_v0  ;;  %11692 = vmatprep.subr.bf16.mxu0 %v12897_v13 }
 0x60f   :  { %11734 = vmatpush3.bf16.msra.mxu1 %v12937_v29  ;;  %10859 = vmatprep.mubr.f32.mxu1 %v12976_v42 }
 0x610   :  { %10779 = vmatmul.mubr.f32.gmra.mrb[6].mxu0 %v12953_v10  ;;  %11736 = vmatprep.subr.bf16.mxu1 %v12902_v24 }
 0x611   :  { %11694 = vmatpush3.bf16.msra.mxu0 %v12897_v13  ;;  %10789 = vmatprep.mubr.f32.mxu0 %v12943_v59 }
 0x612   :  { %10860 = vmatmul.mubr.f32.vlgmr.msra.gmra.mrb[4].mxu1 %v12969_v31 }
 0x613   :  { %10862 = vmatprep.mubr.f32.mxu1 %v12997_v47  ;;  %11738 = vmatpush3.bf16.msra.mxu1 %v12902_v24 }
 0x614   :  { %10790 = vmatmul.mubr.f32.vlgmr.msra.gmra.mrb[4].mxu0 %v12940_v53  ;;  %11740 = vmatprep.subr.bf16.mxu1 %v12909_v21 }
 0x615   :  { %10792 = vmatprep.mubr.f32.mxu0 %v12957_v16 }
 0x616   :  { %10863 = vmatmul.mubr.f32.gmra.mrb[6].mxu1 %v12990_v38 }
 0x617   :  { %11742 = vmatpush3.bf16.msra.mxu1 %v12909_v21  ;;  %10873 = vmatprep.mubr.f32.mxu1 %v12976_v42 }
 0x618   :  { %10793 = vmatmul.mubr.f32.gmra.mrb[6].mxu0 %v12953_v10 }
 0x61a   :  { %10874 = vmatmul.mubr.f32.vlgmr.msra.gmra.mrb[4].mxu1 %v12969_v31  ;;  %v2968_v31 = vstv %s9899_s11  ;;  %s9925_s11 = sld [smem:[#allocation3 + $0x2f]] }
 0x61b   :  { %10876 = vmatprep.mubr.f32.mxu1 %v12997_v47 }
 0x61e   :  { %10877 = vmatmul.mubr.f32.gmra.mrb[6].mxu1 %v12990_v38 }
 0x6e7   :  { %v10791_v58 = vpop.f32.mrb[4].mxu0 }
 0x6e8   :  { %2930 = vrot.lane.b32.xlu0 %v10791_v58, %s12506_s25  ;;  %v2272_v13 = vpop.f32.mrb[5].mxu0 }
 0x6e9   :  { %2928 = vrot.lane.b32.xlu1 %v2272_v13, %s12506_s25 }
 0x6eb   :  { %v13103_v24 = vpop.f32.mrb[6].mxu0 }
 0x6ec   :  { %v13105_v50 = vpop.f32.mrb[7].mxu0 }
 0x6ed   :  { %v10875_v21 = vpop.f32.mrb[4].mxu1 }
 0x6ee   :  { %2938 = vrot.lane.b32.xlu0 %v10875_v21, %s12506_s25  ;;  %v2898_v55 = vpop.f32.mrb[5].mxu1 }
 0x6ef   :  { %2936 = vrot.lane.b32.xlu1 %v2898_v55, %s12506_s25 }
 0x6f1   :  { %v13109_v63 = vpop.f32.mrb[6].mxu1 }
 0x6f2   :  { %v13111_v7 = vpop.f32.mrb[7].mxu1 }
 0x75a   :  { %v2931_v60 = vpop.permute.xlu0 %2930 }
 0x75b   :  { %2954 = vst.msk [vmem:[#allocation2 + $0x10] sm:$0xff] %vm2952_vm2, %v2931_v60  ;;  %v2929_v12 = vpop.permute.xlu1 %2928 }
 0x75c   :  { %2953 = vst.msk [vmem:[#allocation2 + $0x8] sm:$0xff] %vm2952_vm2, %v2929_v12 }
 0x760   :  { %v2939_v14 = vpop.permute.xlu0 %2938 }
 0x761   :  { %2958 = vst.msk [vmem:[#allocation2 + $0x40] sm:$0xff] %vm2952_vm2, %v2939_v14  ;;  %v2937_v3 = vpop.permute.xlu1 %2936 }
 0x762   :  { %2957 = vst.msk [vmem:[#allocation2 + $0x38] sm:$0xff] %vm2952_vm2, %v2937_v3 }
 0x763   :  { %v2989_v29 = vld [vmem:[#allocation2 + $0x9] sm:$0xff] }
 0x764   :  { %v2997_v53 = vmul.f32 %v2996_v28, %v2989_v29  ;;  %v2975_v59 = vld [vmem:[#allocation2 + $0x8] sm:$0xff]  ;;  %v2993_v22 = vmul.f32 %v2992_v19, %v2989_v29  ;;  %v3001_v46 = vmul.f32 %v3000_v40, %v2989_v29 }
 0x765   :  { %v2979_v33 = vmul.f32 %v2978_v61, %v2975_v59  ;;  %v2987_v15 = vmul.f32 %v2986_v9, %v2975_v59  ;;  %v2961_v26 = vld [vmem:[#allocation2 + $0x7] sm:$0xff]  ;;  %v2983_v39 = vmul.f32 %v2982_v30, %v2975_v59 }
 0x766   :  { %3039 = vrot.lane.b32.xlu1 %v2997_v53, %s12508_s29  ;;  %v2969_v35 = vmul.f32 %v2968_v31, %v2961_v26  ;;  %v2973_v44 = vmul.f32 %v2972_v32, %v2961_v26  ;;  %v3005_v0 = vadd.f32 %v3004_v56, %v3001_v46  ;;  %v2965_v13 = vmul.f32 %v2964_v6, %v2961_v26 }
 0x769   :  { %v2990_v8 = vld [vmem:[#allocation2 + $0x39] sm:$0xff] }
 0x76a   :  { %3019 = vrot.lane.b32.xlu1 %v2979_v33, %s12509_s30  ;;  %v2998_v10 = vmul.f32 %v2996_v28, %v2990_v8  ;;  %v2976_v11 = vld [vmem:[#allocation2 + $0x38] sm:$0xff]  ;;  %v2994_v34 = vmul.f32 %v2992_v19, %v2990_v8  ;;  %v3002_v2 = vmul.f32 %v3000_v40, %v2990_v8  ;;  %v69_v28 = vld [vmem:[%s14832_s4] sm:$0xff] }
 0x76b   :  { %v2980_v16 = vmul.f32 %v2978_v61, %v2976_v11  ;;  %v2988_v17 = vmul.f32 %v2986_v9, %v2976_v11  ;;  %v2962_v52 = vld [vmem:[#allocation2 + $0x37] sm:$0xff]  ;;  %v2984_v57 = vmul.f32 %v2982_v30, %v2976_v11  ;;  %v3114_v30 = vstv %s9909_s27  ;;  %s9933_s27 = sld [smem:[#allocation3 + $0x37]] }
 0x76c   :  { %3041 = vrot.lane.b32.xlu0 %v2998_v10, %s12508_s29  ;;  %v2970_v18 = vmul.f32 %v2968_v31, %v2962_v52  ;;  %v2974_v27 = vmul.f32 %v2972_v32, %v2962_v52  ;;  %v3006_v5 = vadd.f32 %v3004_v56, %v3002_v2  ;;  %v2966_v14 = vmul.f32 %v2964_v6, %v2962_v52  ;;  %v70_v10 = vld [vmem:[%s14832_s4 + $0x8] sm:$0xff]  ;;  %s9914_s4 = sld [smem:[#allocation3 + $0x24]] }
 0x76d   :  { %v3124_v31 = vstv %s9911_s24  ;;  %s9936_s24 = sld [smem:[#allocation3 + $0x3a]] }
 0x76e   :  { %3029 = vrot.lane.b32.xlu1 %v2987_v15, %s12508_s29 }
 0x770   :  { %3021 = vrot.lane.b32.xlu0 %v2980_v16, %s12509_s30 }
 0x774   :  { %3031 = vrot.lane.b32.xlu0 %v2988_v17, %s12508_s29 }
 0x7d8   :  { %v3040_v23 = vpop.permute.xlu1 %3039 }
 0x7d9   :  { %v3045_v25 = vadd.f32 %v3040_v23, %v2993_v22  ;;  %v3142_v22 = vstv %s9915_s23  ;;  %s9935_s23 = sld [smem:[#allocation3 + $0x39]] }
 0x7db   :  { %3059 = vrot.lane.b32.xlu1 %v3045_v25, %s12506_s25 }
 0x7dc   :  { %v3020_v42 = vpop.permute.xlu1 %3019 }
 0x7dd   :  { %v3025_v54 = vadd.f32 %v3020_v42, %v2973_v44 }
 0x7de   :  { %v3042_v43 = vpop.permute.xlu0 %3041 }
 0x7df   :  { %v3046_v45 = vadd.f32 %v3042_v43, %v2994_v34  ;;  %3009 = vrot.lane.b32.xlu1 %v2969_v35, %s12508_s29  ;;  %v3132_v35 = vstv %s9913_s26  ;;  %s9931_s26 = sld [smem:[#allocation3 + $0x35]] }
 0x7e0   :  { %v3030_v38 = vpop.permute.xlu1 %3029 }
 0x7e1   :  { %3061 = vrot.lane.b32.xlu0 %v3046_v45, %s12506_s25  ;;  %v3035_v41 = vadd.f32 %v3030_v38, %v2983_v39  ;;  %v3118_v38 = vstv %s9910_s1  ;;  %s9934_s1 = sld [smem:[#allocation3 + $0x38]] }
 0x7e2   :  { %v3022_v20 = vpop.permute.xlu0 %3021 }
 0x7e3   :  { %3049 = vrot.lane.b32.xlu1 %v3025_v54, %s12510_s12  ;;  %v3026_v1 = vadd.f32 %v3022_v20, %v2974_v27  ;;  %v3138_v54 = vstv %s9914_s4  ;;  %s9937_s4 = sld [smem:[#allocation3 + $0x3b]] }
 0x7e5   :  { %3011 = vrot.lane.b32.xlu0 %v2970_v18, %s12508_s29 }
 0x7e6   :  { %v3032_v51 = vpop.permute.xlu0 %3031 }
 0x7e7   :  { %v3036_v62 = vadd.f32 %v3032_v51, %v2984_v57 }
 0x7e9   :  { %3051 = vrot.lane.b32.xlu0 %v3026_v1, %s12510_s12 }
 0x84d   :  { %v3060_v47 = vpop.permute.xlu1 %3059 }
 0x84e   :  { %v3065_v48 = vadd.f32 %v3060_v47, %v3035_v41 }
 0x850   :  { %3069 = vrot.lane.b32.xlu1 %v3065_v48, %s12508_s29 }
 0x851   :  { %v3010_v4 = vpop.permute.xlu1 %3009 }
 0x852   :  { %v3015_v21 = vadd.f32 %v3010_v4, %v2965_v13  ;;  %v3146_v4 = vstv %s9916_s28  ;;  %s9930_s28 = sld [smem:[#allocation3 + $0x34]] }
 0x853   :  { %v3062_v36 = vpop.permute.xlu0 %3061 }
 0x854   :  { %v3066_v37 = vadd.f32 %v3062_v36, %v3036_v62  ;;  %3079 = vrot.lane.b32.xlu1 %v3005_v0, %s12510_s12 }
 0x855   :  { %v3050_v49 = vpop.permute.xlu1 %3049 }
 0x856   :  { %3071 = vrot.lane.b32.xlu0 %v3066_v37, %s12508_s29  ;;  %v3055_v60 = vadd.f32 %v3050_v49, %v3015_v21  ;;  %v3128_v37 = vstv %s9912_s5  ;;  %s9929_s5 = sld [smem:[#allocation3 + $0x33]] }
 0x857   :  { %v3012_v58 = vpop.permute.xlu0 %3011 }
 0x858   :  { %v3016_v53 = vadd.f32 %v3012_v58, %v2966_v14 }
 0x85a   :  { %3081 = vrot.lane.b32.xlu0 %v3006_v5, %s12510_s12 }
 0x85b   :  { %v3052_v12 = vpop.permute.xlu0 %3051 }
 0x85c   :  { %v3056_v33 = vadd.f32 %v3052_v12, %v3016_v53 }
 0x8c2   :  { %v3070_v55 = vpop.permute.xlu1 %3069 }
 0x8c3   :  { %v3075_v3 = vadd.f32 %v3070_v55, %v3055_v60  ;;  %v3150_v55 = vstv %s9917_s9  ;;  %s9932_s9 = sld [smem:[#allocation3 + $0x36]] }
 0x8c6   :  { %v3080_v29 = vpop.permute.xlu1 %3079 }
 0x8c7   :  { %v3085_v59 = vadd.f32 %v3080_v29, %v3075_v3 }
 0x8c8   :  { %v3072_v61 = vpop.permute.xlu0 %3071 }
 0x8c9   :  { %v13136_v8 = vadd.f32 %v3085_v59, %v69_v28  ;;  %v3076_v9 = vadd.f32 %v3072_v61, %v3056_v33  ;;  %v3110_v61 = vstv %s9908_s10  ;;  %s9928_s10 = sld [smem:[#allocation3 + $0x32]] }
 0x8cb   :  { %3098 = vrot.lane.b32.xlu1 %v13136_v8, %s12506_s25  ;;  %3090 = vst.msk [vmem:[#allocation11] sm:$0xff] %vm3089_vm3, %v13136_v8 }
 0x8cc   :  { %v3082_v11 = vpop.permute.xlu0 %3081 }
 0x8cd   :  { %v3086_v15 = vadd.f32 %v3082_v11, %v3076_v9 }
 0x8cf   :  { %v13144_v16 = vadd.f32 %v3086_v15, %v70_v10 }
 0x8d1   :  { %3100 = vrot.lane.b32.xlu0 %v13144_v16, %s12506_s25  ;;  %3091 = vst.msk [vmem:[#allocation11 + $0x8] sm:$0xff] %vm3089_vm3, %v13144_v16 }
 0x93d   :  { %v3099_v17 = vpop.permute.xlu1 %3098 }
 0x93e   :  { %3105 = vst.msk [vmem:[#allocation2 + $0x8] sm:$0xff] %vm3104_vm4, %v3099_v17 }
 0x943   :  { %v3101_v19 = vpop.permute.xlu0 %3100 }
 0x944   :  { %3106 = vst.msk [vmem:[#allocation2 + $0x38] sm:$0xff] %vm3104_vm4, %v3101_v19 }
 0x945   :  { %v3135_v23 = vld [vmem:[#allocation2 + $0x9] sm:$0xff] }
 0x946   :  { %v3143_v25 = vmul.f32 %v3142_v22, %v3135_v23  ;;  %v3121_v26 = vld [vmem:[#allocation2 + $0x8] sm:$0xff]  ;;  %v3139_v18 = vmul.f32 %v3138_v54, %v3135_v23  ;;  %v3147_v13 = vmul.f32 %v3146_v4, %v3135_v23 }
 0x947   :  { %v3125_v32 = vmul.f32 %v3124_v31, %v3121_v26  ;;  %v3133_v44 = vmul.f32 %v3132_v35, %v3121_v26  ;;  %v3107_v1 = vld [vmem:[#allocation2 + $0x7] sm:$0xff]  ;;  %v3129_v5 = vmul.f32 %v3128_v37, %v3121_v26 }
 0x948   :  { %3185 = vrot.lane.b32.xlu1 %v3143_v25, %s12508_s29  ;;  %v3115_v40 = vmul.f32 %v3114_v30, %v3107_v1  ;;  %v3119_v48 = vmul.f32 %v3118_v38, %v3107_v1  ;;  %v3151_v14 = vadd.f32 %v3150_v55, %v3147_v13  ;;  %v3111_v10 = vmul.f32 %v3110_v61, %v3107_v1 }
 0x94b   :  { %v3136_v34 = vld [vmem:[#allocation2 + $0x39] sm:$0xff] }
 0x94c   :  { %3165 = vrot.lane.b32.xlu1 %v3125_v32, %s12509_s30  ;;  %v3144_v42 = vmul.f32 %v3142_v22, %v3136_v34  ;;  %v3122_v43 = vld [vmem:[#allocation2 + $0x38] sm:$0xff]  ;;  %v3140_v39 = vmul.f32 %v3138_v54, %v3136_v34  ;;  %v3148_v29 = vmul.f32 %v3146_v4, %v3136_v34 }
 0x94d   :  { %v3126_v45 = vmul.f32 %v3124_v31, %v3122_v43  ;;  %v3134_v52 = vmul.f32 %v3132_v35, %v3122_v43  ;;  %v3108_v51 = vld [vmem:[#allocation2 + $0x37] sm:$0xff]  ;;  %v3130_v60 = vmul.f32 %v3128_v37, %v3122_v43  ;;  %v3252_v37 = vstv %s9919_s16  ;;  %s9949_s16 = sld [smem:[#allocation3 + $0xc]] }
 0x94e   :  { %3187 = vrot.lane.b32.xlu0 %v3144_v42, %s12508_s29  ;;  %v3116_v57 = vmul.f32 %v3114_v30, %v3108_v51  ;;  %v3120_v0 = vmul.f32 %v3118_v38, %v3108_v51  ;;  %v3152_v53 = vadd.f32 %v3150_v55, %v3148_v29  ;;  %v3112_v22 = vmul.f32 %v3110_v61, %v3108_v51 }
 0x94f   :  { %v3262_v30 = vstv %s9921_s13  ;;  %s9952_s13 = sld [smem:[#allocation3 + $0xf]] }
 0x950   :  { %3175 = vrot.lane.b32.xlu1 %v3133_v44, %s12508_s29 }
 0x952   :  { %3167 = vrot.lane.b32.xlu0 %v3126_v45, %s12509_s30 }
 0x956   :  { %3177 = vrot.lane.b32.xlu0 %v3134_v52, %s12508_s29 }
 0x9ba   :  { %v3186_v20 = vpop.permute.xlu1 %3185 }
 0x9bb   :  { %v3191_v27 = vadd.f32 %v3186_v20, %v3139_v18  ;;  %v3280_v18 = vstv %s9925_s11  ;;  %s9956_s11 = sld [smem:[#allocation3 + $0x13]] }
 0x9bd   :  { %3205 = vrot.lane.b32.xlu1 %v3191_v27, %s12506_s25 }
 0x9be   :  { %v3166_v41 = vpop.permute.xlu1 %3165 }
 0x9bf   :  { %v3171_v56 = vadd.f32 %v3166_v41, %v3119_v48 }
 0x9c0   :  { %v3188_v47 = vpop.permute.xlu0 %3187 }
 0x9c1   :  { %v3192_v46 = vadd.f32 %v3188_v47, %v3140_v39  ;;  %3155 = vrot.lane.b32.xlu1 %v3115_v40, %s12508_s29  ;;  %v3270_v40 = vstv %s9923_s14  ;;  %s9953_s14 = sld [smem:[#allocation3 + $0x10]] }
 0x9c2   :  { %v3176_v2 = vpop.permute.xlu1 %3175 }
 0x9c3   :  { %3207 = vrot.lane.b32.xlu0 %v3192_v46, %s12506_s25  ;;  %v3181_v6 = vadd.f32 %v3176_v2, %v3129_v5  ;;  %v3256_v2 = vstv %s9920_s0  ;;  %s9951_s0 = sld [smem:[#allocation3 + $0xe]] }
 0x9c4   :  { %v3168_v62 = vpop.permute.xlu0 %3167 }
 0x9c5   :  { %3195 = vrot.lane.b32.xlu1 %v3171_v56, %s12510_s12  ;;  %v3172_v36 = vadd.f32 %v3168_v62, %v3120_v0  ;;  %v3276_v56 = vstv %s9924_s15  ;;  %s9948_s15 = sld [smem:[#allocation3 + $0xb]] }
 0x9c7   :  { %3157 = vrot.lane.b32.xlu0 %v3116_v57, %s12508_s29 }
 0x9c8   :  { %v3178_v21 = vpop.permute.xlu0 %3177 }
 0x9c9   :  { %v3182_v12 = vadd.f32 %v3178_v21, %v3130_v60 }
 0x9cb   :  { %3197 = vrot.lane.b32.xlu0 %v3172_v36, %s12510_s12 }
 0xa2f   :  { %v3206_v49 = vpop.permute.xlu1 %3205 }
 0xa30   :  { %v3211_v58 = vadd.f32 %v3206_v49, %v3181_v6 }
 0xa32   :  { %3215 = vrot.lane.b32.xlu1 %v3211_v58, %s12508_s29 }
 0xa33   :  { %v3156_v59 = vpop.permute.xlu1 %3155 }
 0xa34   :  { %v3161_v11 = vadd.f32 %v3156_v59, %v3111_v10  ;;  %v3284_v59 = vstv %s9926_s18  ;;  %s9964_s18 = sld [smem:[#allocation3 + $0x1b]] }
 0xa35   :  { %v3208_v3 = vpop.permute.xlu0 %3207 }
 0xa36   :  { %v3212_v28 = vadd.f32 %v3208_v3, %v3182_v12  ;;  %3225 = vrot.lane.b32.xlu1 %v3151_v14, %s12510_s12 }
 0xa37   :  { %v3196_v33 = vpop.permute.xlu1 %3195 }
 0xa38   :  { %3217 = vrot.lane.b32.xlu0 %v3212_v28, %s12508_s29  ;;  %v3201_v17 = vadd.f32 %v3196_v33, %v3161_v11  ;;  %v3266_v28 = vstv %s9922_s17  ;;  %s9947_s17 = sld [smem:[#allocation3 + $0xa]] }
 0xa39   :  { %v3158_v9 = vpop.permute.xlu0 %3157 }
 0xa3a   :  { %v3162_v26 = vadd.f32 %v3158_v9, %v3112_v22 }
 0xa3c   :  { %3227 = vrot.lane.b32.xlu0 %v3152_v53, %s12510_s12 }
 0xa3d   :  { %v3198_v19 = vpop.permute.xlu0 %3197 }
 0xa3e   :  { %v3202_v34 = vadd.f32 %v3198_v19, %v3162_v26 }
 0xaa4   :  { %v3216_v15 = vpop.permute.xlu1 %3215 }
 0xaa5   :  { %v3221_v23 = vadd.f32 %v3216_v15, %v3201_v17  ;;  %v3288_v15 = vstv %s9927_s21  ;;  %s9940_s21 = sld [smem:[#allocation3 + $0x3]] }
 0xaa8   :  { %v3226_v25 = vpop.permute.xlu1 %3225 }
 0xaa9   :  { %v3231_v31 = vadd.f32 %v3226_v25, %v3221_v23 }
 0xaaa   :  { %v3218_v32 = vpop.permute.xlu0 %3217 }
 0xaab   :  { %v3233_v35 = vmax.f32 %v3231_v31, 0.0  ;;  %v3222_v42 = vadd.f32 %v3218_v32, %v3202_v34  ;;  %v3248_v34 = vstv %s9918_s22  ;;  %s9945_s22 = sld [smem:[#allocation3 + $0x8]] }
 0xaad   :  { %3237 = vrot.lane.b32.xlu1 %v3233_v35, %s12506_s25 }
 0xaae   :  { %v3228_v43 = vpop.permute.xlu0 %3227 }
 0xaaf   :  { %v3232_v44 = vadd.f32 %v3228_v43, %v3222_v42 }
 0xab1   :  { %v3234_v45 = vmax.f32 %v3232_v44, 0.0 }
 0xab3   :  { %3239 = vrot.lane.b32.xlu0 %v3234_v45, %s12506_s25 }
 0xb1f   :  { %v3238_v52 = vpop.permute.xlu1 %3237 }
 0xb20   :  { %3243 = vst.msk [vmem:[#allocation2 + $0x8] sm:$0xff] %vm3104_vm4, %v3238_v52 }
 0xb25   :  { %v3240_v54 = vpop.permute.xlu0 %3239 }
 0xb26   :  { %3244 = vst.msk [vmem:[#allocation2 + $0x38] sm:$0xff] %vm3104_vm4, %v3240_v54 }
 0xb27   :  { %v3273_v20 = vld [vmem:[#allocation2 + $0x9] sm:$0xff] }
 0xb28   :  { %v3281_v27 = vmul.f32 %v3280_v18, %v3273_v20  ;;  %v3259_v1 = vld [vmem:[#allocation2 + $0x8] sm:$0xff]  ;;  %v3277_v57 = vmul.f32 %v3276_v56, %v3273_v20  ;;  %v3285_v10 = vmul.f32 %v3284_v59, %v3273_v20 }
 0xb29   :  { %v3263_v38 = vmul.f32 %v3262_v30, %v3259_v1  ;;  %v3271_v48 = vmul.f32 %v3270_v40, %v3259_v1  ;;  %v3245_v36 = vld [vmem:[#allocation2 + $0x7] sm:$0xff]  ;;  %v3267_v53 = vmul.f32 %v3266_v28, %v3259_v1 }
 0xb2a   :  { %3323 = vrot.lane.b32.xlu1 %v3281_v27, %s12508_s29  ;;  %v3253_v4 = vmul.f32 %v3252_v37, %v3245_v36  ;;  %v3257_v58 = vmul.f32 %v3256_v2, %v3245_v36  ;;  %v3289_v22 = vadd.f32 %v3288_v15, %v3285_v10  ;;  %v3249_v43 = vmul.f32 %v3248_v34, %v3245_v36 }
 0xb2d   :  { %v3274_v39 = vld [vmem:[#allocation2 + $0x39] sm:$0xff] }
 0xb2e   :  { %3303 = vrot.lane.b32.xlu1 %v3263_v38, %s12509_s30  ;;  %v3282_v41 = vmul.f32 %v3280_v18, %v3274_v39  ;;  %v3260_v47 = vld [vmem:[#allocation2 + $0x38] sm:$0xff]  ;;  %v3278_v5 = vmul.f32 %v3276_v56, %v3274_v39  ;;  %v3286_v26 = vmul.f32 %v3284_v59, %v3274_v39  ;;  %v3388_v56 = vld [vmem:[#allocation2 + $0x40] sm:$0xff] }
 0xb2f   :  { %v3264_v46 = vmul.f32 %v3262_v30, %v3260_v47  ;;  %v3272_v51 = vmul.f32 %v3270_v40, %v3260_v47  ;;  %v3246_v21 = vld [vmem:[#allocation2 + $0x37] sm:$0xff]  ;;  %v3268_v17 = vmul.f32 %v3266_v28, %v3260_v47 }
 0xb30   :  { %3325 = vrot.lane.b32.xlu0 %v3282_v41, %s12508_s29  ;;  %v3254_v60 = vmul.f32 %v3252_v37, %v3246_v21  ;;  %v3258_v14 = vmul.f32 %v3256_v2, %v3246_v21  ;;  %v3290_v31 = vadd.f32 %v3288_v15, %v3286_v26  ;;  %v3250_v18 = vmul.f32 %v3248_v34, %v3246_v21  ;;  %v3396_v37 = vld [vmem:[#allocation7 + $0xa0] sm:$0xff]  ;;  %v3398_v34 = vld [vmem:[#allocation7 + $0xb0] sm:$0xff] }
 0xb32   :  { %3313 = vrot.lane.b32.xlu1 %v3271_v48, %s12508_s29 }
 0xb34   :  { %3305 = vrot.lane.b32.xlu0 %v3264_v46, %s12509_s30 }
 0xb38   :  { %3315 = vrot.lane.b32.xlu0 %v3272_v51, %s12508_s29 }
 0xb9c   :  { %v3324_v62 = vpop.permute.xlu1 %3323 }
 0xb9d   :  { %v3329_v0 = vadd.f32 %v3324_v62, %v3277_v57 }
 0xb9f   :  { %3343 = vrot.lane.b32.xlu1 %v3329_v0, %s12506_s25 }
 0xba0   :  { %v3304_v6 = vpop.permute.xlu1 %3303 }
 0xba1   :  { %v3309_v55 = vadd.f32 %v3304_v6, %v3257_v58 }
 0xba2   :  { %v3326_v49 = vpop.permute.xlu0 %3325 }
 0xba3   :  { %v3330_v13 = vadd.f32 %v3326_v49, %v3278_v5  ;;  %3293 = vrot.lane.b32.xlu1 %v3253_v4, %s12508_s29  ;;  %v4059_v5 = vsel %vm390_vm1, %v3396_v37, 0 }
 0xba4   :  { %v3314_v29 = vpop.permute.xlu1 %3313  ;;  %v13218_v6 = vand.u32 4294901760, %v4059_v5 }
 0xba5   :  { %3345 = vrot.lane.b32.xlu0 %v3330_v13, %s12506_s25  ;;  %v3319_v61 = vadd.f32 %v3314_v29, %v3267_v53 }
 0xba6   :  { %v3306_v12 = vpop.permute.xlu0 %3305  ;;  %v13222_v13 = vsub.f32 %v4059_v5, %v13218_v6 }
 0xba7   :  { %3333 = vrot.lane.b32.xlu1 %v3309_v55, %s12510_s12  ;;  %v3310_v3 = vadd.f32 %v3306_v12, %v3258_v14 }
 0xba8   :  { %v4141_v55 = vand.u32 4294901760, %v13222_v13 }
 0xba9   :  { %3295 = vrot.lane.b32.xlu0 %v3254_v60, %s12508_s29 }
 0xbaa   :  { %v3316_v11 = vpop.permute.xlu0 %3315  ;;  %v4142_v12 = vsub.f32 %v13222_v13, %v4141_v55 }
 0xbab   :  { %v3320_v19 = vadd.f32 %v3316_v11, %v3268_v17  ;;  %v3395_v11 = vld [vmem:[#allocation7 + $0x98] sm:$0xff] }
 0xbac   :  { %v4143_v14 = vand.u32 4294901760, %v4142_v12  ;;  %v3426_v26 = vsel %vm390_vm1, %v3395_v11, 0 }
 0xbad   :  { %3335 = vrot.lane.b32.xlu0 %v3310_v3, %s12510_s12 }
 0xbae   :  { %10971 = vmatprep.mubr.f32.mxu1 %v4143_v14 }
 0xc11   :  { %v3344_v33 = vpop.permute.xlu1 %3343 }
 0xc12   :  { %v3349_v9 = vadd.f32 %v3344_v33, %v3319_v61  ;;  %v3393_v61 = vld [vmem:[#allocation7 + $0x88] sm:$0xff] }
 0xc13   :  { %v3420_v33 = vsel %vm390_vm1, %v3393_v61, 0 }
 0xc14   :  { %3353 = vrot.lane.b32.xlu1 %v3349_v9, %s12508_s29  ;;  %v3394_v9 = vld [vmem:[#allocation7 + $0x90] sm:$0xff]  ;;  %v13236_v17 = vand.u32 4294901760, %v3420_v33 }
 0xc15   :  { %v3294_v32 = vpop.permute.xlu1 %3293 }
 0xc16   :  { %v3299_v44 = vadd.f32 %v3294_v32, %v3249_v43 }
 0xc17   :  { %v3346_v23 = vpop.permute.xlu0 %3345 }
 0xc18   :  { %v3350_v25 = vadd.f32 %v3346_v23, %v3320_v19  ;;  %3363 = vrot.lane.b32.xlu1 %v3289_v22, %s12510_s12  ;;  %v3423_v19 = vsel %vm390_vm1, %v3394_v9, 0  ;;  %v3397_v23 = vld [vmem:[#allocation7 + $0xa8] sm:$0xff] }
 0xc19   :  { %v3334_v35 = vpop.permute.xlu1 %3333  ;;  %v13240_v32 = vand.u32 4294901760, %v3423_v19 }
 0xc1a   :  { %3355 = vrot.lane.b32.xlu0 %v3350_v25, %s12508_s29  ;;  %v3339_v52 = vadd.f32 %v3334_v35, %v3299_v44  ;;  %v13243_v35 = vsub.f32 %v3420_v33, %v13236_v17  ;;  %v13248_v44 = vand.u32 4294901760, %v3426_v26 }
 0xc1b   :  { %v3296_v42 = vpop.permute.xlu0 %3295 }
 0xc1c   :  { %2932 = vrot.lane.b32.xlu1 %v13105_v50, %s12506_s25  ;;  %v3300_v1 = vadd.f32 %v3296_v42, %v3250_v18  ;;  %v4062_v42 = vsel %vm390_vm1, %v3397_v23, 0 }
 0xc1e   :  { %3365 = vrot.lane.b32.xlu0 %v3290_v31, %s12510_s12 }
 0xc1f   :  { %v3336_v54 = vpop.permute.xlu0 %3335 }
 0xc20   :  { %v3340_v38 = vadd.f32 %v3336_v54, %v3300_v1  ;;  %v4065_v54 = vsel %vm390_vm1, %v3398_v34, 0  ;;  %v3509_v1 = vand.u32 4294901760, %v13243_v35 }
 0xc22   :  { %2934 = vrot.lane.b32.xlu0 %v13103_v24, %s12506_s25 }
 0xc86   :  { %v3354_v45 = vpop.permute.xlu1 %3353 }
 0xc87   :  { %v3359_v20 = vadd.f32 %v3354_v45, %v3339_v52  ;;  %v3399_v45 = vld [vmem:[#allocation7 + $0xb8] sm:$0xff] }
 0xc8a   :  { %v3364_v27 = vpop.permute.xlu1 %3363 }
 0xc8b   :  { %v3369_v50 = vadd.f32 %v3364_v27, %v3359_v20  ;;  %v13256_v20 = vsub.f32 %v3423_v19, %v13240_v32  ;;  %v13258_v27 = vand.u32 4294901760, %v4062_v42 }
 0xc8c   :  { %v3356_v30 = vpop.permute.xlu0 %3355 }
 0xc8d   :  { %v3371_v39 = vadd.f32 %v3369_v50, %v13136_v8  ;;  %v3360_v40 = vadd.f32 %v3356_v30, %v3340_v38  ;;  %v3384_v8 = vld [vmem:[#allocation2 + $0x10] sm:$0xff]  ;;  %v4068_v50 = vsel %vm390_vm1, %v3399_v45, 0 }
 0xc8e   :  { %v2933_v24 = vpop.permute.xlu1 %2932 }
 0xc8f   :  { %2955 = vst.msk [vmem:[#allocation2 + $0x18] sm:$0xff] %vm2952_vm2, %v2933_v24  ;;  %3375 = vrot.lane.b32.xlu1 %v3371_v39, %s12506_s25  ;;  %v13265_v24 = vsub.f32 %v3426_v26, %v13248_v44 }
 0xc90   :  { %v3366_v41 = vpop.permute.xlu0 %3365 }
 0xc91   :  { %v3370_v47 = vadd.f32 %v3366_v41, %v3360_v40  ;;  %v13267_v40 = vand.u32 4294901760, %v4065_v54  ;;  %v3529_v37 = vand.u32 4294901760, %v13265_v24 }
 0xc93   :  { %v3372_v48 = vadd.f32 %v3370_v47, %v13144_v16  ;;  %2940 = vrot.lane.b32.xlu1 %v13111_v7, %s12506_s25  ;;  %v3392_v7 = vld [vmem:[#allocation7 + $0x80] sm:$0xff]  ;;  %v3530_v61 = vsub.f32 %v13265_v24, %v3529_v37 }
 0xc94   :  { %v2935_v46 = vpop.permute.xlu0 %2934  ;;  %v3417_v57 = vsel %vm390_vm1, %v3392_v7, 0  ;;  %v3510_v7 = vsub.f32 %v13243_v35, %v3509_v1 }
 0xc95   :  { %2956 = vst.msk [vmem:[#allocation2 + $0x20] sm:$0xff] %vm2952_vm2, %v2935_v46  ;;  %3377 = vrot.lane.b32.xlu0 %v3372_v48, %s12506_s25  ;;  %v13206_v62 = vand.u32 4294901760, %v3417_v57  ;;  %v3519_v46 = vand.u32 4294901760, %v13256_v20 }
 0xc96   :  { %v3385_v51 = vld [vmem:[#allocation2 + $0x18] sm:$0xff] }
 0xc97   :  { %3408 = vrot.lane.b32.xlu1 %v3385_v51, %s12508_s29  ;;  %v13210_v36 = vsub.f32 %v3417_v57, %v13206_v62  ;;  %v13273_v51 = vsub.f32 %v4062_v42, %v13258_v27 }
 0xc99   :  { %2942 = vrot.lane.b32.xlu0 %v13109_v63, %s12506_s25  ;;  %v3499_v63 = vand.u32 4294901760, %v13210_v36  ;;  %v4151_v12 = vand.u32 4294901760, %v13273_v51 }
 0xc9b   :  { %v3500_v4 = vsub.f32 %v13210_v36, %v3499_v63  ;;  %v4152_v26 = vsub.f32 %v13273_v51, %v4151_v12 }
 0xc9c   :  { %v3386_v16 = vld [vmem:[#allocation2 + $0x20] sm:$0xff] }
 0xc9d   :  { %3406 = vrot.lane.b32.xlu0 %v3384_v8, %s12508_s29  ;;  %v3501_v58 = vand.u32 4294901760, %v3500_v4  ;;  %v13275_v8 = vand.u32 4294901760, %v4068_v50 }
 0xc9f   :  { %10887 = vmatprep.mubr.f32.mxu0 %v3501_v58  ;;  %v13310_v14 = vsub.f32 %v4068_v50, %v13275_v8 }
 0xca1   :  { %4048 = vrot.lane.b32.xlu0 %v3388_v56, %s12508_s29 }
 0xca5   :  { %3410 = vrot.lane.b32.xlu0 %v3386_v16, %s12508_s29 }
 0xd01   :  { %v3376_v0 = vpop.permute.xlu1 %3375 }
 0xd02   :  { %3381 = vst.msk [vmem:[#allocation2 + $0x8] sm:$0xff] %vm3104_vm4, %v3376_v0 }
 0xd05   :  { %v2941_v2 = vpop.permute.xlu1 %2940 }
 0xd06   :  { %2959 = vst.msk [vmem:[#allocation2 + $0x48] sm:$0xff] %vm2952_vm2, %v2941_v2  ;;  %v13292_v2 = vsub.f32 %v4065_v54, %v13267_v40 }
 0xd07   :  { %v3378_v49 = vpop.permute.xlu0 %3377 }
 0xd08   :  { %3382 = vst.msk [vmem:[#allocation2 + $0x38] sm:$0xff] %vm3104_vm4, %v3378_v49  ;;  %v4161_v33 = vand.u32 4294901760, %v13292_v2 }
 0xd09   :  { %v3383_v21 = vld [vmem:[#allocation2 + $0x8] sm:$0xff]  ;;  %v3409_v15 = vpop.permute.xlu1 %3408 }
 0xd0a   :  { %3404 = vrot.lane.b32.xlu1 %v3383_v21, %s12508_s29  ;;  %v3435_v31 = vand.u32 4294901760, %v3409_v15 }
 0xd0b   :  { %v2943_v60 = vpop.permute.xlu0 %2942 }
 0xd0c   :  { %2960 = vst.msk [vmem:[#allocation2 + $0x50] sm:$0xff] %vm2952_vm2, %v2943_v60  ;;  %v13253_v18 = vsub.f32 %v3409_v15, %v3435_v31  ;;  %v3520_v60 = vsub.f32 %v13256_v20, %v3519_v46 }
 0xd0d   :  { %v3389_v29 = vld [vmem:[#allocation2 + $0x48] sm:$0xff] }
 0xd0e   :  { %v3554_v48 = vand.u32 4294901760, %v13253_v18 }
 0xd0f   :  { %v3387_v3 = vld [vmem:[#allocation2 + $0x38] sm:$0xff]  ;;  %v3407_v53 = vpop.permute.xlu0 %3406 }
 0xd10   :  { %4046 = vrot.lane.b32.xlu1 %v3387_v3, %s12508_s29  ;;  %v3432_v25 = vand.u32 4294901760, %v3407_v53  ;;  %v3555_v21 = vsub.f32 %v13253_v18, %v3554_v48 }
 0xd12   :  { %v13250_v52 = vsub.f32 %v3407_v53, %v3432_v25  ;;  %v3556_v23 = vand.u32 4294901760, %v3555_v21 }
 0xd13   :  { %v3390_v28 = vld [vmem:[#allocation2 + $0x50] sm:$0xff]  ;;  %v13233_v59 = vpop.permute.xlu0 %4048 }
 0xd14   :  { %4052 = vrot.lane.b32.xlu0 %v3390_v28, %s12508_s29  ;;  %4050 = vrot.lane.b32.xlu1 %v3389_v29, %s12508_s29  ;;  %v4074_v30 = vand.u32 4294901760, %v13233_v59  ;;  %v3547_v41 = vand.u32 4294901760, %v13250_v52  ;;  %v3511_v28 = vand.u32 4294901760, %v3510_v7 }
 0xd16   :  { %v13285_v57 = vsub.f32 %v13233_v59, %v4074_v30  ;;  %v3548_v49 = vsub.f32 %v13250_v52, %v3547_v41 }
 0xd17   :  { %v3411_v10 = vpop.permute.xlu0 %3410 }
 0xd18   :  { %v3438_v22 = vand.u32 4294901760, %v3411_v10  ;;  %v4189_v53 = vand.u32 4294901760, %v13285_v57  ;;  %v3549_v15 = vand.u32 4294901760, %v3548_v49  ;;  %v3531_v49 = vand.u32 4294901760, %v3530_v61 }
 0xd1a   :  { %v13246_v43 = vsub.f32 %v3411_v10, %v3438_v22  ;;  %v13294_v5 = vpack.c.bf16 %v3438_v22, %v3435_v31  ;;  %v4171_v31 = vand.u32 4294901760, %v13310_v14 }
 0xd1c   :  { %v3561_v38 = vand.u32 4294901760, %v13246_v43 }
 0xd1e   :  { %v3562_v0 = vsub.f32 %v13246_v43, %v3561_v38 }
 0xd20   :  { %v3563_v59 = vand.u32 4294901760, %v3562_v0 }
 0xd22   :  { %v11755_v50 = vpack.c.bf16 %v3563_v59, %v3556_v23 }
 0xd7c   :  { %v3405_v39 = vpop.permute.xlu1 %3404 }
 0xd7d   :  { %v3429_v47 = vand.u32 4294901760, %v3405_v39 }
 0xd7f   :  { %v13277_v56 = vpack.c.bf16 %v3432_v25, %v3429_v47  ;;  %v13279_v16 = vsub.f32 %v3405_v39, %v3429_v47  ;;  %v3521_v25 = vand.u32 4294901760, %v3520_v60  ;;  %v4162_v39 = vsub.f32 %v13292_v2, %v4161_v33 }
 0xd81   :  { %v3540_v4 = vand.u32 4294901760, %v13279_v16  ;;  %11744 = vmatprep.subr.bf16.mxu0 %v13277_v56  ;;  %v4163_v61 = vand.u32 4294901760, %v4162_v39 }
 0xd82   :  { %11746 = vmatpush3.bf16.msra.mxu0 %v13277_v56  ;;  %v4047_v58 = vpop.permute.xlu1 %4046 }
 0xd83   :  { %v4071_v3 = vand.u32 4294901760, %v4047_v58  ;;  %11748 = vmatprep.subr.bf16.mxu0 %v13294_v5  ;;  %v3541_v29 = vsub.f32 %v13279_v16, %v3540_v4 }
 0xd85   :  { %v13321_v9 = vpack.c.bf16 %v4074_v30, %v4071_v3  ;;  %v13323_v10 = vsub.f32 %v4047_v58, %v4071_v3  ;;  %v3542_v11 = vand.u32 4294901760, %v3541_v29  ;;  %v4190_v30 = vsub.f32 %v13285_v57, %v4189_v53 }
 0xd86   :  { %v4053_v19 = vpop.permute.xlu0 %4052  ;;  %11750 = vmatpush3.bf16.msra.mxu0 %v13294_v5  ;;  %v4051_v22 = vpop.permute.xlu1 %4050  ;;  %v4153_v3 = vand.u32 4294901760, %v4152_v26 }
 0xd87   :  { %v4182_v34 = vand.u32 4294901760, %v13323_v10  ;;  %v4080_v42 = vand.u32 4294901760, %v4053_v19  ;;  %v4077_v45 = vand.u32 4294901760, %v4051_v22  ;;  %11792 = vmatprep.subr.bf16.mxu1 %v13321_v9  ;;  %v11751_v54 = vpack.c.bf16 %v3549_v15, %v3542_v11 }
 0xd88   :  { %11794 = vmatpush3.bf16.msra.mxu1 %v13321_v9  ;;  %v4191_v59 = vand.u32 4294901760, %v4190_v30  ;;  %v11759_v11 = vpack.c.bf16 %v13250_v52, %v13279_v16  ;;  %v11775_v30 = vpack.c.bf16 %v3547_v41, %v3540_v4  ;;  %v11779_v52 = vpack.c.bf16 %v3561_v38, %v3554_v48  ;;  %v4689_v38 = vld [vmem:[#allocation7 + $0xe0] sm:$0xff]  ;;  %v4691_v4 = vld [vmem:[#allocation7 + $0xf0] sm:$0xff] }
 0xd89   :  { %v13339_v47 = vsub.f32 %v4053_v19, %v4080_v42  ;;  %v13341_v7 = vpack.c.bf16 %v4080_v42, %v4077_v45  ;;  %v13343_v0 = vsub.f32 %v4051_v22, %v4077_v45  ;;  %10888 = vmatmul.mubr.f32.vlgmr.msra.gmra.mrb[8].mxu0 %v3511_v28  ;;  %11752 = vmatprep.subr.bf16.mxu0 %v11751_v54  ;;  %v5332_v41 = vand.u32 4294901760, %v4689_v38 }
 0xd8a   :  { %11754 = vmatpush3.bf16.msra.mxu0 %v11751_v54  ;;  %10890 = vmatprep.mubr.f32.mxu0 %v3521_v25  ;;  %v4183_v58 = vsub.f32 %v13323_v10, %v4182_v34  ;;  %v4172_v28 = vsub.f32 %v13310_v14, %v4171_v31  ;;  %v11763_v42 = vpack.c.bf16 %v13246_v43, %v13253_v18  ;;  %v4687_v18 = vld [vmem:[#allocation7 + $0xd0] sm:$0xff] }
 0xd8b   :  { %v4203_v21 = vand.u32 4294901760, %v13339_v47  ;;  %v4196_v60 = vand.u32 4294901760, %v13343_v0  ;;  %11756 = vmatprep.subr.bf16.mxu0 %v11755_v50  ;;  %11796 = vmatprep.subr.bf16.mxu1 %v13341_v7  ;;  %v11807_v54 = vpack.c.bf16 %v13285_v57, %v13323_v10 }
 0xd8c   :  { %11798 = vmatpush3.bf16.msra.mxu1 %v13341_v7  ;;  %v4184_v29 = vand.u32 4294901760, %v4183_v58  ;;  %v4173_v23 = vand.u32 4294901760, %v4172_v28 }
 0xd8d   :  { %10891 = vmatmul.mubr.f32.gmra.mrb[10].mxu0 %v3531_v49  ;;  %v4197_v15 = vsub.f32 %v13343_v0, %v4196_v60  ;;  %v4204_v19 = vsub.f32 %v13339_v47, %v4203_v21 }
 0xd8e   :  { %11758 = vmatpush3.bf16.msra.mxu0 %v11755_v50  ;;  %v11799_v22 = vpack.c.bf16 %v4191_v59, %v4184_v29  ;;  %10901 = vmatprep.mubr.f32.mxu0 %v13206_v62  ;;  %v11811_v50 = vpack.c.bf16 %v13339_v47, %v13343_v0 }
 0xd8f   :  { %11760 = vmatprep.subr.bf16.mxu0 %v11759_v11  ;;  %10972 = vmatmul.mubr.f32.vlgmr.msra.gmra.mrb[8].mxu1 %v4153_v3  ;;  %v4198_v25 = vand.u32 4294901760, %v4197_v15  ;;  %v4205_v26 = vand.u32 4294901760, %v4204_v19 }
 0xd90   :  { %11800 = vmatprep.subr.bf16.mxu1 %v11799_v22  ;;  %10974 = vmatprep.mubr.f32.mxu1 %v4163_v61 }
 0xd91   :  { %11802 = vmatpush3.bf16.msra.mxu1 %v11799_v22  ;;  %10902 = vmatmul.mubr.f32.vlgmr.msra.gmra.mrb[8].mxu0 %v13236_v17  ;;  %v11803_v45 = vpack.c.bf16 %v4205_v26, %v4198_v25 }
 0xd92   :  { %11762 = vmatpush3.bf16.msra.mxu0 %v11759_v11  ;;  %10904 = vmatprep.mubr.f32.mxu0 %v13240_v32 }
 0xd93   :  { %11764 = vmatprep.subr.bf16.mxu0 %v11763_v42  ;;  %10975 = vmatmul.mubr.f32.gmra.mrb[10].mxu1 %v4173_v23 }
 0xd94   :  { %11804 = vmatprep.subr.bf16.mxu1 %v11803_v45  ;;  %10985 = vmatprep.mubr.f32.mxu1 %v13218_v6 }
 0xd95   :  { %11806 = vmatpush3.bf16.msra.mxu1 %v11803_v45  ;;  %10905 = vmatmul.mubr.f32.gmra.mrb[10].mxu0 %v13248_v44 }
 0xd96   :  { %11808 = vmatprep.subr.bf16.mxu1 %v11807_v54  ;;  %11766 = vmatpush3.bf16.msra.mxu0 %v11763_v42 }
 0xd97   :  { %11768 = vmatprep.subr.bf16.mxu0 %v13277_v56  ;;  %10915 = vmatprep.mubr.f32.mxu0 %v13210_v36  ;;  %v11823_v36 = vpack.c.bf16 %v4189_v53, %v4182_v34 }
 0xd98   :  { %10986 = vmatmul.mubr.f32.vlgmr.msra.gmra.mrb[8].mxu1 %v13258_v27 }
 0xd99   :  { %11810 = vmatpush3.bf16.msra.mxu1 %v11807_v54  ;;  %10916 = vmatmul.mubr.f32.vlgmr.msra.gmra.mrb[8].mxu0 %v13243_v35 }
 0xd9a   :  { %11812 = vmatprep.subr.bf16.mxu1 %v11811_v50  ;;  %11770 = vmatpush3.bf16.msra.mxu0 %v13277_v56 }
 0xd9b   :  { %10988 = vmatprep.mubr.f32.mxu1 %v13267_v40  ;;  %11772 = vmatprep.subr.bf16.mxu0 %v13294_v5 }
 0xd9c   :  { %10989 = vmatmul.mubr.f32.gmra.mrb[10].mxu1 %v13275_v8  ;;  %10918 = vmatprep.mubr.f32.mxu0 %v13256_v20 }
 0xd9d   :  { %11814 = vmatpush3.bf16.msra.mxu1 %v11811_v50  ;;  %10919 = vmatmul.mubr.f32.gmra.mrb[10].mxu0 %v13265_v24  ;;  %v4690_v24 = vld [vmem:[#allocation7 + $0xe8] sm:$0xff] }
 0xd9e   :  { %11816 = vmatprep.subr.bf16.mxu1 %v13321_v9  ;;  %11774 = vmatpush3.bf16.msra.mxu0 %v13294_v5  ;;  %v5335_v48 = vand.u32 4294901760, %v4690_v24 }
 0xd9f   :  { %10999 = vmatprep.mubr.f32.mxu1 %v13222_v13  ;;  %11776 = vmatprep.subr.bf16.mxu0 %v11775_v30  ;;  %v4686_v13 = vld [vmem:[#allocation7 + $0xc8] sm:$0xff] }
 0xda0   :  { %11000 = vmatmul.mubr.f32.vlgmr.msra.gmra.mrb[8].mxu1 %v13273_v51  ;;  %10929 = vmatprep.mubr.f32.mxu0 %v3499_v63  ;;  %v11827_v63 = vpack.c.bf16 %v4203_v21, %v4196_v60  ;;  %v13464_v16 = vpack.c.bf16 %v5335_v48, %v5332_v41 }
 0xda1   :  { %11818 = vmatpush3.bf16.msra.mxu1 %v13321_v9  ;;  %10930 = vmatmul.mubr.f32.vlgmr.msra.gmra.mrb[8].mxu0 %v3509_v1 }
 0xda2   :  { %11820 = vmatprep.subr.bf16.mxu1 %v13341_v7  ;;  %11778 = vmatpush3.bf16.msra.mxu0 %v11775_v30 }
 0xda3   :  { %11002 = vmatprep.mubr.f32.mxu1 %v13292_v2  ;;  %11780 = vmatprep.subr.bf16.mxu0 %v11779_v52  ;;  %v5449_v2 = vsub.f32 %v4690_v24, %v5335_v48 }
 0xda4   :  { %11003 = vmatmul.mubr.f32.gmra.mrb[10].mxu1 %v13310_v14  ;;  %10932 = vmatprep.mubr.f32.mxu0 %v3519_v46 }
 0xda5   :  { %11822 = vmatpush3.bf16.msra.mxu1 %v13341_v7  ;;  %10933 = vmatmul.mubr.f32.gmra.mrb[10].mxu0 %v3529_v37  ;;  %v5442_v37 = vsub.f32 %v4689_v38, %v5332_v41 }
 0xda6   :  { %11824 = vmatprep.subr.bf16.mxu1 %v11823_v36  ;;  %11782 = vmatpush3.bf16.msra.mxu0 %v11779_v52 }
 0xda7   :  { %11013 = vmatprep.mubr.f32.mxu1 %v4141_v55  ;;  %11784 = vmatprep.subr.bf16.mxu0 %v13277_v56  ;;  %v5443_v10 = vand.u32 4294901760, %v5442_v37  ;;  %v13489_v54 = vpack.c.bf16 %v5449_v2, %v5442_v37 }
 0xda8   :  { %11014 = vmatmul.mubr.f32.vlgmr.msra.gmra.mrb[8].mxu1 %v4151_v12  ;;  %10943 = vmatprep.mubr.f32.mxu0 %v13206_v62  ;;  %v4692_v12 = vld [vmem:[#allocation7 + $0xf8] sm:$0xff] }
 0xda9   :  { %11826 = vmatpush3.bf16.msra.mxu1 %v11823_v36  ;;  %10944 = vmatmul.mubr.f32.vlgmr.msra.gmra.mrb[8].mxu0 %v13236_v17  ;;  %v5444_v0 = vsub.f32 %v5442_v37, %v5443_v10 }
 0xdaa   :  { %11828 = vmatprep.subr.bf16.mxu1 %v11827_v63  ;;  %11786 = vmatpush3.bf16.msra.mxu0 %v13277_v56 }
 0xdab   :  { %11016 = vmatprep.mubr.f32.mxu1 %v4161_v33  ;;  %11788 = vmatprep.subr.bf16.mxu0 %v13294_v5  ;;  %v5338_v33 = vand.u32 4294901760, %v4691_v4  ;;  %v5445_v28 = vand.u32 4294901760, %v5444_v0 }
 0xdac   :  { %11017 = vmatmul.mubr.f32.gmra.mrb[10].mxu1 %v4171_v31  ;;  %10946 = vmatprep.mubr.f32.mxu0 %v13240_v32  ;;  %v5450_v31 = vand.u32 4294901760, %v5449_v2 }
 0xdad   :  { %11830 = vmatpush3.bf16.msra.mxu1 %v11827_v63  ;;  %10947 = vmatmul.mubr.f32.gmra.mrb[10].mxu0 %v13248_v44  ;;  %v5456_v58 = vsub.f32 %v4691_v4, %v5338_v33 }
 0xdae   :  { %11832 = vmatprep.subr.bf16.mxu1 %v13321_v9  ;;  %11790 = vmatpush3.bf16.msra.mxu0 %v13294_v5  ;;  %v5451_v49 = vsub.f32 %v5449_v2, %v5450_v31  ;;  %v13497_v36 = vpack.c.bf16 %v5450_v31, %v5443_v10 }
 0xdaf   :  { %11027 = vmatprep.mubr.f32.mxu1 %v13218_v6  ;;  %10957 = vmatprep.mubr.f32.mxu0 %v13206_v62  ;;  %v4685_v62 = vld [vmem:[#allocation7 + $0xc0] sm:$0xff]  ;;  %v5457_v59 = vand.u32 4294901760, %v5456_v58 }
 0xdb0   :  { %11028 = vmatmul.mubr.f32.vlgmr.msra.gmra.mrb[8].mxu1 %v13258_v27  ;;  %v4706_v55 = vand.u32 4294901760, %v4685_v62  ;;  %v5452_v29 = vand.u32 4294901760, %v5451_v49 }
 0xdb1   :  { %11834 = vmatpush3.bf16.msra.mxu1 %v13321_v9  ;;  %10958 = vmatmul.mubr.f32.vlgmr.msra.gmra.mrb[8].mxu0 %v13236_v17  ;;  %v4709_v17 = vand.u32 4294901760, %v4686_v13  ;;  %v5341_v9 = vand.u32 4294901760, %v4692_v12  ;;  %v5458_v19 = vsub.f32 %v5456_v58, %v5457_v59 }
 0xdb2   :  { %11836 = vmatprep.subr.bf16.mxu1 %v13341_v7  ;;  %11030 = vmatprep.mubr.f32.mxu1 %v13267_v40  ;;  %v13478_v15 = vpack.c.bf16 %v5452_v29, %v5445_v28 }
 0xdb3   :  { %10960 = vmatprep.mubr.f32.mxu0 %v13240_v32  ;;  %v13449_v35 = vpack.c.bf16 %v4709_v17, %v4706_v55  ;;  %v13451_v32 = vsub.f32 %v4685_v62, %v4706_v55  ;;  %v13453_v43 = vsub.f32 %v4686_v13, %v4709_v17  ;;  %v5463_v3 = vsub.f32 %v4692_v12, %v5341_v9 }
 0xdb4   :  { %11031 = vmatmul.mubr.f32.gmra.mrb[10].mxu1 %v13275_v8  ;;  %v5459_v25 = vand.u32 4294901760, %v5458_v19 }
 0xdb5   :  { %11838 = vmatpush3.bf16.msra.mxu1 %v13341_v7  ;;  %10961 = vmatmul.mubr.f32.gmra.mrb[10].mxu0 %v13248_v44  ;;  %v4688_v44 = vld [vmem:[#allocation7 + $0xd8] sm:$0xff]  ;;  %v4824_v1 = vand.u32 4294901760, %v13453_v43  ;;  %v13471_v7 = vpack.c.bf16 %v5341_v9, %v5338_v33  ;;  %v5464_v11 = vand.u32 4294901760, %v5463_v3  ;;  %v13483_v23 = vpack.c.bf16 %v13453_v43, %v13451_v32 }
 0xdb6   :  { %11041 = vmatprep.mubr.f32.mxu1 %v13218_v6  ;;  %11840 = vmatprep.subr.bf16.mxu0 %v13449_v35  ;;  %v4712_v6 = vand.u32 4294901760, %v4687_v18  ;;  %v4715_v20 = vand.u32 4294901760, %v4688_v44  ;;  %v13491_v50 = vpack.c.bf16 %v5463_v3, %v5456_v58 }
 0xdb7   :  { %11842 = vmatpush3.bf16.msra.mxu0 %v13449_v35  ;;  %v4825_v51 = vsub.f32 %v13453_v43, %v4824_v1  ;;  %11888 = vmatprep.subr.bf16.mxu1 %v13464_v16  ;;  %v5465_v22 = vsub.f32 %v5463_v3, %v5464_v11  ;;  %v13499_v63 = vpack.c.bf16 %v5464_v11, %v5457_v59 }
 0xdb8   :  { %11042 = vmatmul.mubr.f32.vlgmr.msra.gmra.mrb[8].mxu1 %v13258_v27  ;;  %v4817_v27 = vand.u32 4294901760, %v13451_v32  ;;  %v4837_v56 = vsub.f32 %v4688_v44, %v4715_v20 }
 0xdb9   :  { %11044 = vmatprep.mubr.f32.mxu1 %v13267_v40  ;;  %v13459_v40 = vpack.c.bf16 %v4715_v20, %v4712_v6  ;;  %v4826_v5 = vand.u32 4294901760, %v4825_v51  ;;  %11890 = vmatpush3.bf16.msra.mxu1 %v13464_v16  ;;  %v5466_v26 = vand.u32 4294901760, %v5465_v22 }
 0xdba   :  { %v4818_v46 = vsub.f32 %v13451_v32, %v4817_v27  ;;  %v4838_v53 = vand.u32 4294901760, %v4837_v56  ;;  %11892 = vmatprep.subr.bf16.mxu1 %v13471_v7  ;;  %v13493_v30 = vpack.c.bf16 %v4824_v1, %v4817_v27 }
 0xdbb   :  { %11844 = vmatprep.subr.bf16.mxu0 %v13459_v40  ;;  %v13485_v42 = vpack.c.bf16 %v5466_v26, %v5459_v25 }
 0xdbc   :  { %11045 = vmatmul.mubr.f32.gmra.mrb[10].mxu1 %v13275_v8  ;;  %v4830_v8 = vsub.f32 %v4687_v18, %v4712_v6  ;;  %v4819_v57 = vand.u32 4294901760, %v4818_v46  ;;  %11846 = vmatpush3.bf16.msra.mxu0 %v13459_v40  ;;  %v4839_v47 = vsub.f32 %v4837_v56, %v4838_v53 }
 0xdbd   :  { %11894 = vmatpush3.bf16.msra.mxu1 %v13471_v7 }
 0xdbe   :  { %v4831_v14 = vand.u32 4294901760, %v4830_v8  ;;  %v13469_v34 = vpack.c.bf16 %v4826_v5, %v4819_v57  ;;  %v4840_v60 = vand.u32 4294901760, %v4839_v47  ;;  %11896 = vmatprep.subr.bf16.mxu1 %v13478_v15  ;;  %v13487_v45 = vpack.c.bf16 %v4837_v56, %v4830_v8 }
 0xdc0   :  { %v4832_v39 = vsub.f32 %v4830_v8, %v4831_v14  ;;  %11848 = vmatprep.subr.bf16.mxu0 %v13469_v34  ;;  %v13495_v52 = vpack.c.bf16 %v4838_v53, %v4831_v14 }
 0xdc2   :  { %v4833_v21 = vand.u32 4294901760, %v4832_v39 }
 0xdc4   :  { %v13476_v61 = vpack.c.bf16 %v4840_v60, %v4833_v21 }
 0xe84   :  { %v10959_v62 = vpop.f32.mrb[8].mxu0 }
 0xe85   :  { %v4697_v13 = vsel %vm390_vm1, %v10959_v62, 0  ;;  %v4020_v55 = vpop.f32.mrb[9].mxu0 }
 0xe86   :  { %v13502_v17 = vand.u32 4294901760, %v4697_v13  ;;  %v4694_v32 = vsel %vm390_vm1, %v4020_v55, 0 }
 0xe87   :  { %v13505_v43 = vand.u32 4294901760, %v4694_v32 }
 0xe88   :  { %v13508_v18 = vsub.f32 %v4697_v13, %v13502_v17  ;;  %v10962_v44 = vpop.f32.mrb[10].mxu0 }
 0xe89   :  { %v13511_v6 = vsub.f32 %v4694_v32, %v13505_v43  ;;  %v4703_v20 = vsel %vm390_vm1, %v10962_v44, 0  ;;  %v4032_v27 = vpop.f32.mrb[11].mxu0 }
 0xe8a   :  { %v4786_v1 = vand.u32 4294901760, %v13508_v18  ;;  %v13515_v38 = vand.u32 4294901760, %v4703_v20  ;;  %v4700_v24 = vsel %vm390_vm1, %v4032_v27, 0 }
 0xe8b   :  { %v4776_v41 = vand.u32 4294901760, %v13511_v6  ;;  %v13519_v48 = vand.u32 4294901760, %v4700_v24  ;;  %v11043_v46 = vpop.f32.mrb[8].mxu1 }
 0xe8c   :  { %v4787_v51 = vsub.f32 %v13508_v18, %v4786_v1  ;;  %v13525_v8 = vsub.f32 %v4703_v20, %v13515_v38  ;;  %v5323_v56 = vsel %vm390_vm1, %v11043_v46, 0  ;;  %v4662_v57 = vpop.f32.mrb[9].mxu1  ;;  %v6012_v46 = vstv %s9931_s26  ;;  %s9943_s26 = sld [smem:[#allocation3 + $0x6]] }
 0xe8d   :  { %v13529_v37 = vsub.f32 %v4700_v24, %v13519_v48  ;;  %v13531_v2 = vand.u32 4294901760, %v5323_v56  ;;  %v5320_v5 = vsel %vm390_vm1, %v4662_v57, 0  ;;  %v4777_v4 = vsub.f32 %v13511_v6, %v4776_v41 }
 0xe8e   :  { %v4806_v12 = vand.u32 4294901760, %v13525_v8  ;;  %v13538_v14 = vand.u32 4294901760, %v5320_v5  ;;  %v4788_v31 = vand.u32 4294901760, %v4787_v51  ;;  %v13687_v24 = vstv %s9936_s24  ;;  %s9942_s24 = sld [smem:[#allocation3 + $0x5]] }
 0xe8f   :  { %v4796_v53 = vand.u32 4294901760, %v13529_v37  ;;  %v13542_v33 = vsub.f32 %v5323_v56, %v13531_v2  ;;  %v11046_v9 = vpop.f32.mrb[10].mxu1  ;;  %v4778_v10 = vand.u32 4294901760, %v4777_v4  ;;  %v13693_v56 = vstv %s9937_s4  ;;  %s9938_s4 = sld [smem:[#allocation3 + $0x1]] }
 0xe90   :  { %v13545_v39 = vsub.f32 %v5320_v5, %v13538_v14  ;;  %v5329_v47 = vsel %vm390_vm1, %v11046_v9, 0  ;;  %v4674_v0 = vpop.f32.mrb[11].mxu1  ;;  %v4807_v49 = vsub.f32 %v13525_v8, %v4806_v12  ;;  %v6024_v9 = vstv %s9933_s27  ;;  %s9939_s27 = sld [smem:[#allocation3 + $0x2]] }
 0xe91   :  { %v5412_v58 = vand.u32 4294901760, %v13542_v33  ;;  %v13552_v21 = vand.u32 4294901760, %v5329_v47  ;;  %v5326_v60 = vsel %vm390_vm1, %v4674_v0, 0  ;;  %11055 = vmatprep.mubr.f32.mxu0 %v4778_v10  ;;  %v4797_v3 = vsub.f32 %v13529_v37, %v4796_v53 }
 0xe92   :  { %v5402_v28 = vand.u32 4294901760, %v13545_v39  ;;  %v13559_v29 = vand.u32 4294901760, %v5326_v60  ;;  %11056 = vmatmul.mubr.f32.vlgmr.msra.gmra.mrb[12].mxu0 %v4788_v31  ;;  %v4808_v25 = vand.u32 4294901760, %v4807_v49  ;;  %v6034_v49 = vstv %s9934_s1  ;;  %s9941_s1 = sld [smem:[#allocation3 + $0x4]] }
 0xe93   :  { %v5413_v59 = vsub.f32 %v13542_v33, %v5412_v58  ;;  %v13565_v11 = vsub.f32 %v5329_v47, %v13552_v21  ;;  %11850 = vmatpush3.bf16.msra.mxu0 %v13469_v34  ;;  %v4798_v19 = vand.u32 4294901760, %v4797_v3 }
 0xe94   :  { %v13569_v22 = vsub.f32 %v5326_v60, %v13559_v29  ;;  %11852 = vmatprep.subr.bf16.mxu0 %v13476_v61  ;;  %v5403_v26 = vsub.f32 %v13545_v39, %v5402_v28 }
 0xe95   :  { %v5432_v62 = vand.u32 4294901760, %v13565_v11  ;;  %11058 = vmatprep.mubr.f32.mxu0 %v4798_v19  ;;  %v5414_v32 = vand.u32 4294901760, %v5413_v59 }
 0xe96   :  { %v5422_v13 = vand.u32 4294901760, %v13569_v22  ;;  %11059 = vmatmul.mubr.f32.gmra.mrb[14].mxu0 %v4808_v25  ;;  %v5404_v55 = vand.u32 4294901760, %v5403_v26 }
 0xe97   :  { %11854 = vmatpush3.bf16.msra.mxu0 %v13476_v61  ;;  %11069 = vmatprep.mubr.f32.mxu0 %v13505_v43  ;;  %v5433_v34 = vsub.f32 %v13565_v11, %v5432_v62 }
 0xe98   :  { %11139 = vmatprep.mubr.f32.mxu1 %v5404_v55  ;;  %11856 = vmatprep.subr.bf16.mxu0 %v13483_v23  ;;  %v5423_v44 = vsub.f32 %v13569_v22, %v5422_v13 }
 0xe99   :  { %11140 = vmatmul.mubr.f32.vlgmr.msra.gmra.mrb[12].mxu1 %v5414_v32  ;;  %v5434_v61 = vand.u32 4294901760, %v5433_v34 }
 0xe9a   :  { %11898 = vmatpush3.bf16.msra.mxu1 %v13478_v15  ;;  %11070 = vmatmul.mubr.f32.vlgmr.msra.gmra.mrb[12].mxu0 %v13502_v17  ;;  %v5424_v20 = vand.u32 4294901760, %v5423_v44 }
 0xe9b   :  { %11072 = vmatprep.mubr.f32.mxu0 %v13519_v48  ;;  %11858 = vmatpush3.bf16.msra.mxu0 %v13483_v23 }
 0xe9c   :  { %11142 = vmatprep.mubr.f32.mxu1 %v5424_v20  ;;  %11900 = vmatprep.subr.bf16.mxu1 %v13485_v42  ;;  %v6002_v20 = vstv %s9930_s28  ;;  %s9954_s28 = sld [smem:[#allocation3 + $0x11]] }
 0xe9d   :  { %11143 = vmatmul.mubr.f32.gmra.mrb[14].mxu1 %v5434_v61  ;;  %11860 = vmatprep.subr.bf16.mxu0 %v13487_v45 }
 0xe9e   :  { %11902 = vmatpush3.bf16.msra.mxu1 %v13485_v42  ;;  %11153 = vmatprep.mubr.f32.mxu1 %v13538_v14 }
 0xe9f   :  { %11073 = vmatmul.mubr.f32.gmra.mrb[14].mxu0 %v13515_v38  ;;  %11904 = vmatprep.subr.bf16.mxu1 %v13489_v54 }
 0xea0   :  { %11862 = vmatpush3.bf16.msra.mxu0 %v13487_v45  ;;  %11083 = vmatprep.mubr.f32.mxu0 %v13511_v6 }
 0xea1   :  { %11154 = vmatmul.mubr.f32.vlgmr.msra.gmra.mrb[12].mxu1 %v13531_v2  ;;  %11864 = vmatprep.subr.bf16.mxu0 %v13449_v35 }
 0xea2   :  { %11156 = vmatprep.mubr.f32.mxu1 %v13559_v29  ;;  %11906 = vmatpush3.bf16.msra.mxu1 %v13489_v54 }
 0xea3   :  { %11084 = vmatmul.mubr.f32.vlgmr.msra.gmra.mrb[12].mxu0 %v13508_v18  ;;  %11908 = vmatprep.subr.bf16.mxu1 %v13491_v50 }
 0xea4   :  { %11086 = vmatprep.mubr.f32.mxu0 %v13529_v37  ;;  %11866 = vmatpush3.bf16.msra.mxu0 %v13449_v35 }
 0xea5   :  { %11157 = vmatmul.mubr.f32.gmra.mrb[14].mxu1 %v13552_v21  ;;  %11868 = vmatprep.subr.bf16.mxu0 %v13459_v40 }
 0xea6   :  { %11910 = vmatpush3.bf16.msra.mxu1 %v13491_v50  ;;  %11167 = vmatprep.mubr.f32.mxu1 %v13545_v39 }
 0xea7   :  { %11087 = vmatmul.mubr.f32.gmra.mrb[14].mxu0 %v13525_v8  ;;  %11912 = vmatprep.subr.bf16.mxu1 %v13464_v16 }
 0xea8   :  { %11870 = vmatpush3.bf16.msra.mxu0 %v13459_v40  ;;  %11097 = vmatprep.mubr.f32.mxu0 %v4776_v41 }
 0xea9   :  { %11168 = vmatmul.mubr.f32.vlgmr.msra.gmra.mrb[12].mxu1 %v13542_v33  ;;  %11872 = vmatprep.subr.bf16.mxu0 %v13493_v30 }
 0xeaa   :  { %11170 = vmatprep.mubr.f32.mxu1 %v13569_v22  ;;  %11914 = vmatpush3.bf16.msra.mxu1 %v13464_v16 }
 0xeab   :  { %11098 = vmatmul.mubr.f32.vlgmr.msra.gmra.mrb[12].mxu0 %v4786_v1  ;;  %11916 = vmatprep.subr.bf16.mxu1 %v13471_v7 }
 0xeac   :  { %11100 = vmatprep.mubr.f32.mxu0 %v4796_v53  ;;  %11874 = vmatpush3.bf16.msra.mxu0 %v13493_v30 }
 0xead   :  { %11171 = vmatmul.mubr.f32.gmra.mrb[14].mxu1 %v13565_v11  ;;  %11876 = vmatprep.subr.bf16.mxu0 %v13495_v52 }
 0xeae   :  { %11918 = vmatpush3.bf16.msra.mxu1 %v13471_v7  ;;  %11181 = vmatprep.mubr.f32.mxu1 %v5402_v28 }
 0xeaf   :  { %11101 = vmatmul.mubr.f32.gmra.mrb[14].mxu0 %v4806_v12  ;;  %11920 = vmatprep.subr.bf16.mxu1 %v13497_v36 }
 0xeb0   :  { %11878 = vmatpush3.bf16.msra.mxu0 %v13495_v52  ;;  %11111 = vmatprep.mubr.f32.mxu0 %v13505_v43 }
 0xeb1   :  { %11182 = vmatmul.mubr.f32.vlgmr.msra.gmra.mrb[12].mxu1 %v5412_v58  ;;  %11880 = vmatprep.subr.bf16.mxu0 %v13449_v35 }
 0xeb2   :  { %11184 = vmatprep.mubr.f32.mxu1 %v5422_v13  ;;  %11922 = vmatpush3.bf16.msra.mxu1 %v13497_v36  ;;  %v6040_v36 = vstv %s9935_s23  ;;  %s9946_s23 = sld [smem:[#allocation3 + $0x9]] }
 0xeb3   :  { %11112 = vmatmul.mubr.f32.vlgmr.msra.gmra.mrb[12].mxu0 %v13502_v17  ;;  %11924 = vmatprep.subr.bf16.mxu1 %v13499_v63 }
 0xeb4   :  { %11114 = vmatprep.mubr.f32.mxu0 %v13519_v48  ;;  %11882 = vmatpush3.bf16.msra.mxu0 %v13449_v35 }
 0xeb5   :  { %11185 = vmatmul.mubr.f32.gmra.mrb[14].mxu1 %v5432_v62  ;;  %11884 = vmatprep.subr.bf16.mxu0 %v13459_v40  ;;  %v5996_v62 = vstv %s9929_s5  ;;  %s6259_s5 = sld [smem:[#allocation3]] }
 0xeb6   :  { %11926 = vmatpush3.bf16.msra.mxu1 %v13499_v63  ;;  %11195 = vmatprep.mubr.f32.mxu1 %v13538_v14 }
 0xeb7   :  { %11115 = vmatmul.mubr.f32.gmra.mrb[14].mxu0 %v13515_v38  ;;  %11928 = vmatprep.subr.bf16.mxu1 %v13464_v16 }
 0xeb8   :  { %11886 = vmatpush3.bf16.msra.mxu0 %v13459_v40  ;;  %11125 = vmatprep.mubr.f32.mxu0 %v13505_v43 }
 0xeb9   :  { %11196 = vmatmul.mubr.f32.vlgmr.msra.gmra.mrb[12].mxu1 %v13531_v2 }
 0xeba   :  { %11198 = vmatprep.mubr.f32.mxu1 %v13559_v29  ;;  %11930 = vmatpush3.bf16.msra.mxu1 %v13464_v16 }
 0xebb   :  { %11126 = vmatmul.mubr.f32.vlgmr.msra.gmra.mrb[12].mxu0 %v13502_v17  ;;  %11932 = vmatprep.subr.bf16.mxu1 %v13471_v7 }
 0xebc   :  { %11128 = vmatprep.mubr.f32.mxu0 %v13519_v48 }
 0xebd   :  { %11199 = vmatmul.mubr.f32.gmra.mrb[14].mxu1 %v13552_v21 }
 0xebe   :  { %11934 = vmatpush3.bf16.msra.mxu1 %v13471_v7  ;;  %11209 = vmatprep.mubr.f32.mxu1 %v13538_v14 }
 0xebf   :  { %11129 = vmatmul.mubr.f32.gmra.mrb[14].mxu0 %v13515_v38 }
 0xec1   :  { %11210 = vmatmul.mubr.f32.vlgmr.msra.gmra.mrb[12].mxu1 %v13531_v2 }
 0xec2   :  { %11212 = vmatprep.mubr.f32.mxu1 %v13559_v29 }
 0xec5   :  { %11213 = vmatmul.mubr.f32.gmra.mrb[14].mxu1 %v13552_v21 }
 0xf8e   :  { %v11127_v35 = vpop.f32.mrb[12].mxu0 }
 0xf8f   :  { %5955 = vrot.lane.b32.xlu0 %v11127_v35, %s12506_s25  ;;  %v5297_v40 = vpop.f32.mrb[13].mxu0 }
 0xf90   :  { %5953 = vrot.lane.b32.xlu1 %v5297_v40, %s12506_s25 }
 0xf92   :  { %v13665_v16 = vpop.f32.mrb[14].mxu0 }
 0xf93   :  { %v5309_v15 = vpop.f32.mrb[15].mxu0 }
 0xf94   :  { %5957 = vrot.lane.b32.xlu1 %v5309_v15, %s12506_s25  ;;  %v11211_v7 = vpop.f32.mrb[12].mxu1 }
 0xf95   :  { %v5923_v23 = vpop.f32.mrb[13].mxu1 }
 0xf96   :  { %5961 = vrot.lane.b32.xlu0 %v5923_v23, %s12506_s25 }
 0xf98   :  { %5963 = vrot.lane.b32.xlu1 %v11211_v7, %s12506_s25  ;;  %v13670_v42 = vpop.f32.mrb[14].mxu1 }
 0xf99   :  { %v5935_v45 = vpop.f32.mrb[15].mxu1 }
 0xf9a   :  { %5965 = vrot.lane.b32.xlu0 %v5935_v45, %s12506_s25 }
0x1001   :  { %v5956_v54 = vpop.permute.xlu0 %5955 }
0x1002   :  { %5978 = vst.msk [vmem:[#allocation2 + $0x10] sm:$0xff] %vm2952_vm2, %v5956_v54  ;;  %v5954_v50 = vpop.permute.xlu1 %5953 }
0x1003   :  { %5977 = vst.msk [vmem:[#allocation2 + $0x8] sm:$0xff] %vm2952_vm2, %v5954_v50 }
0x1006   :  { %v5958_v30 = vpop.permute.xlu1 %5957 }
0x1007   :  { %5979 = vst.msk [vmem:[#allocation2 + $0x18] sm:$0xff] %vm2952_vm2, %v5958_v30 }
0x1008   :  { %v5962_v52 = vpop.permute.xlu0 %5961 }
0x1009   :  { %5981 = vst.msk [vmem:[#allocation2 + $0x38] sm:$0xff] %vm2952_vm2, %v5962_v52  ;;  %v13696_v37 = vld [vmem:[#allocation2 + $0x10] sm:$0xff] }
0x100a   :  { %v5964_v63 = vpop.permute.xlu1 %5963  ;;  %v13677_v17 = vld [vmem:[#allocation2 + $0x9] sm:$0xff]  ;;  %v6014_v14 = vmul.f32 %v6012_v46, %v13696_v37  ;;  %v6026_v39 = vmul.f32 %v6024_v9, %v13696_v37 }
0x100b   :  { %5982 = vst.msk [vmem:[#allocation2 + $0x40] sm:$0xff] %vm2952_vm2, %v5964_v63  ;;  %v6041_v43 = vmul.f32 %v6040_v36, %v13677_v17  ;;  %v13689_v48 = vld [vmem:[#allocation2 + $0x8] sm:$0xff]  ;;  %v6035_v58 = vmul.f32 %v6034_v49, %v13677_v17 }
0x100c   :  { %v5966_v18 = vpop.permute.xlu0 %5965  ;;  %v6013_v5 = vmul.f32 %v6012_v46, %v13689_v48  ;;  %v6025_v31 = vmul.f32 %v6024_v9, %v13689_v48  ;;  %v13729_v26 = vld [vmem:[#allocation2 + $0x7] sm:$0xff]  ;;  %v13732_v55 = vld [vmem:[#allocation2 + $0xf] sm:$0xff] }
0x100d   :  { %5983 = vst.msk [vmem:[#allocation2 + $0x48] sm:$0xff] %vm2952_vm2, %v5966_v18  ;;  %6121 = vrot.lane.b32.xlu1 %v6041_v43, %s12508_s29  ;;  %v5997_v32 = vmul.f32 %v5996_v62, %v13729_v26  ;;  %v5998_v44 = vmul.f32 %v5996_v62, %v13732_v55  ;;  %v6003_v7 = vmul.f32 %v6002_v20, %v13729_v26 }
0x100e   :  { %v13683_v6 = vld [vmem:[#allocation2 + $0x11] sm:$0xff]  ;;  %v6004_v54 = vmul.f32 %v6002_v20, %v13732_v55  ;;  %v6047_v18 = vmul.f32 %v13687_v24, %v13677_v17 }
0x100f   :  { %v6042_v27 = vmul.f32 %v6040_v36, %v13683_v6  ;;  %v6036_v3 = vmul.f32 %v6034_v49, %v13683_v6 }
0x1010   :  { %v13706_v12 = vld [vmem:[#allocation2 + $0x38] sm:$0xff] }
0x1011   :  { %6123 = vrot.lane.b32.xlu0 %v6042_v27, %s12508_s29  ;;  %v6015_v33 = vmul.f32 %v6012_v46, %v13706_v12  ;;  %v6027_v47 = vmul.f32 %v6024_v9, %v13706_v12  ;;  %v13736_v34 = vld [vmem:[#allocation2 + $0x37] sm:$0xff] }
0x1012   :  { %v6031_v1 = vld [vmem:[#allocation2 + $0x39] sm:$0xff]  ;;  %v5999_v40 = vmul.f32 %v5996_v62, %v13736_v34  ;;  %v6005_v52 = vmul.f32 %v6002_v20, %v13736_v34 }
0x1013   :  { %v6043_v38 = vmul.f32 %v6040_v36, %v6031_v1  ;;  %v6049_v51 = vmul.f32 %v13687_v24, %v6031_v1  ;;  %v13710_v53 = vld [vmem:[#allocation2 + $0x40] sm:$0xff]  ;;  %v6037_v59 = vmul.f32 %v6034_v49, %v6031_v1  ;;  %v6048_v1 = vmul.f32 %v13687_v24, %v13683_v6 }
0x1014   :  { %v6032_v41 = vld [vmem:[#allocation2 + $0x41] sm:$0xff]  ;;  %v6016_v10 = vmul.f32 %v6012_v46, %v13710_v53  ;;  %v6028_v0 = vmul.f32 %v6024_v9, %v13710_v53 }
0x1015   :  { %6125 = vrot.lane.b32.xlu1 %v6043_v38, %s12508_s29  ;;  %v6044_v8 = vmul.f32 %v6040_v36, %v6032_v41  ;;  %v6050_v57 = vmul.f32 %v13687_v24, %v6032_v41  ;;  %v13699_v2 = vadd.f32 %v13693_v56, %v6049_v51  ;;  %v6038_v22 = vmul.f32 %v6034_v49, %v6032_v41  ;;  %v13740_v35 = vld [vmem:[#allocation2 + $0x3f] sm:$0xff] }
0x1016   :  { %v6000_v23 = vmul.f32 %v5996_v62, %v13740_v35  ;;  %v6006_v43 = vmul.f32 %v6002_v20, %v13740_v35  ;;  %v6053_v38 = vadd.f32 %v13693_v56, %v6047_v18  ;;  %v6054_v41 = vadd.f32 %v13693_v56, %v6048_v1  ;;  %v3092_v20 = vld [vmem:[%s14831_s3] sm:$0xff] }
0x1017   :  { %6127 = vrot.lane.b32.xlu0 %v6044_v8, %s12508_s29  ;;  %v13704_v4 = vadd.f32 %v13693_v56, %v6050_v57  ;;  %v6018_v51 = vstv %s9932_s9  ;;  %s9950_s9 = sld [smem:[#allocation3 + $0xd]] }
0x1018   :  { %v6019_v57 = vmul.f32 %v6018_v51, %v13689_v48  ;;  %v6020_v24 = vmul.f32 %v6018_v51, %v13696_v37  ;;  %v6021_v56 = vmul.f32 %v6018_v51, %v13706_v12 }
0x1019   :  { %6081 = vrot.lane.b32.xlu1 %v6013_v5, %s12509_s30 }
0x101b   :  { %6083 = vrot.lane.b32.xlu0 %v6014_v14, %s12509_s30 }
0x101d   :  { %6085 = vrot.lane.b32.xlu1 %v6015_v33, %s12509_s30 }
0x101f   :  { %6087 = vrot.lane.b32.xlu0 %v6016_v10, %s12509_s30 }
0x1021   :  { %6101 = vrot.lane.b32.xlu1 %v6025_v31, %s12508_s29 }
0x1023   :  { %6103 = vrot.lane.b32.xlu0 %v6026_v39, %s12508_s29 }
0x1025   :  { %6105 = vrot.lane.b32.xlu1 %v6027_v47, %s12508_s29  ;;  %v6022_v47 = vmul.f32 %v6018_v51, %v13710_v53 }
0x1027   :  { %6107 = vrot.lane.b32.xlu0 %v6028_v0, %s12508_s29 }
0x107f   :  { %v6122_v21 = vpop.permute.xlu1 %6121 }
0x1080   :  { %v6133_v60 = vadd.f32 %v6122_v21, %v6035_v58 }
0x1082   :  { %6161 = vrot.lane.b32.xlu1 %v6133_v60, %s12506_s25 }
0x1083   :  { %v6124_v28 = vpop.permute.xlu0 %6123 }
0x1084   :  { %v6134_v29 = vadd.f32 %v6124_v28, %v6036_v3 }
0x1086   :  { %6163 = vrot.lane.b32.xlu0 %v6134_v29, %s12506_s25 }
0x1087   :  { %v6126_v11 = vpop.permute.xlu1 %6125 }
0x1088   :  { %v6135_v19 = vadd.f32 %v6126_v11, %v6037_v59  ;;  %v5990_v59 = vstv %s9928_s10  ;;  %s9955_s10 = sld [smem:[#allocation3 + $0x12]] }
0x1089   :  { %v6128_v25 = vpop.permute.xlu0 %6127  ;;  %v5992_v62 = vmul.f32 %v5990_v59, %v13732_v55  ;;  %v3093_v55 = vld [vmem:[%s14831_s3 + $0x8] sm:$0xff] }
0x108a   :  { %v6136_v13 = vadd.f32 %v6128_v25, %v6038_v22  ;;  %6165 = vrot.lane.b32.xlu1 %v6135_v19, %s12506_s25  ;;  %v5991_v19 = vmul.f32 %v5990_v59, %v13729_v26 }
0x108b   :  { %v6082_v61 = vpop.permute.xlu1 %6081 }
0x108c   :  { %6167 = vrot.lane.b32.xlu0 %v6136_v13, %s12506_s25  ;;  %v6093_v45 = vadd.f32 %v6082_v61, %v6003_v7  ;;  %v5993_v7 = vmul.f32 %v5990_v59, %v13736_v34 }
0x108d   :  { %v6084_v15 = vpop.permute.xlu0 %6083 }
0x108e   :  { %6061 = vrot.lane.b32.xlu1 %v5997_v32, %s12508_s29  ;;  %v6094_v30 = vadd.f32 %v6084_v15, %v6004_v54  ;;  %v5994_v54 = vmul.f32 %v5990_v59, %v13740_v35  ;;  %v3094_v35 = vld [vmem:[%s14831_s3 + $0x10] sm:$0xff] }
0x108f   :  { %v6086_v50 = vpop.permute.xlu1 %6085 }
0x1090   :  { %6063 = vrot.lane.b32.xlu0 %v5998_v44, %s12508_s29  ;;  %v6095_v63 = vadd.f32 %v6086_v50, %v6005_v52 }
0x1091   :  { %v6088_v36 = vpop.permute.xlu0 %6087 }
0x1092   :  { %6065 = vrot.lane.b32.xlu1 %v5999_v40, %s12508_s29  ;;  %v6096_v27 = vadd.f32 %v6088_v36, %v6006_v43 }
0x1093   :  { %v6102_v46 = vpop.permute.xlu1 %6101 }
0x1094   :  { %6067 = vrot.lane.b32.xlu0 %v6000_v23, %s12508_s29  ;;  %v6113_v5 = vadd.f32 %v6102_v46, %v6019_v57 }
0x1095   :  { %v6104_v17 = vpop.permute.xlu0 %6103 }
0x1096   :  { %6141 = vrot.lane.b32.xlu1 %v6093_v45, %s12510_s12  ;;  %v6114_v9 = vadd.f32 %v6104_v17, %v6020_v24 }
0x1097   :  { %v6106_v8 = vpop.permute.xlu1 %6105 }
0x1098   :  { %6143 = vrot.lane.b32.xlu0 %v6094_v30, %s12510_s12  ;;  %v6115_v39 = vadd.f32 %v6106_v8, %v6021_v56 }
0x1099   :  { %v6108_v14 = vpop.permute.xlu0 %6107 }
0x109a   :  { %6145 = vrot.lane.b32.xlu1 %v6095_v63, %s12510_s12  ;;  %v6116_v48 = vadd.f32 %v6108_v14, %v6022_v47 }
0x109c   :  { %6147 = vrot.lane.b32.xlu0 %v6096_v27, %s12510_s12 }
0x109e   :  { %6201 = vrot.lane.b32.xlu1 %v6053_v38, %s12510_s12 }
0x10a0   :  { %6203 = vrot.lane.b32.xlu0 %v6054_v41, %s12510_s12  ;;  %v3095_v41 = vld [vmem:[%s14831_s3 + $0x18] sm:$0xff]  ;;  %s9944_s3 = sld [smem:[#allocation3 + $0x7]] }
0x10f4   :  { %v6162_v6 = vpop.permute.xlu1 %6161 }
0x10f5   :  { %v6173_v33 = vadd.f32 %v6162_v6, %v6113_v5  ;;  %v6310_v6 = vstv %s9944_s3  ;;  %s9960_s3 = sld [smem:[#allocation3 + $0x17]] }
0x10f7   :  { %6181 = vrot.lane.b32.xlu1 %v6173_v33, %s12508_s29 }
0x10f8   :  { %v6164_v10 = vpop.permute.xlu0 %6163 }
0x10f9   :  { %v6174_v31 = vadd.f32 %v6164_v10, %v6114_v9 }
0x10fb   :  { %6183 = vrot.lane.b32.xlu0 %v6174_v31, %s12508_s29 }
0x10fc   :  { %v6166_v0 = vpop.permute.xlu1 %6165 }
0x10fd   :  { %v6175_v49 = vadd.f32 %v6166_v0, %v6115_v39 }
0x10fe   :  { %v6168_v58 = vpop.permute.xlu0 %6167 }
0x10ff   :  { %v6176_v21 = vadd.f32 %v6168_v58, %v6116_v48  ;;  %6185 = vrot.lane.b32.xlu1 %v6175_v49, %s12508_s29  ;;  %v6282_v49 = vstv %s9940_s21  ;;  %s9965_s21 = sld [smem:[#allocation3 + $0x1c]] }
0x1100   :  { %v6062_v37 = vpop.permute.xlu1 %6061 }
0x1101   :  { %6187 = vrot.lane.b32.xlu0 %v6176_v21, %s12508_s29  ;;  %v6073_v25 = vadd.f32 %v6062_v37, %v5991_v19  ;;  %v13831_v21 = vstv %s9945_s22  ;;  %s9966_s22 = sld [smem:[#allocation3 + $0x1d]] }
0x1102   :  { %v6064_v12 = vpop.permute.xlu0 %6063 }
0x1103   :  { %6205 = vrot.lane.b32.xlu1 %v13699_v2, %s12510_s12 }
0x1104   :  { %v6066_v53 = vpop.permute.xlu1 %6065 }
0x1105   :  { %6207 = vrot.lane.b32.xlu0 %v13704_v4, %s12510_s12  ;;  %v6074_v4 = vadd.f32 %v6064_v12, %v5992_v62  ;;  %v6075_v45 = vadd.f32 %v6066_v53, %v5993_v7  ;;  %v13837_v53 = vstv %s9946_s23  ;;  %s9962_s23 = sld [smem:[#allocation3 + $0x19]] }
0x1106   :  { %v6068_v60 = vpop.permute.xlu0 %6067 }
0x1107   :  { %v6076_v52 = vadd.f32 %v6068_v60, %v5994_v54 }
0x1108   :  { %v6142_v3 = vpop.permute.xlu1 %6141 }
0x1109   :  { %v6153_v2 = vadd.f32 %v6142_v3, %v6073_v25  ;;  %v6294_v25 = vstv %s9942_s24  ;;  %s9958_s24 = sld [smem:[#allocation3 + $0x15]] }
0x110a   :  { %v6144_v28 = vpop.permute.xlu0 %6143 }
0x110b   :  { %v6154_v61 = vadd.f32 %v6144_v28, %v6074_v4  ;;  %v6304_v4 = vstv %s9943_s26  ;;  %s9961_s26 = sld [smem:[#allocation3 + $0x18]] }
0x110c   :  { %v6146_v29 = vpop.permute.xlu1 %6145 }
0x110d   :  { %v6155_v34 = vadd.f32 %v6146_v29, %v6075_v45 }
0x110e   :  { %v6148_v11 = vpop.permute.xlu0 %6147 }
0x110f   :  { %v6156_v43 = vadd.f32 %v6148_v11, %v6076_v52 }
0x1110   :  { %v6202_v22 = vpop.permute.xlu1 %6201 }
0x1112   :  { %v6204_v13 = vpop.permute.xlu0 %6203 }
0x1169   :  { %v6182_v32 = vpop.permute.xlu1 %6181 }
0x116a   :  { %v6193_v44 = vadd.f32 %v6182_v32, %v6153_v2 }
0x116c   :  { %v6213_v40 = vadd.f32 %v6202_v22, %v6193_v44 }
0x116d   :  { %v6184_v15 = vpop.permute.xlu0 %6183 }
0x116e   :  { %v13781_v26 = vadd.f32 %v6213_v40, %v3092_v20  ;;  %v6194_v23 = vadd.f32 %v6184_v15, %v6154_v61 }
0x1170   :  { %v6214_v50 = vadd.f32 %v6204_v13, %v6194_v23  ;;  %6238 = vrot.lane.b32.xlu1 %v13781_v26, %s12506_s25  ;;  %6222 = vst.msk [vmem:[#allocation9] sm:$0xff] %vm6221_vm5, %v13781_v26 }
0x1171   :  { %v6186_v30 = vpop.permute.xlu1 %6185 }
0x1172   :  { %v13791_v36 = vadd.f32 %v6214_v50, %v3093_v55  ;;  %v6195_v18 = vadd.f32 %v6186_v30, %v6155_v34 }
0x1173   :  { %v6188_v63 = vpop.permute.xlu0 %6187 }
0x1174   :  { %6240 = vrot.lane.b32.xlu0 %v13791_v36, %s12506_s25  ;;  %6223 = vst.msk [vmem:[#allocation9 + $0x8] sm:$0xff] %vm6221_vm5, %v13791_v36  ;;  %v6196_v1 = vadd.f32 %v6188_v63, %v6156_v43  ;;  %v6266_v63 = vstv %s9938_s4  ;;  %s9959_s4 = sld [smem:[#allocation3 + $0x16]] }
0x1175   :  { %v6206_v27 = vpop.permute.xlu1 %6205 }
0x1176   :  { %v6215_v38 = vadd.f32 %v6206_v27, %v6195_v18 }
0x1177   :  { %v6208_v46 = vpop.permute.xlu0 %6207 }
0x1178   :  { %v13803_v51 = vadd.f32 %v6215_v38, %v3094_v35  ;;  %v6216_v17 = vadd.f32 %v6208_v46, %v6196_v1  ;;  %v6272_v1 = vstv %s9939_s27 }
0x117a   :  { %v13805_v8 = vadd.f32 %v6216_v17, %v3095_v41  ;;  %6242 = vrot.lane.b32.xlu1 %v13803_v51, %s12506_s25  ;;  %6224 = vst.msk [vmem:[#allocation9 + $0x10] sm:$0xff] %vm6221_vm5, %v13803_v51 }
0x117c   :  { %6244 = vrot.lane.b32.xlu0 %v13805_v8, %s12506_s25  ;;  %6225 = vst.msk [vmem:[#allocation9 + $0x18] sm:$0xff] %vm6221_vm5, %v13805_v8 }
0x11e2   :  { %v6239_v57 = vpop.permute.xlu1 %6238 }
0x11e3   :  { %6251 = vst.msk [vmem:[#allocation2 + $0x8] sm:$0xff] %vm6250_vm6, %v6239_v57 }
0x11e6   :  { %v6241_v5 = vpop.permute.xlu0 %6240 }
0x11e7   :  { %6252 = vst.msk [vmem:[#allocation2 + $0x10] sm:$0xff] %vm6250_vm6, %v6241_v5 }
0x11ea   :  { %v13829_v58 = vld [vmem:[#allocation2 + $0x8] sm:$0xff] }
0x11eb   :  { %v6283_v3 = vmul.f32 %v6282_v49, %v13829_v58  ;;  %v6295_v2 = vmul.f32 %v6294_v25, %v13829_v58  ;;  %v13871_v34 = vld [vmem:[#allocation2 + $0x7] sm:$0xff] }
0x11ec   :  { %v6243_v14 = vpop.permute.xlu1 %6242  ;;  %v6267_v18 = vmul.f32 %v6266_v63, %v13871_v34  ;;  %v6273_v57 = vmul.f32 %v6272_v1, %v13871_v34 }
0x11ed   :  { %6253 = vst.msk [vmem:[#allocation2 + $0x38] sm:$0xff] %vm6250_vm6, %v6243_v14 }
0x11ee   :  { %v6245_v24 = vpop.permute.xlu0 %6244  ;;  %v13818_v33 = vld [vmem:[#allocation2 + $0x11] sm:$0xff]  ;;  %v13820_v9 = vld [vmem:[#allocation2 + $0x9] sm:$0xff] }
0x11ef   :  { %6254 = vst.msk [vmem:[#allocation2 + $0x40] sm:$0xff] %vm6250_vm6, %v6245_v24  ;;  %v6312_v10 = vmul.f32 %v6310_v6, %v13818_v33  ;;  %v6311_v56 = vmul.f32 %v6310_v6, %v13820_v9  ;;  %v13827_v48 = vld [vmem:[#allocation2 + $0x10] sm:$0xff]  ;;  %v6306_v44 = vmul.f32 %v6304_v4, %v13818_v33  ;;  %v6305_v20 = vmul.f32 %v6304_v4, %v13820_v9 }
0x11f0   :  { %v6284_v60 = vmul.f32 %v6282_v49, %v13827_v48  ;;  %v6296_v62 = vmul.f32 %v6294_v25, %v13827_v48  ;;  %v13869_v52 = vld [vmem:[#allocation2 + $0xf] sm:$0xff]  ;;  %v6318_v17 = vmul.f32 %v13831_v21, %v13818_v33 }
0x11f1   :  { %6393 = vrot.lane.b32.xlu0 %v6312_v10, %s12508_s29  ;;  %6391 = vrot.lane.b32.xlu1 %v6311_v56, %s12508_s29  ;;  %v6268_v43 = vmul.f32 %v6266_v63, %v13869_v52  ;;  %v6274_v10 = vmul.f32 %v6272_v1, %v13869_v52 }
0x11f4   :  { %v13849_v11 = vld [vmem:[#allocation2 + $0x38] sm:$0xff] }
0x11f5   :  { %v6285_v22 = vmul.f32 %v6282_v49, %v13849_v11  ;;  %v6297_v32 = vmul.f32 %v6294_v25, %v13849_v11  ;;  %v13879_v27 = vld [vmem:[#allocation2 + $0x37] sm:$0xff] }
0x11f6   :  { %v6302_v31 = vld [vmem:[#allocation2 + $0x41] sm:$0xff]  ;;  %v6301_v39 = vld [vmem:[#allocation2 + $0x39] sm:$0xff]  ;;  %v6269_v46 = vmul.f32 %v6266_v63, %v13879_v27  ;;  %v6275_v56 = vmul.f32 %v6272_v1, %v13879_v27 }
0x11f7   :  { %v6314_v47 = vmul.f32 %v6310_v6, %v6302_v31  ;;  %v6313_v0 = vmul.f32 %v6310_v6, %v6301_v39  ;;  %v6320_v37 = vmul.f32 %v13831_v21, %v6302_v31  ;;  %v6319_v12 = vmul.f32 %v13831_v21, %v6301_v39  ;;  %v13847_v59 = vld [vmem:[#allocation2 + $0x40] sm:$0xff] }
0x11f8   :  { %v6286_v19 = vmul.f32 %v6282_v49, %v13847_v59  ;;  %v6298_v13 = vmul.f32 %v6294_v25, %v13847_v59  ;;  %v6308_v23 = vmul.f32 %v6304_v4, %v6302_v31  ;;  %v6307_v55 = vmul.f32 %v6304_v4, %v6301_v39  ;;  %v13877_v35 = vld [vmem:[#allocation2 + $0x3f] sm:$0xff] }
0x11f9   :  { %6397 = vrot.lane.b32.xlu0 %v6314_v47, %s12508_s29  ;;  %6395 = vrot.lane.b32.xlu1 %v6313_v0, %s12508_s29  ;;  %v13842_v28 = vadd.f32 %v13837_v53, %v6320_v37  ;;  %v13845_v29 = vadd.f32 %v13837_v53, %v6319_v12  ;;  %v6270_v41 = vmul.f32 %v6266_v63, %v13877_v35 }
0x11fa   :  { %v6324_v6 = vadd.f32 %v13837_v53, %v6318_v17  ;;  %v6317_v39 = vmul.f32 %v13831_v21, %v13820_v9  ;;  %v6276_v0 = vmul.f32 %v6272_v1, %v13877_v35 }
0x11fc   :  { %v6323_v37 = vadd.f32 %v13837_v53, %v6317_v39 }
0x11fd   :  { %6353 = vrot.lane.b32.xlu0 %v6284_v60, %s12509_s30  ;;  %6351 = vrot.lane.b32.xlu1 %v6283_v3, %s12509_s30  ;;  %v6288_v3 = vstv %s9941_s1 }
0x11fe   :  { %v6290_v21 = vmul.f32 %v6288_v3, %v13827_v48  ;;  %v6292_v4 = vmul.f32 %v6288_v3, %v13847_v59 }
0x1201   :  { %6357 = vrot.lane.b32.xlu0 %v6286_v19, %s12509_s30  ;;  %6355 = vrot.lane.b32.xlu1 %v6285_v22, %s12509_s30  ;;  %v6289_v22 = vmul.f32 %v6288_v3, %v13829_v58 }
0x1205   :  { %6373 = vrot.lane.b32.xlu0 %v6296_v62, %s12508_s29  ;;  %6371 = vrot.lane.b32.xlu1 %v6295_v2, %s12508_s29 }
0x1209   :  { %6377 = vrot.lane.b32.xlu0 %v6298_v13, %s12508_s29  ;;  %6375 = vrot.lane.b32.xlu1 %v6297_v32, %s12508_s29 }
0x1263   :  { %v6394_v61 = vpop.permute.xlu0 %6393  ;;  %v6392_v40 = vpop.permute.xlu1 %6391 }
0x1264   :  { %v6404_v15 = vadd.f32 %v6394_v61, %v6306_v44  ;;  %v6403_v7 = vadd.f32 %v6392_v40, %v6305_v20  ;;  %v6291_v44 = vmul.f32 %v6288_v3, %v13849_v11 }
0x1266   :  { %6433 = vrot.lane.b32.xlu0 %v6404_v15, %s12506_s25  ;;  %6431 = vrot.lane.b32.xlu1 %v6403_v7, %s12506_s25 }
0x126b   :  { %v6398_v45 = vpop.permute.xlu0 %6397  ;;  %v6396_v54 = vpop.permute.xlu1 %6395 }
0x126c   :  { %v6406_v50 = vadd.f32 %v6398_v45, %v6308_v23  ;;  %v6405_v30 = vadd.f32 %v6396_v54, %v6307_v55 }
0x126e   :  { %6437 = vrot.lane.b32.xlu0 %v6406_v50, %s12506_s25  ;;  %6435 = vrot.lane.b32.xlu1 %v6405_v30, %s12506_s25  ;;  %v6260_v30 = vstv %s6259_s5 }
0x126f   :  { %v6352_v38 = vpop.permute.xlu1 %6351  ;;  %v6354_v5 = vpop.permute.xlu0 %6353  ;;  %v6262_v63 = vmul.f32 %v6260_v30, %v13869_v52 }
0x1270   :  { %v6363_v14 = vadd.f32 %v6352_v38, %v6273_v57  ;;  %v6364_v33 = vadd.f32 %v6354_v5, %v6274_v10  ;;  %v6263_v10 = vmul.f32 %v6260_v30, %v13879_v27 }
0x1272   :  { %6333 = vrot.lane.b32.xlu0 %v6268_v43, %s12508_s29  ;;  %6331 = vrot.lane.b32.xlu1 %v6267_v18, %s12508_s29  ;;  %v6261_v43 = vmul.f32 %v6260_v30, %v13871_v34 }
0x1273   :  { %v6356_v24 = vpop.permute.xlu1 %6355  ;;  %v6358_v47 = vpop.permute.xlu0 %6357 }
0x1274   :  { %v6365_v31 = vadd.f32 %v6356_v24, %v6275_v56  ;;  %v6366_v49 = vadd.f32 %v6358_v47, %v6276_v0  ;;  %v6264_v24 = vmul.f32 %v6260_v30, %v13877_v35 }
0x1276   :  { %6337 = vrot.lane.b32.xlu0 %v6270_v41, %s12508_s29  ;;  %6335 = vrot.lane.b32.xlu1 %v6269_v46, %s12508_s29 }
0x1277   :  { %v6374_v12 = vpop.permute.xlu0 %6373  ;;  %v6372_v60 = vpop.permute.xlu1 %6371 }
0x1278   :  { %v6384_v25 = vadd.f32 %v6374_v12, %v6290_v21  ;;  %v6383_v62 = vadd.f32 %v6372_v60, %v6289_v22  ;;  %v6566_v22 = vstv %s9954_s28 }
0x127a   :  { %6473 = vrot.lane.b32.xlu0 %v6324_v6, %s12510_s12  ;;  %6411 = vrot.lane.b32.xlu1 %v6363_v14, %s12510_s12 }
0x127b   :  { %v6378_v19 = vpop.permute.xlu0 %6377  ;;  %v6376_v9 = vpop.permute.xlu1 %6375 }
0x127c   :  { %v6386_v20 = vadd.f32 %v6378_v19, %v6292_v4  ;;  %v6385_v61 = vadd.f32 %v6376_v9, %v6291_v44 }
0x127e   :  { %6413 = vrot.lane.b32.xlu0 %v6364_v33, %s12510_s12  ;;  %6415 = vrot.lane.b32.xlu1 %v6365_v31, %s12510_s12 }
0x1282   :  { %6417 = vrot.lane.b32.xlu0 %v6366_v49, %s12510_s12  ;;  %6471 = vrot.lane.b32.xlu1 %v6323_v37, %s12510_s12 }
0x12d8   :  { %v6434_v2 = vpop.permute.xlu0 %6433  ;;  %v6432_v13 = vpop.permute.xlu1 %6431 }
0x12d9   :  { %v6444_v32 = vadd.f32 %v6434_v2, %v6384_v25  ;;  %v6443_v53 = vadd.f32 %v6432_v13, %v6383_v62 }
0x12db   :  { %6453 = vrot.lane.b32.xlu0 %v6444_v32, %s12508_s29  ;;  %6451 = vrot.lane.b32.xlu1 %v6443_v53, %s12508_s29 }
0x12e0   :  { %v6438_v40 = vpop.permute.xlu0 %6437  ;;  %v6436_v48 = vpop.permute.xlu1 %6435 }
0x12e1   :  { %v6446_v15 = vadd.f32 %v6438_v40, %v6386_v20  ;;  %v6445_v58 = vadd.f32 %v6436_v48, %v6385_v61  ;;  %v6538_v48 = vstv %s9950_s9 }
0x12e3   :  { %6457 = vrot.lane.b32.xlu0 %v6446_v15, %s12508_s29  ;;  %6455 = vrot.lane.b32.xlu1 %v6445_v58, %s12508_s29  ;;  %v6572_v58 = vstv %s9955_s10 }
0x12e4   :  { %v6334_v7 = vpop.permute.xlu0 %6333  ;;  %v6332_v59 = vpop.permute.xlu1 %6331 }
0x12e5   :  { %v6343_v38 = vadd.f32 %v6332_v59, %v6261_v43 }
0x12e7   :  { %6477 = vrot.lane.b32.xlu0 %v13842_v28, %s12510_s12  ;;  %6475 = vrot.lane.b32.xlu1 %v13845_v29, %s12510_s12  ;;  %v6344_v28 = vadd.f32 %v6334_v7, %v6262_v63 }
0x12e8   :  { %v6338_v23 = vpop.permute.xlu0 %6337  ;;  %v6336_v11 = vpop.permute.xlu1 %6335 }
0x12e9   :  { %v6346_v33 = vadd.f32 %v6338_v23, %v6264_v24  ;;  %v6345_v34 = vadd.f32 %v6336_v11, %v6263_v10  ;;  %v6578_v11 = vstv %s9956_s11 }
0x12ec   :  { %v6474_v55 = vpop.permute.xlu0 %6473  ;;  %v6412_v45 = vpop.permute.xlu1 %6411 }
0x12ed   :  { %v6423_v41 = vadd.f32 %v6412_v45, %v6343_v38 }
0x12f0   :  { %v6414_v54 = vpop.permute.xlu0 %6413  ;;  %v6416_v50 = vpop.permute.xlu1 %6415 }
0x12f1   :  { %v6424_v29 = vadd.f32 %v6414_v54, %v6344_v28  ;;  %v6425_v47 = vadd.f32 %v6416_v50, %v6345_v34 }
0x12f4   :  { %v6418_v18 = vpop.permute.xlu0 %6417  ;;  %v6472_v1 = vpop.permute.xlu1 %6471 }
0x12f5   :  { %v6426_v0 = vadd.f32 %v6418_v18, %v6346_v33  ;;  %v6550_v18 = vstv %s9952_s13 }
0x134d   :  { %v6454_v46 = vpop.permute.xlu0 %6453  ;;  %v6452_v17 = vpop.permute.xlu1 %6451 }
0x134e   :  { %v6464_v57 = vadd.f32 %v6454_v46, %v6424_v29  ;;  %v6463_v5 = vadd.f32 %v6452_v17, %v6423_v41  ;;  %v6560_v29 = vstv %s9953_s14 }
0x1350   :  { %v6484_v14 = vadd.f32 %v6474_v55, %v6464_v57  ;;  %v6483_v6 = vadd.f32 %v6472_v1, %v6463_v5 }
0x1352   :  { %v6488_v56 = vmax.f32 %v6484_v14, 0.0  ;;  %v6487_v52 = vmax.f32 %v6483_v6, 0.0 }
0x1354   :  { %6497 = vrot.lane.b32.xlu0 %v6488_v56, %s12506_s25  ;;  %6495 = vrot.lane.b32.xlu1 %v6487_v52, %s12506_s25 }
0x1355   :  { %v6458_v31 = vpop.permute.xlu0 %6457  ;;  %v6456_v39 = vpop.permute.xlu1 %6455 }
0x1356   :  { %v6466_v49 = vadd.f32 %v6458_v31, %v6426_v0  ;;  %v6465_v37 = vadd.f32 %v6456_v39, %v6425_v47  ;;  %v6522_v47 = vstv %s9948_s15 }
0x1359   :  { %v6478_v12 = vpop.permute.xlu0 %6477  ;;  %v6476_v60 = vpop.permute.xlu1 %6475 }
0x135a   :  { %v6486_v3 = vadd.f32 %v6478_v12, %v6466_v49  ;;  %v6485_v35 = vadd.f32 %v6476_v60, %v6465_v37 }
0x135c   :  { %v6490_v19 = vmax.f32 %v6486_v3, 0.0  ;;  %v6489_v27 = vmax.f32 %v6485_v35, 0.0 }
0x135e   :  { %6501 = vrot.lane.b32.xlu0 %v6490_v19, %s12506_s25  ;;  %6499 = vrot.lane.b32.xlu1 %v6489_v27, %s12506_s25  ;;  %v6528_v27 = vstv %s9949_s16 }
0x13c6   :  { %v6498_v9 = vpop.permute.xlu0 %6497  ;;  %v6496_v21 = vpop.permute.xlu1 %6495 }
0x13c7   :  { %6508 = vst.msk [vmem:[#allocation2 + $0x10] sm:$0xff] %vm6250_vm6, %v6498_v9  ;;  %6507 = vst.msk [vmem:[#allocation2 + $0x8] sm:$0xff] %vm6250_vm6, %v6496_v21 }
0x13ce   :  { %v13925_v25 = vld [vmem:[#allocation2 + $0x11] sm:$0xff]  ;;  %v13927_v62 = vld [vmem:[#allocation2 + $0x9] sm:$0xff] }
0x13cf   :  { %v6568_v2 = vmul.f32 %v6566_v22, %v13925_v25  ;;  %v6567_v13 = vmul.f32 %v6566_v22, %v13927_v62  ;;  %v13935_v40 = vld [vmem:[#allocation2 + $0x10] sm:$0xff]  ;;  %v13937_v15 = vld [vmem:[#allocation2 + $0x8] sm:$0xff]  ;;  %v6562_v46 = vmul.f32 %v6560_v29, %v13925_v25  ;;  %v6561_v17 = vmul.f32 %v6560_v29, %v13927_v62 }
0x13d0   :  { %v6502_v32 = vpop.permute.xlu0 %6501  ;;  %v6500_v53 = vpop.permute.xlu1 %6499  ;;  %v6540_v59 = vmul.f32 %v6538_v48, %v13935_v40  ;;  %v6539_v23 = vmul.f32 %v6538_v48, %v13937_v15  ;;  %v6552_v1 = vmul.f32 %v6550_v18, %v13935_v40  ;;  %v6551_v28 = vmul.f32 %v6550_v18, %v13937_v15  ;;  %v13969_v31 = vld [vmem:[#allocation2 + $0xf] sm:$0xff]  ;;  %v13971_v39 = vld [vmem:[#allocation2 + $0x7] sm:$0xff] }
0x13d1   :  { %6510 = vst.msk [vmem:[#allocation2 + $0x40] sm:$0xff] %vm6250_vm6, %v6502_v32  ;;  %6509 = vst.msk [vmem:[#allocation2 + $0x38] sm:$0xff] %vm6250_vm6, %v6500_v53  ;;  %6649 = vrot.lane.b32.xlu0 %v6568_v2, %s12508_s29  ;;  %6647 = vrot.lane.b32.xlu1 %v6567_v13, %s12508_s29  ;;  %v6524_v0 = vmul.f32 %v6522_v47, %v13969_v31  ;;  %v6523_v49 = vmul.f32 %v6522_v47, %v13971_v39 }
0x13d2   :  { %v6574_v35 = vmul.f32 %v6572_v58, %v13925_v25  ;;  %v6573_v19 = vmul.f32 %v6572_v58, %v13927_v62  ;;  %v6530_v13 = vmul.f32 %v6528_v27, %v13969_v31  ;;  %v6529_v32 = vmul.f32 %v6528_v27, %v13971_v39 }
0x13d4   :  { %v6579_v2 = vadd.f32 %v6578_v11, %v6573_v19 }
0x13d8   :  { %v6558_v4 = vld [vmem:[#allocation2 + $0x41] sm:$0xff]  ;;  %v6557_v44 = vld [vmem:[#allocation2 + $0x39] sm:$0xff] }
0x13d9   :  { %v6570_v20 = vmul.f32 %v6566_v22, %v6558_v4  ;;  %v6569_v61 = vmul.f32 %v6566_v22, %v6557_v44  ;;  %v6576_v7 = vmul.f32 %v6572_v58, %v6558_v4  ;;  %v6575_v55 = vmul.f32 %v6572_v58, %v6557_v44  ;;  %v13943_v45 = vld [vmem:[#allocation2 + $0x40] sm:$0xff]  ;;  %v13945_v54 = vld [vmem:[#allocation2 + $0x38] sm:$0xff] }
0x13da   :  { %v6542_v63 = vmul.f32 %v6538_v48, %v13943_v45  ;;  %v6541_v43 = vmul.f32 %v6538_v48, %v13945_v54  ;;  %v6554_v38 = vmul.f32 %v6550_v18, %v13943_v45  ;;  %v6553_v41 = vmul.f32 %v6550_v18, %v13945_v54  ;;  %v13977_v37 = vld [vmem:[#allocation2 + $0x3f] sm:$0xff]  ;;  %v13979_v12 = vld [vmem:[#allocation2 + $0x37] sm:$0xff] }
0x13db   :  { %6653 = vrot.lane.b32.xlu0 %v6570_v20, %s12508_s29  ;;  %6651 = vrot.lane.b32.xlu1 %v6569_v61, %s12508_s29  ;;  %v13947_v50 = vadd.f32 %v6578_v11, %v6576_v7  ;;  %v13951_v30 = vadd.f32 %v6578_v11, %v6575_v55  ;;  %v6564_v24 = vmul.f32 %v6560_v29, %v6558_v4 }
0x13dc   :  { %v6563_v10 = vmul.f32 %v6560_v29, %v6557_v44  ;;  %v6526_v60 = vmul.f32 %v6522_v47, %v13977_v37  ;;  %v6525_v3 = vmul.f32 %v6522_v47, %v13979_v12  ;;  %v6580_v22 = vadd.f32 %v6578_v11, %v6574_v35 }
0x13dd   :  { %v6532_v44 = vmul.f32 %v6528_v27, %v13977_v37  ;;  %v6531_v20 = vmul.f32 %v6528_v27, %v13979_v12 }
0x13df   :  { %6609 = vrot.lane.b32.xlu0 %v6540_v59, %s12509_s30  ;;  %6607 = vrot.lane.b32.xlu1 %v6539_v23, %s12509_s30  ;;  %v6544_v59 = vstv %s9951_s0 }
0x13e0   :  { %v6546_v55 = vmul.f32 %v6544_v59, %v13935_v40  ;;  %v6548_v29 = vmul.f32 %v6544_v59, %v13943_v45 }
0x13e3   :  { %6613 = vrot.lane.b32.xlu0 %v6542_v63, %s12509_s30  ;;  %6611 = vrot.lane.b32.xlu1 %v6541_v43, %s12509_s30  ;;  %v6545_v63 = vmul.f32 %v6544_v59, %v13937_v15 }
0x13e7   :  { %6629 = vrot.lane.b32.xlu0 %v6552_v1, %s12508_s29  ;;  %6627 = vrot.lane.b32.xlu1 %v6551_v28, %s12508_s29 }
0x13eb   :  { %6633 = vrot.lane.b32.xlu0 %v6554_v38, %s12508_s29  ;;  %6631 = vrot.lane.b32.xlu1 %v6553_v41, %s12508_s29 }
0x1443   :  { %v6650_v57 = vpop.permute.xlu0 %6649  ;;  %v6648_v5 = vpop.permute.xlu1 %6647 }
0x1444   :  { %v6660_v14 = vadd.f32 %v6650_v57, %v6562_v46  ;;  %v6659_v6 = vadd.f32 %v6648_v5, %v6561_v17  ;;  %v6547_v46 = vmul.f32 %v6544_v59, %v13945_v54  ;;  %v6769_v59 = vld [vmem:[#allocation2 + $0x18] sm:$0xff] }
0x1446   :  { %6689 = vrot.lane.b32.xlu0 %v6660_v14, %s12506_s25  ;;  %6687 = vrot.lane.b32.xlu1 %v6659_v6, %s12506_s25 }
0x144d   :  { %v6654_v56 = vpop.permute.xlu0 %6653  ;;  %v6652_v52 = vpop.permute.xlu1 %6651 }
0x144e   :  { %v6662_v33 = vadd.f32 %v6654_v56, %v6564_v24  ;;  %v6661_v34 = vadd.f32 %v6652_v52, %v6563_v10 }
0x1450   :  { %6693 = vrot.lane.b32.xlu0 %v6662_v33, %s12506_s25  ;;  %6691 = vrot.lane.b32.xlu1 %v6661_v34, %s12506_s25  ;;  %v6516_v34 = vstv %s9947_s17 }
0x1451   :  { %v6610_v9 = vpop.permute.xlu0 %6609  ;;  %v6608_v21 = vpop.permute.xlu1 %6607  ;;  %v6518_v47 = vmul.f32 %v6516_v34, %v13969_v31  ;;  %v6520_v31 = vmul.f32 %v6516_v34, %v13977_v37 }
0x1452   :  { %v6620_v25 = vadd.f32 %v6610_v9, %v6530_v13  ;;  %v6619_v53 = vadd.f32 %v6608_v21, %v6529_v32 }
0x1454   :  { %6589 = vrot.lane.b32.xlu0 %v6524_v0, %s12508_s29  ;;  %6587 = vrot.lane.b32.xlu1 %v6523_v49, %s12508_s29  ;;  %v6517_v0 = vmul.f32 %v6516_v34, %v13971_v39  ;;  %v6519_v39 = vmul.f32 %v6516_v34, %v13979_v12 }
0x1455   :  { %v6614_v62 = vpop.permute.xlu0 %6613  ;;  %v6612_v4 = vpop.permute.xlu1 %6611 }
0x1456   :  { %v6622_v61 = vadd.f32 %v6614_v62, %v6532_v44  ;;  %v6621_v48 = vadd.f32 %v6612_v4, %v6531_v20 }
0x1458   :  { %6593 = vrot.lane.b32.xlu0 %v6526_v60, %s12508_s29  ;;  %6591 = vrot.lane.b32.xlu1 %v6525_v3, %s12508_s29 }
0x1459   :  { %v6630_v58 = vpop.permute.xlu0 %6629  ;;  %v6628_v7 = vpop.permute.xlu1 %6627 }
0x145a   :  { %v6640_v43 = vadd.f32 %v6630_v58, %v6546_v55  ;;  %v6639_v18 = vadd.f32 %v6628_v7, %v6545_v63  ;;  %v6776_v63 = vld [vmem:[#allocation7 + $0x100] sm:$0xff] }
0x145c   :  { %6729 = vrot.lane.b32.xlu0 %v6580_v22, %s12510_s12  ;;  %6727 = vrot.lane.b32.xlu1 %v6579_v2, %s12510_s12 }
0x145d   :  { %v6634_v23 = vpop.permute.xlu0 %6633  ;;  %v6632_v11 = vpop.permute.xlu1 %6631 }
0x145e   :  { %v6642_v17 = vadd.f32 %v6634_v23, %v6548_v29  ;;  %v6641_v57 = vadd.f32 %v6632_v11, %v6547_v46 }
0x1460   :  { %6669 = vrot.lane.b32.xlu0 %v6620_v25, %s12510_s12  ;;  %6667 = vrot.lane.b32.xlu1 %v6619_v53, %s12510_s12 }
0x1464   :  { %6673 = vrot.lane.b32.xlu0 %v6622_v61, %s12510_s12  ;;  %6671 = vrot.lane.b32.xlu1 %v6621_v48, %s12510_s12 }
0x14b8   :  { %v6690_v1 = vpop.permute.xlu0 %6689  ;;  %v6688_v28 = vpop.permute.xlu1 %6687 }
0x14b9   :  { %v6700_v38 = vadd.f32 %v6690_v1, %v6640_v43  ;;  %v6699_v41 = vadd.f32 %v6688_v28, %v6639_v18  ;;  %v6801_v18 = vsel %vm390_vm1, %v6776_v63, 0 }
0x14ba   :  { %v14037_v1 = vand.u32 4294901760, %v6801_v18 }
0x14bb   :  { %6709 = vrot.lane.b32.xlu0 %v6700_v38, %s12508_s29  ;;  %6707 = vrot.lane.b32.xlu1 %v6699_v41, %s12508_s29  ;;  %v6780_v38 = vld [vmem:[#allocation7 + $0x120] sm:$0xff]  ;;  %v6773_v41 = vld [vmem:[#allocation2 + $0x48] sm:$0xff] }
0x14bc   :  { %v14040_v28 = vsub.f32 %v6801_v18, %v14037_v1  ;;  %v7443_v46 = vsel %vm390_vm1, %v6780_v38, 0 }
0x14c2   :  { %v6694_v5 = vpop.permute.xlu0 %6693  ;;  %v6692_v40 = vpop.permute.xlu1 %6691 }
0x14c3   :  { %v6702_v14 = vadd.f32 %v6694_v5, %v6642_v17  ;;  %v6701_v15 = vadd.f32 %v6692_v40, %v6641_v57  ;;  %v6883_v17 = vand.u32 4294901760, %v14040_v28  ;;  %v14046_v57 = vand.u32 4294901760, %v7443_v46 }
0x14c5   :  { %6713 = vrot.lane.b32.xlu0 %v6702_v14, %s12508_s29  ;;  %6711 = vrot.lane.b32.xlu1 %v6701_v15, %s12508_s29  ;;  %v6884_v5 = vsub.f32 %v14040_v28, %v6883_v17  ;;  %v14052_v40 = vsub.f32 %v7443_v46, %v14046_v57 }
0x14c6   :  { %v6590_v6 = vpop.permute.xlu0 %6589  ;;  %v6588_v45 = vpop.permute.xlu1 %6587 }
0x14c7   :  { %v6599_v3 = vadd.f32 %v6588_v45, %v6517_v0  ;;  %v6885_v15 = vand.u32 4294901760, %v6884_v5  ;;  %v6779_v0 = vld [vmem:[#allocation7 + $0x118] sm:$0xff] }
0x14c9   :  { %6733 = vrot.lane.b32.xlu0 %v13947_v50, %s12510_s12  ;;  %6731 = vrot.lane.b32.xlu1 %v13951_v30, %s12510_s12  ;;  %v6600_v50 = vadd.f32 %v6590_v6, %v6518_v47  ;;  %v7525_v6 = vand.u32 4294901760, %v14052_v40  ;;  %v6778_v47 = vld [vmem:[#allocation7 + $0x110] sm:$0xff] }
0x14ca   :  { %v6594_v24 = vpop.permute.xlu0 %6593  ;;  %v6592_v54 = vpop.permute.xlu1 %6591  ;;  %11223 = vmatprep.mubr.f32.mxu0 %v6885_v15 }
0x14cb   :  { %v6602_v25 = vadd.f32 %v6594_v24, %v6520_v31  ;;  %v6601_v53 = vadd.f32 %v6592_v54, %v6519_v39  ;;  %v7526_v45 = vsub.f32 %v14052_v40, %v7525_v6 }
0x14cd   :  { %v7527_v54 = vand.u32 4294901760, %v7526_v45 }
0x14ce   :  { %v6730_v10 = vpop.permute.xlu0 %6729  ;;  %v6728_v56 = vpop.permute.xlu1 %6727 }
0x14cf   :  { %11307 = vmatprep.mubr.f32.mxu1 %v7527_v54 }
0x14d2   :  { %v6670_v52 = vpop.permute.xlu0 %6669  ;;  %v6668_v33 = vpop.permute.xlu1 %6667 }
0x14d3   :  { %v6680_v35 = vadd.f32 %v6670_v52, %v6600_v50  ;;  %v6679_v30 = vadd.f32 %v6668_v33, %v6599_v3  ;;  %v6777_v52 = vld [vmem:[#allocation7 + $0x108] sm:$0xff]  ;;  %v6807_v50 = vsel %vm390_vm1, %v6778_v47, 0 }
0x14d4   :  { %v6804_v33 = vsel %vm390_vm1, %v6777_v52, 0 }
0x14d6   :  { %v6674_v49 = vpop.permute.xlu0 %6673  ;;  %v6672_v60 = vpop.permute.xlu1 %6671 }
0x14d7   :  { %v6682_v44 = vadd.f32 %v6674_v49, %v6602_v25  ;;  %v6681_v20 = vadd.f32 %v6672_v60, %v6601_v53  ;;  %v14062_v49 = vand.u32 4294901760, %v6804_v33  ;;  %v6783_v25 = vld [vmem:[#allocation7 + $0x138] sm:$0xff] }
0x152d   :  { %v6710_v19 = vpop.permute.xlu0 %6709  ;;  %v6708_v27 = vpop.permute.xlu1 %6707 }
0x152e   :  { %v6720_v9 = vadd.f32 %v6710_v19, %v6680_v35  ;;  %v6719_v21 = vadd.f32 %v6708_v27, %v6679_v30  ;;  %v6810_v30 = vsel %vm390_vm1, %v6779_v0, 0  ;;  %v6781_v19 = vld [vmem:[#allocation7 + $0x128] sm:$0xff]  ;;  %v14067_v27 = vsub.f32 %v6804_v33, %v14062_v49 }
0x1530   :  { %v6740_v22 = vadd.f32 %v6730_v10, %v6720_v9  ;;  %v6739_v2 = vadd.f32 %v6728_v56, %v6719_v21  ;;  %v14069_v9 = vand.u32 4294901760, %v6807_v50  ;;  %v6782_v21 = vld [vmem:[#allocation7 + $0x130] sm:$0xff] }
0x1532   :  { %v6744_v13 = vadd.f32 %v6740_v22, %v13791_v36  ;;  %v6743_v32 = vadd.f32 %v6739_v2, %v13781_v26  ;;  %v14073_v2 = vand.u32 4294901760, %v6810_v30 }
0x1534   :  { %6753 = vrot.lane.b32.xlu0 %v6744_v13, %s12506_s25  ;;  %6751 = vrot.lane.b32.xlu1 %v6743_v32, %s12506_s25  ;;  %v7446_v13 = vsel %vm390_vm1, %v6781_v19, 0 }
0x1537   :  { %v6714_v62 = vpop.permute.xlu0 %6713  ;;  %v6712_v4 = vpop.permute.xlu1 %6711 }
0x1538   :  { %v6722_v61 = vadd.f32 %v6714_v62, %v6682_v44  ;;  %v6721_v48 = vadd.f32 %v6712_v4, %v6681_v20  ;;  %v7449_v4 = vsel %vm390_vm1, %v6782_v21, 0  ;;  %v6893_v44 = vand.u32 4294901760, %v14067_v27 }
0x1539   :  { %v14081_v20 = vsub.f32 %v6807_v50, %v14069_v9 }
0x153b   :  { %v6734_v58 = vpop.permute.xlu0 %6733  ;;  %v6732_v36 = vpop.permute.xlu1 %6731 }
0x153c   :  { %v6742_v7 = vadd.f32 %v6734_v58, %v6722_v61  ;;  %v6741_v26 = vadd.f32 %v6732_v36, %v6721_v48  ;;  %v14083_v61 = vand.u32 4294901760, %v7446_v13  ;;  %v14089_v36 = vsub.f32 %v6810_v30, %v14073_v2 }
0x153e   :  { %v6746_v37 = vadd.f32 %v6742_v7, %v13805_v8  ;;  %v6745_v12 = vadd.f32 %v6741_v26, %v13803_v51  ;;  %v7452_v7 = vsel %vm390_vm1, %v6783_v25, 0  ;;  %v6913_v38 = vand.u32 4294901760, %v14089_v36 }
0x1540   :  { %6757 = vrot.lane.b32.xlu0 %v6746_v37, %s12506_s25  ;;  %6755 = vrot.lane.b32.xlu1 %v6745_v12, %s12506_s25 }
0x1544   :  { %5967 = vrot.lane.b32.xlu0 %v13670_v42, %s12506_s25  ;;  %5959 = vrot.lane.b32.xlu1 %v13665_v16, %s12506_s25 }
0x1548   :  { %6792 = vrot.lane.b32.xlu1 %v6769_v59, %s12508_s29 }
0x15a6   :  { %v6754_v23 = vpop.permute.xlu0 %6753  ;;  %v6752_v11 = vpop.permute.xlu1 %6751 }
0x15a7   :  { %6764 = vst.msk [vmem:[#allocation2 + $0x10] sm:$0xff] %vm6250_vm6, %v6754_v23  ;;  %6763 = vst.msk [vmem:[#allocation2 + $0x8] sm:$0xff] %vm6250_vm6, %v6752_v11  ;;  %v14095_v23 = vand.u32 4294901760, %v7449_v4 }
0x15ae   :  { %v6767_v51 = vld [vmem:[#allocation2 + $0x8] sm:$0xff]  ;;  %v6768_v14 = vld [vmem:[#allocation2 + $0x10] sm:$0xff] }
0x15af   :  { %6788 = vrot.lane.b32.xlu1 %v6767_v51, %s12508_s29 }
0x15b2   :  { %v6758_v8 = vpop.permute.xlu0 %6757  ;;  %v6756_v55 = vpop.permute.xlu1 %6755 }
0x15b3   :  { %6766 = vst.msk [vmem:[#allocation2 + $0x40] sm:$0xff] %vm6250_vm6, %v6758_v8  ;;  %6765 = vst.msk [vmem:[#allocation2 + $0x38] sm:$0xff] %vm6250_vm6, %v6756_v55  ;;  %v6894_v8 = vsub.f32 %v14067_v27, %v6893_v44  ;;  %v6903_v55 = vand.u32 4294901760, %v14081_v20 }
0x15b6   :  { %v5968_v42 = vpop.permute.xlu0 %5967  ;;  %v5960_v16 = vpop.permute.xlu1 %5959 }
0x15b7   :  { %5984 = vst.msk [vmem:[#allocation2 + $0x50] sm:$0xff] %vm2952_vm2, %v5968_v42  ;;  %5980 = vst.msk [vmem:[#allocation2 + $0x20] sm:$0xff] %vm2952_vm2, %v5960_v16  ;;  %v14103_v42 = vsub.f32 %v7446_v13, %v14083_v61  ;;  %v14105_v16 = vand.u32 4294901760, %v7452_v7 }
0x15b9   :  { %v7535_v52 = vand.u32 4294901760, %v14103_v42  ;;  %v14137_v33 = vsub.f32 %v7452_v7, %v14105_v16 }
0x15ba   :  { %v6771_v43 = vld [vmem:[#allocation2 + $0x38] sm:$0xff]  ;;  %v6772_v24 = vld [vmem:[#allocation2 + $0x40] sm:$0xff]  ;;  %v6793_v56 = vpop.permute.xlu1 %6792 }
0x15bb   :  { %7430 = vrot.lane.b32.xlu1 %v6771_v43, %s12508_s29  ;;  %v6819_v60 = vand.u32 4294901760, %v6793_v56 }
0x15bd   :  { %v14071_v22 = vsub.f32 %v6793_v56, %v6819_v60  ;;  %v6904_v56 = vsub.f32 %v14081_v20, %v6903_v55 }
0x15be   :  { %v6770_v29 = vld [vmem:[#allocation2 + $0x20] sm:$0xff]  ;;  %v6774_v10 = vld [vmem:[#allocation2 + $0x50] sm:$0xff] }
0x15bf   :  { %7434 = vrot.lane.b32.xlu1 %v6773_v41, %s12508_s29  ;;  %6794 = vrot.lane.b32.xlu0 %v6770_v29, %s12508_s29  ;;  %v6938_v48 = vand.u32 4294901760, %v14071_v22 }
0x15c1   :  { %v6939_v63 = vsub.f32 %v14071_v22, %v6938_v48 }
0x15c3   :  { %6790 = vrot.lane.b32.xlu0 %v6768_v14, %s12508_s29  ;;  %v14122_v14 = vsub.f32 %v7449_v4, %v14095_v23  ;;  %v6940_v25 = vand.u32 4294901760, %v6939_v63 }
0x15c5   :  { %v7545_v19 = vand.u32 4294901760, %v14122_v14 }
0x15c7   :  { %7432 = vrot.lane.b32.xlu0 %v6772_v24, %s12508_s29  ;;  %v7546_v63 = vsub.f32 %v14122_v14, %v7545_v19 }
0x15cb   :  { %7436 = vrot.lane.b32.xlu0 %v6774_v10, %s12508_s29  ;;  %v6895_v10 = vand.u32 4294901760, %v6894_v8  ;;  %v6905_v8 = vand.u32 4294901760, %v6904_v56 }
0x1621   :  { %v6789_v34 = vpop.permute.xlu1 %6788 }
0x1622   :  { %v6813_v3 = vand.u32 4294901760, %v6789_v34 }
0x1624   :  { %v14076_v32 = vsub.f32 %v6789_v34, %v6813_v3 }
0x1626   :  { %v6924_v26 = vand.u32 4294901760, %v14076_v32 }
0x1628   :  { %v6925_v41 = vsub.f32 %v14076_v32, %v6924_v26 }
0x162a   :  { %v6926_v30 = vand.u32 4294901760, %v6925_v41 }
0x162d   :  { %v7431_v35 = vpop.permute.xlu1 %7430 }
0x162e   :  { %v7455_v31 = vand.u32 4294901760, %v7431_v35 }
0x1630   :  { %v14093_v37 = vsub.f32 %v7431_v35, %v7455_v31 }
0x1631   :  { %v6795_v39 = vpop.permute.xlu0 %6794  ;;  %v7435_v62 = vpop.permute.xlu1 %7434 }
0x1632   :  { %v6822_v53 = vand.u32 4294901760, %v6795_v39  ;;  %v7461_v12 = vand.u32 4294901760, %v7435_v62  ;;  %v7566_v29 = vand.u32 4294901760, %v14093_v37 }
0x1634   :  { %v14086_v58 = vsub.f32 %v6795_v39, %v6822_v53  ;;  %v14119_v46 = vsub.f32 %v7435_v62, %v7461_v12  ;;  %v14124_v15 = vpack.c.bf16 %v6822_v53, %v6819_v60  ;;  %v6914_v60 = vsub.f32 %v14089_v36, %v6913_v38 }
0x1635   :  { %v6791_v59 = vpop.permute.xlu0 %6790  ;;  %v7567_v50 = vsub.f32 %v14093_v37, %v7566_v29  ;;  %v7536_v53 = vsub.f32 %v14103_v42, %v7535_v52  ;;  %v7555_v62 = vand.u32 4294901760, %v14137_v33 }
0x1636   :  { %v6945_v11 = vand.u32 4294901760, %v14086_v58  ;;  %v6816_v51 = vand.u32 4294901760, %v6791_v59  ;;  %v6915_v41 = vand.u32 4294901760, %v6914_v60 }
0x1637   :  { %v7537_v56 = vand.u32 4294901760, %v7536_v53  ;;  %v7556_v60 = vsub.f32 %v14137_v33, %v7555_v62  ;;  %v11955_v53 = vpack.c.bf16 %v14086_v58, %v14071_v22  ;;  %v8071_v22 = vld [vmem:[#allocation7 + $0x150] sm:$0xff] }
0x1638   :  { %v14110_v43 = vpack.c.bf16 %v6816_v51, %v6813_v3  ;;  %v14112_v18 = vsub.f32 %v6791_v59, %v6816_v51  ;;  %v6946_v45 = vsub.f32 %v14086_v58, %v6945_v11  ;;  %v7580_v3 = vand.u32 4294901760, %v14119_v46 }
0x1639   :  { %v7433_v5 = vpop.permute.xlu0 %7432 }
0x163a   :  { %v6931_v24 = vand.u32 4294901760, %v14112_v18  ;;  %v7458_v54 = vand.u32 4294901760, %v7433_v5  ;;  %11936 = vmatprep.subr.bf16.mxu0 %v14110_v43  ;;  %v6947_v39 = vand.u32 4294901760, %v6946_v45  ;;  %v7581_v45 = vsub.f32 %v14119_v46, %v7580_v3 }
0x163b   :  { %11938 = vmatpush3.bf16.msra.mxu0 %v14110_v43 }
0x163c   :  { %v6932_v34 = vsub.f32 %v14112_v18, %v6931_v24  ;;  %v14142_v47 = vpack.c.bf16 %v7458_v54, %v7455_v31  ;;  %v14144_v0 = vsub.f32 %v7433_v5, %v7458_v54  ;;  %11940 = vmatprep.subr.bf16.mxu0 %v14124_v15  ;;  %v7568_v5 = vand.u32 4294901760, %v7567_v50 }
0x163d   :  { %v7437_v35 = vpop.permute.xlu0 %7436 }
0x163e   :  { %v7573_v21 = vand.u32 4294901760, %v14144_v0  ;;  %v7464_v13 = vand.u32 4294901760, %v7437_v35  ;;  %11984 = vmatprep.subr.bf16.mxu1 %v14142_v47  ;;  %v6933_v31 = vand.u32 4294901760, %v6932_v34 }
0x163f   :  { %11942 = vmatpush3.bf16.msra.mxu0 %v14124_v15  ;;  %11986 = vmatpush3.bf16.msra.mxu1 %v14142_v47 }
0x1640   :  { %v7574_v4 = vsub.f32 %v14144_v0, %v7573_v21  ;;  %v14166_v7 = vpack.c.bf16 %v7464_v13, %v7461_v12  ;;  %v14168_v59 = vsub.f32 %v7437_v35, %v7464_v13  ;;  %v11943_v51 = vpack.c.bf16 %v6933_v31, %v6926_v30 }
0x1641   :  { %v11947_v12 = vpack.c.bf16 %v6947_v39, %v6940_v25  ;;  %v11951_v30 = vpack.c.bf16 %v14112_v18, %v14076_v32  ;;  %v7582_v13 = vand.u32 4294901760, %v7581_v45  ;;  %v7557_v39 = vand.u32 4294901760, %v7556_v60  ;;  %v8075_v18 = vld [vmem:[#allocation7 + $0x170] sm:$0xff] }
0x1642   :  { %v7587_v54 = vand.u32 4294901760, %v14168_v59  ;;  %11224 = vmatmul.mubr.f32.vlgmr.msra.gmra.mrb[16].mxu0 %v6895_v10  ;;  %11944 = vmatprep.subr.bf16.mxu0 %v11943_v51  ;;  %v7575_v34 = vand.u32 4294901760, %v7574_v4  ;;  %v7547_v10 = vand.u32 4294901760, %v7546_v63  ;;  %v11999_v4 = vpack.c.bf16 %v14144_v0, %v14093_v37 }
0x1643   :  { %11988 = vmatprep.subr.bf16.mxu1 %v14166_v7  ;;  %11946 = vmatpush3.bf16.msra.mxu0 %v11943_v51  ;;  %v12003_v51 = vpack.c.bf16 %v14168_v59, %v14119_v46  ;;  %v11971_v32 = vpack.c.bf16 %v6945_v11, %v6938_v48 }
0x1644   :  { %v7588_v50 = vsub.f32 %v14168_v59, %v7587_v54  ;;  %11990 = vmatpush3.bf16.msra.mxu1 %v14166_v7  ;;  %11948 = vmatprep.subr.bf16.mxu0 %v11947_v12  ;;  %v11991_v35 = vpack.c.bf16 %v7575_v34, %v7568_v5 }
0x1645   :  { %11226 = vmatprep.mubr.f32.mxu0 %v6905_v8  ;;  %v11967_v8 = vpack.c.bf16 %v6931_v24, %v6924_v26  ;;  %v12015_v26 = vpack.c.bf16 %v7573_v21, %v7566_v29 }
0x1646   :  { %11227 = vmatmul.mubr.f32.gmra.mrb[18].mxu0 %v6915_v41  ;;  %11992 = vmatprep.subr.bf16.mxu1 %v11991_v35  ;;  %v7589_v31 = vand.u32 4294901760, %v7588_v50 }
0x1647   :  { %11308 = vmatmul.mubr.f32.vlgmr.msra.gmra.mrb[16].mxu1 %v7537_v56  ;;  %11950 = vmatpush3.bf16.msra.mxu0 %v11947_v12 }
0x1648   :  { %11994 = vmatpush3.bf16.msra.mxu1 %v11991_v35  ;;  %11952 = vmatprep.subr.bf16.mxu0 %v11951_v30  ;;  %v11995_v25 = vpack.c.bf16 %v7589_v31, %v7582_v13 }
0x1649   :  { %11237 = vmatprep.mubr.f32.mxu0 %v14037_v1  ;;  %11310 = vmatprep.mubr.f32.mxu1 %v7547_v10 }
0x164a   :  { %11238 = vmatmul.mubr.f32.vlgmr.msra.gmra.mrb[16].mxu0 %v14062_v49  ;;  %11996 = vmatprep.subr.bf16.mxu1 %v11995_v25 }
0x164b   :  { %11311 = vmatmul.mubr.f32.gmra.mrb[18].mxu1 %v7557_v39  ;;  %11954 = vmatpush3.bf16.msra.mxu0 %v11951_v30 }
0x164c   :  { %11998 = vmatpush3.bf16.msra.mxu1 %v11995_v25  ;;  %11956 = vmatprep.subr.bf16.mxu0 %v11955_v53 }
0x164d   :  { %12000 = vmatprep.subr.bf16.mxu1 %v11999_v4  ;;  %11240 = vmatprep.mubr.f32.mxu0 %v14069_v9 }
0x164e   :  { %11321 = vmatprep.mubr.f32.mxu1 %v14046_v57  ;;  %11241 = vmatmul.mubr.f32.gmra.mrb[18].mxu0 %v14073_v2 }
0x164f   :  { %11322 = vmatmul.mubr.f32.vlgmr.msra.gmra.mrb[16].mxu1 %v14083_v61  ;;  %11958 = vmatpush3.bf16.msra.mxu0 %v11955_v53 }
0x1650   :  { %12002 = vmatpush3.bf16.msra.mxu1 %v11999_v4  ;;  %11960 = vmatprep.subr.bf16.mxu0 %v14110_v43 }
0x1651   :  { %12004 = vmatprep.subr.bf16.mxu1 %v12003_v51  ;;  %11251 = vmatprep.mubr.f32.mxu0 %v14040_v28  ;;  %v12019_v28 = vpack.c.bf16 %v7587_v54, %v7580_v3 }
0x1652   :  { %11324 = vmatprep.mubr.f32.mxu1 %v14095_v23  ;;  %11252 = vmatmul.mubr.f32.vlgmr.msra.gmra.mrb[16].mxu0 %v14067_v27 }
0x1653   :  { %11325 = vmatmul.mubr.f32.gmra.mrb[18].mxu1 %v14105_v16  ;;  %11962 = vmatpush3.bf16.msra.mxu0 %v14110_v43 }
0x1654   :  { %12006 = vmatpush3.bf16.msra.mxu1 %v12003_v51  ;;  %11964 = vmatprep.subr.bf16.mxu0 %v14124_v15 }
0x1655   :  { %12008 = vmatprep.subr.bf16.mxu1 %v14142_v47  ;;  %11254 = vmatprep.mubr.f32.mxu0 %v14081_v20 }
0x1656   :  { %11335 = vmatprep.mubr.f32.mxu1 %v14052_v40  ;;  %11255 = vmatmul.mubr.f32.gmra.mrb[18].mxu0 %v14089_v36 }
0x1657   :  { %11336 = vmatmul.mubr.f32.vlgmr.msra.gmra.mrb[16].mxu1 %v14103_v42  ;;  %11966 = vmatpush3.bf16.msra.mxu0 %v14124_v15 }
0x1658   :  { %12010 = vmatpush3.bf16.msra.mxu1 %v14142_v47  ;;  %11968 = vmatprep.subr.bf16.mxu0 %v11967_v8 }
0x1659   :  { %12012 = vmatprep.subr.bf16.mxu1 %v14166_v7  ;;  %11265 = vmatprep.mubr.f32.mxu0 %v6883_v17  ;;  %v8070_v17 = vld [vmem:[#allocation7 + $0x148] sm:$0xff] }
0x165a   :  { %11338 = vmatprep.mubr.f32.mxu1 %v14122_v14  ;;  %11266 = vmatmul.mubr.f32.vlgmr.msra.gmra.mrb[16].mxu0 %v6893_v44  ;;  %v8073_v44 = vld [vmem:[#allocation7 + $0x160] sm:$0xff] }
0x165b   :  { %11339 = vmatmul.mubr.f32.gmra.mrb[18].mxu1 %v14137_v33  ;;  %11970 = vmatpush3.bf16.msra.mxu0 %v11967_v8  ;;  %v8716_v48 = vand.u32 4294901760, %v8073_v44 }
0x165c   :  { %12014 = vmatpush3.bf16.msra.mxu1 %v14166_v7  ;;  %11972 = vmatprep.subr.bf16.mxu0 %v11971_v32 }
0x165d   :  { %12016 = vmatprep.subr.bf16.mxu1 %v12015_v26  ;;  %11268 = vmatprep.mubr.f32.mxu0 %v6903_v55  ;;  %v8826_v29 = vsub.f32 %v8073_v44, %v8716_v48 }
0x165e   :  { %11349 = vmatprep.mubr.f32.mxu1 %v7525_v6  ;;  %11269 = vmatmul.mubr.f32.gmra.mrb[18].mxu0 %v6913_v38  ;;  %v8093_v6 = vand.u32 4294901760, %v8070_v17  ;;  %v8076_v38 = vld [vmem:[#allocation7 + $0x178] sm:$0xff] }
0x165f   :  { %11350 = vmatmul.mubr.f32.vlgmr.msra.gmra.mrb[16].mxu1 %v7535_v52  ;;  %11974 = vmatpush3.bf16.msra.mxu0 %v11971_v32  ;;  %v8725_v24 = vand.u32 4294901760, %v8076_v38  ;;  %v8827_v0 = vand.u32 4294901760, %v8826_v29 }
0x1660   :  { %12018 = vmatpush3.bf16.msra.mxu1 %v12015_v26  ;;  %11976 = vmatprep.subr.bf16.mxu0 %v14110_v43 }
0x1661   :  { %12020 = vmatprep.subr.bf16.mxu1 %v12019_v28  ;;  %11279 = vmatprep.mubr.f32.mxu0 %v14037_v1  ;;  %v8828_v5 = vsub.f32 %v8826_v29, %v8827_v0 }
0x1662   :  { %11352 = vmatprep.mubr.f32.mxu1 %v7545_v19  ;;  %11280 = vmatmul.mubr.f32.vlgmr.msra.gmra.mrb[16].mxu0 %v14062_v49 }
0x1663   :  { %11353 = vmatmul.mubr.f32.gmra.mrb[18].mxu1 %v7555_v62  ;;  %11978 = vmatpush3.bf16.msra.mxu0 %v14110_v43  ;;  %v8829_v56 = vand.u32 4294901760, %v8828_v5 }
0x1664   :  { %12022 = vmatpush3.bf16.msra.mxu1 %v12019_v28  ;;  %11980 = vmatprep.subr.bf16.mxu0 %v14124_v15 }
0x1665   :  { %12024 = vmatprep.subr.bf16.mxu1 %v14142_v47  ;;  %11282 = vmatprep.mubr.f32.mxu0 %v14069_v9 }
0x1666   :  { %11363 = vmatprep.mubr.f32.mxu1 %v14046_v57  ;;  %11283 = vmatmul.mubr.f32.gmra.mrb[18].mxu0 %v14073_v2 }
0x1667   :  { %11364 = vmatmul.mubr.f32.vlgmr.msra.gmra.mrb[16].mxu1 %v14083_v61  ;;  %11982 = vmatpush3.bf16.msra.mxu0 %v14124_v15  ;;  %v8722_v15 = vand.u32 4294901760, %v8075_v18 }
0x1668   :  { %12026 = vmatpush3.bf16.msra.mxu1 %v14142_v47  ;;  %11293 = vmatprep.mubr.f32.mxu0 %v14037_v1  ;;  %v8069_v1 = vld [vmem:[#allocation7 + $0x140] sm:$0xff] }
0x1669   :  { %12028 = vmatprep.subr.bf16.mxu1 %v14166_v7  ;;  %11366 = vmatprep.mubr.f32.mxu1 %v14095_v23  ;;  %v8090_v40 = vand.u32 4294901760, %v8069_v1  ;;  %v14293_v19 = vpack.c.bf16 %v8725_v24, %v8722_v15  ;;  %v8840_v62 = vsub.f32 %v8075_v18, %v8722_v15 }
0x166a   :  { %11294 = vmatmul.mubr.f32.vlgmr.msra.gmra.mrb[16].mxu0 %v14062_v49 }
0x166b   :  { %11367 = vmatmul.mubr.f32.gmra.mrb[18].mxu1 %v14105_v16  ;;  %11296 = vmatprep.mubr.f32.mxu0 %v14069_v9  ;;  %v14273_v49 = vpack.c.bf16 %v8093_v6, %v8090_v40  ;;  %v14275_v27 = vsub.f32 %v8069_v1, %v8090_v40  ;;  %v14277_v9 = vsub.f32 %v8070_v17, %v8093_v6  ;;  %v8841_v54 = vand.u32 4294901760, %v8840_v62 }
0x166c   :  { %12030 = vmatpush3.bf16.msra.mxu1 %v14166_v7  ;;  %11377 = vmatprep.mubr.f32.mxu1 %v14046_v57  ;;  %v8072_v57 = vld [vmem:[#allocation7 + $0x158] sm:$0xff]  ;;  %v8847_v7 = vsub.f32 %v8076_v38, %v8725_v24 }
0x166d   :  { %12032 = vmatprep.subr.bf16.mxu0 %v14273_v49  ;;  %v8099_v20 = vand.u32 4294901760, %v8072_v57  ;;  %v8201_v58 = vand.u32 4294901760, %v14275_v27  ;;  %v8208_v37 = vand.u32 4294901760, %v14277_v9  ;;  %v8842_v50 = vsub.f32 %v8840_v62, %v8841_v54 }
0x166e   :  { %11297 = vmatmul.mubr.f32.gmra.mrb[18].mxu0 %v14073_v2  ;;  %v8096_v2 = vand.u32 4294901760, %v8071_v22  ;;  %v8848_v12 = vand.u32 4294901760, %v8847_v7  ;;  %v14307_v39 = vpack.c.bf16 %v14277_v9, %v14275_v27  ;;  %v14315_v51 = vpack.c.bf16 %v8847_v7, %v8840_v62 }
0x166f   :  { %11378 = vmatmul.mubr.f32.vlgmr.msra.gmra.mrb[16].mxu1 %v14083_v61  ;;  %v8074_v61 = vld [vmem:[#allocation7 + $0x168] sm:$0xff]  ;;  %12034 = vmatpush3.bf16.msra.mxu0 %v14273_v49  ;;  %v8202_v11 = vsub.f32 %v14275_v27, %v8201_v58  ;;  %v8221_v42 = vsub.f32 %v8072_v57, %v8099_v20  ;;  %v8209_v43 = vsub.f32 %v14277_v9, %v8208_v37  ;;  %v8843_v13 = vand.u32 4294901760, %v8842_v50 }
0x1670   :  { %11380 = vmatprep.mubr.f32.mxu1 %v14095_v23  ;;  %v8719_v36 = vand.u32 4294901760, %v8074_v61  ;;  %v14283_v23 = vpack.c.bf16 %v8099_v20, %v8096_v2  ;;  %v8214_v55 = vsub.f32 %v8071_v22, %v8096_v2  ;;  %v8849_v35 = vsub.f32 %v8847_v7, %v8848_v12 }
0x1671   :  { %v8203_v14 = vand.u32 4294901760, %v8202_v11  ;;  %v8210_v33 = vand.u32 4294901760, %v8209_v43  ;;  %v8222_v47 = vand.u32 4294901760, %v8221_v42  ;;  %v14317_v8 = vpack.c.bf16 %v8208_v37, %v8201_v58 }
0x1672   :  { %v8833_v46 = vsub.f32 %v8074_v61, %v8719_v36  ;;  %12036 = vmatprep.subr.bf16.mxu0 %v14283_v23  ;;  %v8215_v52 = vand.u32 4294901760, %v8214_v55  ;;  %v8850_v31 = vand.u32 4294901760, %v8849_v35  ;;  %v14311_v53 = vpack.c.bf16 %v8221_v42, %v8214_v55 }
0x1673   :  { %11381 = vmatmul.mubr.f32.gmra.mrb[18].mxu1 %v14105_v16  ;;  %v14286_v16 = vpack.c.bf16 %v8719_v36, %v8716_v48  ;;  %12038 = vmatpush3.bf16.msra.mxu0 %v14283_v23  ;;  %v14295_v59 = vpack.c.bf16 %v8210_v33, %v8203_v14  ;;  %v8223_v41 = vsub.f32 %v8221_v42, %v8222_v47 }
0x1674   :  { %v8834_v3 = vand.u32 4294901760, %v8833_v46  ;;  %v8216_v21 = vsub.f32 %v8214_v55, %v8215_v52  ;;  %v14309_v25 = vpack.c.bf16 %v8850_v31, %v8843_v13  ;;  %v14313_v4 = vpack.c.bf16 %v8833_v46, %v8826_v29 }
0x1675   :  { %12080 = vmatprep.subr.bf16.mxu1 %v14286_v16  ;;  %12040 = vmatprep.subr.bf16.mxu0 %v14295_v59  ;;  %v8224_v34 = vand.u32 4294901760, %v8223_v41  ;;  %v14319_v32 = vpack.c.bf16 %v8222_v47, %v8215_v52  ;;  %v14323_v28 = vpack.c.bf16 %v8848_v12, %v8841_v54 }
0x1676   :  { %12082 = vmatpush3.bf16.msra.mxu1 %v14286_v16  ;;  %v8835_v63 = vsub.f32 %v8833_v46, %v8834_v3  ;;  %v8217_v45 = vand.u32 4294901760, %v8216_v21  ;;  %v14321_v26 = vpack.c.bf16 %v8834_v3, %v8827_v0 }
0x1677   :  { %12084 = vmatprep.subr.bf16.mxu1 %v14293_v19 }
0x1678   :  { %v8836_v60 = vand.u32 4294901760, %v8835_v63  ;;  %v14300_v10 = vpack.c.bf16 %v8224_v34, %v8217_v45 }
0x167a   :  { %12086 = vmatpush3.bf16.msra.mxu1 %v14293_v19  ;;  %v14302_v30 = vpack.c.bf16 %v8836_v60, %v8829_v56 }
0x167c   :  { %12088 = vmatprep.subr.bf16.mxu1 %v14302_v30 }
0x173d   :  { %v11295_v1 = vpop.f32.mrb[16].mxu0 }
0x173e   :  { %v8081_v17 = vsel %vm390_vm1, %v11295_v1, 0  ;;  %v7404_v40 = vpop.f32.mrb[17].mxu0 }
0x173f   :  { %v14326_v6 = vand.u32 4294901760, %v8081_v17  ;;  %v8078_v27 = vsel %vm390_vm1, %v7404_v40, 0 }
0x1740   :  { %v14329_v9 = vand.u32 4294901760, %v8078_v27 }
0x1741   :  { %v14332_v22 = vsub.f32 %v8081_v17, %v14326_v6  ;;  %v11298_v57 = vpop.f32.mrb[18].mxu0 }
0x1742   :  { %v14335_v44 = vsub.f32 %v8078_v27, %v14329_v9  ;;  %v8087_v2 = vsel %vm390_vm1, %v11298_v57, 0  ;;  %v11379_v20 = vpop.f32.mrb[16].mxu1  ;;  %v7416_v61 = vpop.f32.mrb[19].mxu0 }
0x1743   :  { %v8170_v48 = vand.u32 4294901760, %v14332_v22  ;;  %v14339_v58 = vand.u32 4294901760, %v8087_v2  ;;  %v8707_v36 = vsel %vm390_vm1, %v11379_v20, 0  ;;  %v8084_v37 = vsel %vm390_vm1, %v7416_v61, 0  ;;  %v8046_v11 = vpop.f32.mrb[17].mxu1 }
0x1744   :  { %v8160_v55 = vand.u32 4294901760, %v14335_v44  ;;  %v14344_v42 = vand.u32 4294901760, %v8707_v36  ;;  %v14346_v43 = vand.u32 4294901760, %v8084_v37  ;;  %v8704_v18 = vsel %vm390_vm1, %v8046_v11, 0 }
0x1745   :  { %v8171_v38 = vsub.f32 %v14332_v22, %v8170_v48  ;;  %v14353_v29 = vsub.f32 %v8087_v2, %v14339_v58  ;;  %v14355_v46 = vand.u32 4294901760, %v8704_v18 }
0x1746   :  { %v14358_v14 = vsub.f32 %v8707_v36, %v14344_v42  ;;  %v14361_v15 = vsub.f32 %v8084_v37, %v14346_v43  ;;  %v11382_v24 = vpop.f32.mrb[18].mxu1  ;;  %v8161_v52 = vsub.f32 %v14335_v44, %v8160_v55 }
0x1747   :  { %v8190_v33 = vand.u32 4294901760, %v14353_v29  ;;  %v14368_v47 = vsub.f32 %v8704_v18, %v14355_v46  ;;  %v8713_v0 = vsel %vm390_vm1, %v11382_v24, 0  ;;  %v8058_v3 = vpop.f32.mrb[19].mxu1  ;;  %v8172_v5 = vand.u32 4294901760, %v8171_v38 }
0x1748   :  { %v8796_v21 = vand.u32 4294901760, %v14358_v14  ;;  %v8180_v62 = vand.u32 4294901760, %v14361_v15  ;;  %v14373_v7 = vand.u32 4294901760, %v8713_v0  ;;  %v8710_v41 = vsel %vm390_vm1, %v8058_v3, 0 }
0x1749   :  { %v8786_v63 = vand.u32 4294901760, %v14368_v47  ;;  %v14377_v45 = vand.u32 4294901760, %v8710_v41  ;;  %v8162_v54 = vand.u32 4294901760, %v8161_v52  ;;  %v8191_v60 = vsub.f32 %v14353_v29, %v8190_v33 }
0x174a   :  { %v8797_v12 = vsub.f32 %v14358_v14, %v8796_v21  ;;  %v14383_v34 = vsub.f32 %v8713_v0, %v14373_v7  ;;  %v8181_v56 = vsub.f32 %v14361_v15, %v8180_v62  ;;  %v14538_v24 = vstv %s9965_s21 }
0x174b   :  { %v14392_v50 = vsub.f32 %v8710_v41, %v14377_v45  ;;  %11391 = vmatprep.mubr.f32.mxu0 %v8162_v54  ;;  %v8787_v35 = vsub.f32 %v14368_v47, %v8786_v63  ;;  %v8192_v27 = vand.u32 4294901760, %v8191_v60  ;;  %v14546_v0 = vstv %s9966_s22 }
0x174c   :  { %v8816_v13 = vand.u32 4294901760, %v14383_v34  ;;  %11392 = vmatmul.mubr.f32.vlgmr.msra.gmra.mrb[20].mxu0 %v8172_v5  ;;  %v8182_v31 = vand.u32 4294901760, %v8181_v56  ;;  %v8798_v40 = vand.u32 4294901760, %v8797_v12 }
0x174d   :  { %v8806_v1 = vand.u32 4294901760, %v14392_v50  ;;  %12042 = vmatpush3.bf16.msra.mxu0 %v14295_v59  ;;  %v8788_v17 = vand.u32 4294901760, %v8787_v35 }
0x174e   :  { %11394 = vmatprep.mubr.f32.mxu0 %v8182_v31  ;;  %12044 = vmatprep.subr.bf16.mxu0 %v14300_v10  ;;  %v8817_v57 = vsub.f32 %v14383_v34, %v8816_v13 }
0x174f   :  { %11475 = vmatprep.mubr.f32.mxu1 %v8788_v17  ;;  %v8807_v2 = vsub.f32 %v14392_v50, %v8806_v1 }
0x1750   :  { %11395 = vmatmul.mubr.f32.gmra.mrb[22].mxu0 %v8192_v27  ;;  %11476 = vmatmul.mubr.f32.vlgmr.msra.gmra.mrb[20].mxu1 %v8798_v40  ;;  %v8818_v20 = vand.u32 4294901760, %v8817_v57 }
0x1751   :  { %12046 = vmatpush3.bf16.msra.mxu0 %v14300_v10  ;;  %11405 = vmatprep.mubr.f32.mxu0 %v14329_v9  ;;  %v8808_v59 = vand.u32 4294901760, %v8807_v2 }
0x1752   :  { %12090 = vmatpush3.bf16.msra.mxu1 %v14302_v30  ;;  %12048 = vmatprep.subr.bf16.mxu0 %v14307_v39 }
0x1753   :  { %11478 = vmatprep.mubr.f32.mxu1 %v8808_v59  ;;  %12092 = vmatprep.subr.bf16.mxu1 %v14309_v25 }
0x1754   :  { %11406 = vmatmul.mubr.f32.vlgmr.msra.gmra.mrb[20].mxu0 %v14326_v6  ;;  %11479 = vmatmul.mubr.f32.gmra.mrb[22].mxu1 %v8818_v20 }
0x1755   :  { %11408 = vmatprep.mubr.f32.mxu0 %v14346_v43  ;;  %12050 = vmatpush3.bf16.msra.mxu0 %v14307_v39 }
0x1756   :  { %12094 = vmatpush3.bf16.msra.mxu1 %v14309_v25  ;;  %11489 = vmatprep.mubr.f32.mxu1 %v14355_v46 }
0x1757   :  { %12052 = vmatprep.subr.bf16.mxu0 %v14311_v53  ;;  %12096 = vmatprep.subr.bf16.mxu1 %v14313_v4 }
0x1758   :  { %11409 = vmatmul.mubr.f32.gmra.mrb[22].mxu0 %v14339_v58 }
0x1759   :  { %11490 = vmatmul.mubr.f32.vlgmr.msra.gmra.mrb[20].mxu1 %v14344_v42  ;;  %12054 = vmatpush3.bf16.msra.mxu0 %v14311_v53 }
0x175a   :  { %11419 = vmatprep.mubr.f32.mxu0 %v14335_v44  ;;  %11492 = vmatprep.mubr.f32.mxu1 %v14377_v45 }
0x175b   :  { %12098 = vmatpush3.bf16.msra.mxu1 %v14313_v4  ;;  %12056 = vmatprep.subr.bf16.mxu0 %v14273_v49 }
0x175c   :  { %11420 = vmatmul.mubr.f32.vlgmr.msra.gmra.mrb[20].mxu0 %v14332_v22  ;;  %12100 = vmatprep.subr.bf16.mxu1 %v14315_v51 }
0x175d   :  { %11493 = vmatmul.mubr.f32.gmra.mrb[22].mxu1 %v14373_v7  ;;  %11422 = vmatprep.mubr.f32.mxu0 %v14361_v15 }
0x175e   :  { %12058 = vmatpush3.bf16.msra.mxu0 %v14273_v49  ;;  %11503 = vmatprep.mubr.f32.mxu1 %v14368_v47 }
0x175f   :  { %12102 = vmatpush3.bf16.msra.mxu1 %v14315_v51  ;;  %12060 = vmatprep.subr.bf16.mxu0 %v14283_v23 }
0x1760   :  { %11423 = vmatmul.mubr.f32.gmra.mrb[22].mxu0 %v14353_v29  ;;  %12104 = vmatprep.subr.bf16.mxu1 %v14286_v16 }
0x1761   :  { %11433 = vmatprep.mubr.f32.mxu0 %v8160_v55 }
0x1762   :  { %11504 = vmatmul.mubr.f32.vlgmr.msra.gmra.mrb[20].mxu1 %v14358_v14  ;;  %12062 = vmatpush3.bf16.msra.mxu0 %v14283_v23 }
0x1763   :  { %11506 = vmatprep.mubr.f32.mxu1 %v14392_v50  ;;  %12106 = vmatpush3.bf16.msra.mxu1 %v14286_v16 }
0x1764   :  { %12064 = vmatprep.subr.bf16.mxu0 %v14317_v8  ;;  %12108 = vmatprep.subr.bf16.mxu1 %v14293_v19 }
0x1765   :  { %11434 = vmatmul.mubr.f32.vlgmr.msra.gmra.mrb[20].mxu0 %v8170_v48 }
0x1766   :  { %11507 = vmatmul.mubr.f32.gmra.mrb[22].mxu1 %v14383_v34  ;;  %11436 = vmatprep.mubr.f32.mxu0 %v8180_v62 }
0x1767   :  { %12066 = vmatpush3.bf16.msra.mxu0 %v14317_v8  ;;  %12110 = vmatpush3.bf16.msra.mxu1 %v14293_v19 }
0x1768   :  { %11517 = vmatprep.mubr.f32.mxu1 %v8786_v63  ;;  %12068 = vmatprep.subr.bf16.mxu0 %v14319_v32  ;;  %v9436_v63 = vstv %s9962_s23 }
0x1769   :  { %11437 = vmatmul.mubr.f32.gmra.mrb[22].mxu0 %v8190_v33  ;;  %12112 = vmatprep.subr.bf16.mxu1 %v14321_v26 }
0x176a   :  { %11518 = vmatmul.mubr.f32.vlgmr.msra.gmra.mrb[20].mxu1 %v8796_v21  ;;  %11447 = vmatprep.mubr.f32.mxu0 %v14329_v9 }
0x176b   :  { %12070 = vmatpush3.bf16.msra.mxu0 %v14319_v32  ;;  %11520 = vmatprep.mubr.f32.mxu1 %v8806_v1  ;;  %v9464_v32 = vstv %s9964_s18 }
0x176c   :  { %12114 = vmatpush3.bf16.msra.mxu1 %v14321_v26  ;;  %12072 = vmatprep.subr.bf16.mxu0 %v14273_v49 }
0x176d   :  { %12116 = vmatprep.subr.bf16.mxu1 %v14323_v28 }
0x176e   :  { %11448 = vmatmul.mubr.f32.vlgmr.msra.gmra.mrb[20].mxu0 %v14326_v6  ;;  %11521 = vmatmul.mubr.f32.gmra.mrb[22].mxu1 %v8816_v13 }
0x176f   :  { %11450 = vmatprep.mubr.f32.mxu0 %v14346_v43  ;;  %12074 = vmatpush3.bf16.msra.mxu0 %v14273_v49 }
0x1770   :  { %12118 = vmatpush3.bf16.msra.mxu1 %v14323_v28  ;;  %11531 = vmatprep.mubr.f32.mxu1 %v14355_v46 }
0x1771   :  { %12076 = vmatprep.subr.bf16.mxu0 %v14283_v23  ;;  %12120 = vmatprep.subr.bf16.mxu1 %v14286_v16 }
0x1772   :  { %11451 = vmatmul.mubr.f32.gmra.mrb[22].mxu0 %v14339_v58 }
0x1773   :  { %11532 = vmatmul.mubr.f32.vlgmr.msra.gmra.mrb[20].mxu1 %v14344_v42  ;;  %12078 = vmatpush3.bf16.msra.mxu0 %v14283_v23 }
0x1774   :  { %11461 = vmatprep.mubr.f32.mxu0 %v14329_v9  ;;  %11534 = vmatprep.mubr.f32.mxu1 %v14377_v45 }
0x1775   :  { %12122 = vmatpush3.bf16.msra.mxu1 %v14286_v16 }
0x1776   :  { %11462 = vmatmul.mubr.f32.vlgmr.msra.gmra.mrb[20].mxu0 %v14326_v6  ;;  %12124 = vmatprep.subr.bf16.mxu1 %v14293_v19 }
0x1777   :  { %11535 = vmatmul.mubr.f32.gmra.mrb[22].mxu1 %v14373_v7  ;;  %11464 = vmatprep.mubr.f32.mxu0 %v14346_v43 }
0x1778   :  { %11545 = vmatprep.mubr.f32.mxu1 %v14355_v46  ;;  %v9416_v46 = vstv %s9960_s3 }
0x1779   :  { %12126 = vmatpush3.bf16.msra.mxu1 %v14293_v19 }
0x177a   :  { %11465 = vmatmul.mubr.f32.gmra.mrb[22].mxu0 %v14339_v58 }
0x177c   :  { %11546 = vmatmul.mubr.f32.vlgmr.msra.gmra.mrb[20].mxu1 %v14344_v42 }
0x177d   :  { %11548 = vmatprep.mubr.f32.mxu1 %v14377_v45 }
0x1780   :  { %11549 = vmatmul.mubr.f32.gmra.mrb[22].mxu1 %v14373_v7 }
0x1849   :  { %v11463_v49 = vpop.f32.mrb[20].mxu0 }
0x184a   :  { %9339 = vrot.lane.b32.xlu0 %v11463_v49, %s12506_s25  ;;  %v8681_v23 = vpop.f32.mrb[21].mxu0 }
0x184b   :  { %9337 = vrot.lane.b32.xlu1 %v8681_v23, %s12506_s25 }
0x184d   :  { %v11466_v16 = vpop.f32.mrb[22].mxu0 }
0x184e   :  { %v8693_v10 = vpop.f32.mrb[23].mxu0 }
0x184f   :  { %v11547_v30 = vpop.f32.mrb[20].mxu1 }
0x1850   :  { %9347 = vrot.lane.b32.xlu0 %v11547_v30, %s12506_s25  ;;  %v9307_v19 = vpop.f32.mrb[21].mxu1 }
0x1851   :  { %9345 = vrot.lane.b32.xlu1 %v9307_v19, %s12506_s25 }
0x1853   :  { %v11550_v39 = vpop.f32.mrb[22].mxu1 }
0x1854   :  { %9343 = vrot.lane.b32.xlu0 %v11466_v16, %s12506_s25  ;;  %v9319_v25 = vpop.f32.mrb[23].mxu1 }
0x1855   :  { %9341 = vrot.lane.b32.xlu1 %v8693_v10, %s12506_s25 }
0x1858   :  { %9351 = vrot.lane.b32.xlu0 %v11550_v39, %s12506_s25 }
0x1859   :  { %9349 = vrot.lane.b32.xlu1 %v9319_v25, %s12506_s25 }
0x18bc   :  { %v9340_v53 = vpop.permute.xlu0 %9339 }
0x18bd   :  { %9362 = vst.msk [vmem:[#allocation2 + $0x10] sm:$0xff] %vm2952_vm2, %v9340_v53  ;;  %v9338_v4 = vpop.permute.xlu1 %9337 }
0x18be   :  { %9361 = vst.msk [vmem:[#allocation2 + $0x8] sm:$0xff] %vm2952_vm2, %v9338_v4 }
0x18c2   :  { %v9348_v51 = vpop.permute.xlu0 %9347 }
0x18c3   :  { %9366 = vst.msk [vmem:[#allocation2 + $0x40] sm:$0xff] %vm2952_vm2, %v9348_v51  ;;  %v9346_v8 = vpop.permute.xlu1 %9345 }
0x18c4   :  { %9365 = vst.msk [vmem:[#allocation2 + $0x38] sm:$0xff] %vm2952_vm2, %v9346_v8  ;;  %v14559_v5 = vld [vmem:[#allocation2 + $0x10] sm:$0xff] }
0x18c5   :  { %v14503_v26 = vld [vmem:[#allocation2 + $0x9] sm:$0xff]  ;;  %v9418_v45 = vmul.f32 %v9416_v46, %v14559_v5  ;;  %v9438_v27 = vmul.f32 %v9436_v63, %v14559_v5 }
0x18c6   :  { %v9344_v28 = vpop.permute.xlu0 %9343  ;;  %v9465_v6 = vmul.f32 %v9464_v32, %v14503_v26  ;;  %v14532_v29 = vld [vmem:[#allocation2 + $0x8] sm:$0xff] }
0x18c7   :  { %9364 = vst.msk [vmem:[#allocation2 + $0x20] sm:$0xff] %vm2952_vm2, %v9344_v28  ;;  %v9342_v9 = vpop.permute.xlu1 %9341  ;;  %v9417_v52 = vmul.f32 %v9416_v46, %v14532_v29  ;;  %v9437_v54 = vmul.f32 %v9436_v63, %v14532_v29 }
0x18c8   :  { %9363 = vst.msk [vmem:[#allocation2 + $0x18] sm:$0xff] %vm2952_vm2, %v9342_v9  ;;  %9621 = vrot.lane.b32.xlu1 %v9465_v6, %s12508_s29 }
0x18ca   :  { %v9352_v22 = vpop.permute.xlu0 %9351  ;;  %v14571_v60 = vld [vmem:[#allocation2 + $0x40] sm:$0xff] }
0x18cb   :  { %9368 = vst.msk [vmem:[#allocation2 + $0x50] sm:$0xff] %vm2952_vm2, %v9352_v22  ;;  %v9350_v44 = vpop.permute.xlu1 %9349  ;;  %v14510_v61 = vld [vmem:[#allocation2 + $0x39] sm:$0xff]  ;;  %v9422_v35 = vmul.f32 %v9416_v46, %v14571_v60  ;;  %v9442_v20 = vmul.f32 %v9436_v63, %v14571_v60 }
0x18cc   :  { %9367 = vst.msk [vmem:[#allocation2 + $0x48] sm:$0xff] %vm2952_vm2, %v9350_v44  ;;  %v9469_v48 = vmul.f32 %v9464_v32, %v14510_v61  ;;  %v14544_v47 = vld [vmem:[#allocation2 + $0x38] sm:$0xff] }
0x18cd   :  { %v9421_v41 = vmul.f32 %v9416_v46, %v14544_v47  ;;  %v9441_v56 = vmul.f32 %v9436_v63, %v14544_v47 }
0x18ce   :  { %9629 = vrot.lane.b32.xlu1 %v9469_v48, %s12508_s29  ;;  %v14515_v58 = vld [vmem:[#allocation2 + $0x21] sm:$0xff] }
0x18cf   :  { %v9468_v36 = vmul.f32 %v9464_v32, %v14515_v58  ;;  %v14518_v37 = vld [vmem:[#allocation2 + $0x19] sm:$0xff]  ;;  %v14521_v55 = vld [vmem:[#allocation2 + $0x11] sm:$0xff]  ;;  %v14610_v48 = vld [vmem:[#allocation2 + $0x7] sm:$0xff] }
0x18d0   :  { %v9467_v11 = vmul.f32 %v9464_v32, %v14518_v37  ;;  %v9466_v42 = vmul.f32 %v9464_v32, %v14521_v55  ;;  %v14565_v12 = vld [vmem:[#allocation2 + $0x20] sm:$0xff]  ;;  %v14574_v50 = vld [vmem:[#allocation2 + $0x18] sm:$0xff] }
0x18d1   :  { %9627 = vrot.lane.b32.xlu0 %v9468_v36, %s12508_s29  ;;  %v9420_v34 = vmul.f32 %v9416_v46, %v14565_v12  ;;  %v9419_v13 = vmul.f32 %v9416_v46, %v14574_v50  ;;  %v9439_v57 = vmul.f32 %v9436_v63, %v14574_v50  ;;  %v9440_v2 = vmul.f32 %v9436_v63, %v14565_v12 }
0x18d2   :  { %9625 = vrot.lane.b32.xlu1 %v9467_v11, %s12508_s29  ;;  %v14535_v14 = vld [vmem:[#allocation2 + $0x51] sm:$0xff]  ;;  %v9388_v36 = vstv %s9958_s24 }
0x18d3   :  { %v14526_v43 = vld [vmem:[#allocation2 + $0x49] sm:$0xff]  ;;  %v14529_v38 = vld [vmem:[#allocation2 + $0x41] sm:$0xff]  ;;  %v9482_v3 = vmul.f32 %v14538_v24, %v14535_v14  ;;  %v9472_v62 = vmul.f32 %v9464_v32, %v14535_v14 }
0x18d4   :  { %v9471_v18 = vmul.f32 %v9464_v32, %v14526_v43  ;;  %v9470_v15 = vmul.f32 %v9464_v32, %v14529_v38  ;;  %v9481_v33 = vmul.f32 %v14538_v24, %v14526_v43  ;;  %v14579_v31 = vld [vmem:[#allocation2 + $0x50] sm:$0xff]  ;;  %v14582_v1 = vld [vmem:[#allocation2 + $0x48] sm:$0xff] }
0x18d5   :  { %9623 = vrot.lane.b32.xlu0 %v9466_v42, %s12508_s29  ;;  %v14556_v7 = vadd.f32 %v14546_v0, %v9482_v3  ;;  %v9424_v17 = vmul.f32 %v9416_v46, %v14579_v31  ;;  %v9423_v40 = vmul.f32 %v9416_v46, %v14582_v1  ;;  %v9443_v59 = vmul.f32 %v9436_v63, %v14582_v1 }
0x18d6   :  { %9633 = vrot.lane.b32.xlu1 %v9471_v18, %s12508_s29  ;;  %v14552_v21 = vadd.f32 %v14546_v0, %v9481_v33  ;;  %v9444_v49 = vmul.f32 %v9436_v63, %v14579_v31  ;;  %v9389_v18 = vmul.f32 %v9388_v36, %v14610_v48  ;;  %v14618_v3 = vstv %s9961_s26  ;;  %v14622_v63 = vld [vmem:[#allocation2 + $0x37] sm:$0xff] }
0x18d9   :  { %9631 = vrot.lane.b32.xlu0 %v9470_v15, %s12508_s29  ;;  %v14615_v15 = vld [vmem:[#allocation2 + $0x17] sm:$0xff] }
0x18da   :  { %9541 = vrot.lane.b32.xlu1 %v9417_v52, %s12509_s30 }
0x18dd   :  { %9635 = vrot.lane.b32.xlu0 %v9472_v62, %s12508_s29  ;;  %v9391_v62 = vmul.f32 %v9388_v36, %v14615_v15 }
0x18de   :  { %9549 = vrot.lane.b32.xlu1 %v9421_v41, %s12509_s30 }
0x18e1   :  { %9543 = vrot.lane.b32.xlu0 %v9418_v45, %s12509_s30 }
0x18e2   :  { %9581 = vrot.lane.b32.xlu1 %v9437_v54, %s12508_s29 }
0x18e5   :  { %9547 = vrot.lane.b32.xlu0 %v9420_v34, %s12509_s30  ;;  %v9393_v34 = vmul.f32 %v9388_v36, %v14622_v63 }
0x18e6   :  { %9589 = vrot.lane.b32.xlu1 %v9441_v56, %s12508_s29 }
0x18e9   :  { %9551 = vrot.lane.b32.xlu0 %v9422_v35, %s12509_s30 }
0x18ea   :  { %9545 = vrot.lane.b32.xlu1 %v9419_v13, %s12509_s30  ;;  %v14633_v13 = vld [vmem:[#allocation2 + $0x47] sm:$0xff] }
0x18ed   :  { %9555 = vrot.lane.b32.xlu0 %v9424_v17, %s12509_s30  ;;  %v9431_v17 = vmul.f32 %v14618_v3, %v14544_v47 }
0x18ee   :  { %9553 = vrot.lane.b32.xlu1 %v9423_v40, %s12509_s30  ;;  %s9963_s30 = sld [smem:[#allocation3 + $0x1a]] }
0x18f1   :  { %9583 = vrot.lane.b32.xlu0 %v9438_v27, %s12508_s29  ;;  %v9398_v27 = vstv %s9959_s4 }
0x18f2   :  { %9585 = vrot.lane.b32.xlu1 %v9439_v57, %s12508_s29  ;;  %v14638_v57 = vld [vmem:[#allocation2 + $0xf] sm:$0xff]  ;;  %v9403_v47 = vmul.f32 %v9398_v27, %v14622_v63 }
0x18f4   :  { %v9454_v23 = vstv %s9963_s30 }
0x18f5   :  { %9587 = vrot.lane.b32.xlu0 %v9440_v2, %s12508_s29  ;;  %v9455_v16 = vmul.f32 %v9454_v23, %v14503_v26  ;;  %v9459_v19 = vmul.f32 %v9454_v23, %v14510_v61  ;;  %v9458_v53 = vmul.f32 %v9454_v23, %v14515_v58  ;;  %v9457_v51 = vmul.f32 %v9454_v23, %v14518_v37 }
0x18f6   :  { %9593 = vrot.lane.b32.xlu1 %v9443_v59, %s12508_s29  ;;  %v9461_v9 = vmul.f32 %v9454_v23, %v14526_v43  ;;  %v9462_v46 = vmul.f32 %v9454_v23, %v14535_v14  ;;  %v9456_v41 = vmul.f32 %v9454_v23, %v14521_v55  ;;  %v9427_v14 = vmul.f32 %v14618_v3, %v14532_v29 }
0x18f7   :  { %v9460_v35 = vmul.f32 %v9454_v23, %v14529_v38  ;;  %v9395_v59 = vmul.f32 %v9388_v36, %v14633_v13 }
0x18f9   :  { %9591 = vrot.lane.b32.xlu0 %v9442_v20, %s12508_s29  ;;  %v9399_v20 = vmul.f32 %v9398_v27, %v14610_v48 }
0x18fd   :  { %9595 = vrot.lane.b32.xlu0 %v9444_v49, %s12508_s29  ;;  %v9390_v49 = vmul.f32 %v9388_v36, %v14638_v57 }
0x193a   :  { %v9622_v10 = vpop.permute.xlu1 %9621 }
0x193b   :  { %v9645_v30 = vadd.f32 %v9622_v10, %v9455_v16  ;;  %v14647_v16 = vld [vmem:[#allocation2 + $0x1f] sm:$0xff] }
0x193c   :  { %v9392_v10 = vmul.f32 %v9388_v36, %v14647_v16 }
0x193d   :  { %9701 = vrot.lane.b32.xlu1 %v9645_v30, %s12506_s25 }
0x1940   :  { %v9630_v39 = vpop.permute.xlu1 %9629 }
0x1941   :  { %v9649_v25 = vadd.f32 %v9630_v39, %v9459_v19  ;;  %v14653_v19 = vld [vmem:[#allocation2 + $0x3f] sm:$0xff]  ;;  %v9475_v39 = vmul.f32 %v14538_v24, %v14503_v26 }
0x1943   :  { %v9628_v4 = vpop.permute.xlu0 %9627  ;;  %9709 = vrot.lane.b32.xlu1 %v9649_v25, %s12506_s25 }
0x1944   :  { %v9648_v8 = vadd.f32 %v9628_v4, %v9458_v53  ;;  %v9626_v32 = vpop.permute.xlu1 %9625  ;;  %v9394_v53 = vmul.f32 %v9388_v36, %v14653_v19  ;;  %v14660_v4 = vld [vmem:[#allocation2 + $0x4f] sm:$0xff] }
0x1945   :  { %v9647_v28 = vadd.f32 %v9626_v32, %v9457_v51  ;;  %v9485_v51 = vadd.f32 %v14546_v0, %v9475_v39  ;;  %v9396_v26 = vmul.f32 %v9388_v36, %v14660_v4 }
0x1946   :  { %9707 = vrot.lane.b32.xlu0 %v9648_v8, %s12506_s25  ;;  %v9477_v8 = vmul.f32 %v14538_v24, %v14518_v37 }
0x1947   :  { %v9624_v6 = vpop.permute.xlu0 %9623  ;;  %9705 = vrot.lane.b32.xlu1 %v9647_v28, %s12506_s25 }
0x1948   :  { %v9634_v22 = vpop.permute.xlu1 %9633  ;;  %v9646_v45 = vadd.f32 %v9624_v6, %v9456_v41  ;;  %v9487_v28 = vadd.f32 %v14546_v0, %v9477_v8  ;;  %v9479_v6 = vmul.f32 %v14538_v24, %v14510_v61 }
0x1949   :  { %v9651_v44 = vadd.f32 %v9634_v22, %v9461_v9  ;;  %v9400_v9 = vmul.f32 %v9398_v27, %v14638_v57 }
0x194b   :  { %v9632_v11 = vpop.permute.xlu0 %9631  ;;  %9713 = vrot.lane.b32.xlu1 %v9651_v44, %s12506_s25  ;;  %v9489_v44 = vadd.f32 %v14546_v0, %v9479_v6 }
0x194c   :  { %v9542_v42 = vpop.permute.xlu1 %9541  ;;  %v9650_v40 = vadd.f32 %v9632_v11, %v9460_v35  ;;  %v9402_v11 = vmul.f32 %v9398_v27, %v14647_v16  ;;  %v9478_v35 = vmul.f32 %v14538_v24, %v14515_v58 }
0x194d   :  { %v9565_v23 = vadd.f32 %v9542_v42, %v9399_v20  ;;  %v9401_v42 = vmul.f32 %v9398_v27, %v14615_v15 }
0x194f   :  { %v9636_v52 = vpop.permute.xlu0 %9635  ;;  %9501 = vrot.lane.b32.xlu1 %v9389_v18, %s12508_s29 }
0x1950   :  { %v9652_v43 = vadd.f32 %v9636_v52, %v9462_v46  ;;  %v9550_v33 = vpop.permute.xlu1 %9549  ;;  %v9404_v46 = vmul.f32 %v9398_v27, %v14653_v19 }
0x1951   :  { %v9569_v30 = vadd.f32 %v9550_v33, %v9403_v47 }
0x1952   :  { %9715 = vrot.lane.b32.xlu0 %v9652_v43, %s12506_s25  ;;  %v9405_v43 = vmul.f32 %v9398_v27, %v14633_v13 }
0x1953   :  { %9505 = vrot.lane.b32.xlu1 %v9391_v62, %s12508_s29  ;;  %v9544_v25 = vpop.permute.xlu0 %9543 }
0x1954   :  { %v9582_v54 = vpop.permute.xlu1 %9581  ;;  %v9566_v22 = vadd.f32 %v9544_v25, %v9400_v9 }
0x1955   :  { %v14629_v56 = vadd.f32 %v9582_v54, %v9427_v14  ;;  %v9406_v14 = vmul.f32 %v9398_v27, %v14660_v4  ;;  %v9476_v54 = vmul.f32 %v14538_v24, %v14521_v55 }
0x1956   :  { %9703 = vrot.lane.b32.xlu0 %v9646_v45, %s12506_s25 }
0x1957   :  { %9509 = vrot.lane.b32.xlu1 %v9393_v34, %s12508_s29  ;;  %v9548_v32 = vpop.permute.xlu0 %9547  ;;  %v9486_v34 = vadd.f32 %v14546_v0, %v9476_v54 }
0x1958   :  { %v9590_v29 = vpop.permute.xlu1 %9589  ;;  %v9568_v61 = vadd.f32 %v9548_v32, %v9402_v11 }
0x1959   :  { %v14640_v2 = vadd.f32 %v9590_v29, %v9431_v17  ;;  %v9488_v17 = vadd.f32 %v14546_v0, %v9478_v35 }
0x195a   :  { %9711 = vrot.lane.b32.xlu0 %v9650_v40, %s12506_s25  ;;  %v9480_v40 = vmul.f32 %v14538_v24, %v14529_v38  ;;  %v9430_v38 = vmul.f32 %v14618_v3, %v14565_v12  ;;  %s12511_s25 = smov [#allocation9]  }
0x195b   :  { %9513 = vrot.lane.b32.xlu1 %v9395_v59, %s12508_s29  ;;  %v9552_v36 = vpop.permute.xlu0 %9551  ;;  %s9846_s27 = sshll.u32 %s12511_s25, 4  ;;  %s9847_s27 = int_to_ptr.vmem [resolvable:$true] %s9846_s27 }
0x195c   :  { %v9546_v37 = vpop.permute.xlu1 %9545  ;;  %v9570_v33 = vadd.f32 %v9552_v36, %v9404_v46  ;;  %v9490_v27 = vadd.f32 %v14546_v0, %v9480_v40  ;;  %v9429_v0 = vmul.f32 %v14618_v3, %v14574_v50  ;;  %s12428_s1 = scalar_lea.vmem %s9847_s27, 512  ;;  %p12433_p0 = scmp.lt.s32.totalorder %s9847_s27, %s9847_s27 }
0x195d   :  { %v9567_v18 = vadd.f32 %v9546_v37, %v9401_v42  ;;  %v9432_v37 = vmul.f32 %v14618_v3, %v14571_v60  ;;  %p12429_p13 = scmp.ne.s32.totalorder %s9847_s27, %s12428_s1  ;;  %p12434_p1 = scmp.lt.s32.totalorder %s12428_s1, %s12428_s1 }
0x195e   :  { %9503 = vrot.lane.b32.xlu0 %v9390_v49, %s12508_s29 }
0x195f   :  { %9661 = vrot.lane.b32.xlu1 %v9565_v23, %s12510_s12  ;;  %v9556_v62 = vpop.permute.xlu0 %9555  ;;  %p12435_p2 = por %p12434_p1, %p12433_p0 }
0x1960   :  { %v9554_v52 = vpop.permute.xlu1 %9553  ;;  %v9572_v45 = vadd.f32 %v9556_v62, %v9406_v14 }
0x1961   :  { %v9571_v41 = vadd.f32 %v9554_v52, %v9405_v43  ;;  %p12436_p3 = pnand %p12435_p2, %p12429_p13 }
0x1962   :  { %9507 = vrot.lane.b32.xlu0 %v9392_v10, %s12508_s29 }
0x1963   :  { %9669 = vrot.lane.b32.xlu1 %v9569_v30, %s12510_s12  ;;  %v9584_v55 = vpop.permute.xlu0 %9583 }
0x1964   :  { %v9586_v29 = vpop.permute.xlu1 %9585 }
0x1965   :  { %v9607_v39 = vadd.f32 %v9586_v29, %v9429_v0 }
0x1966   :  { %9511 = vrot.lane.b32.xlu0 %v9394_v53, %s12508_s29 }
0x1967   :  { %9781 = vrot.lane.b32.xlu1 %v9485_v51, %s12510_s12  ;;  %v9588_v59 = vpop.permute.xlu0 %9587 }
0x1968   :  { %v9594_v20 = vpop.permute.xlu1 %9593  ;;  %v9608_v30 = vadd.f32 %v9588_v59, %v9430_v38 }
0x196a   :  { %9515 = vrot.lane.b32.xlu0 %v9396_v26, %s12508_s29 }
0x196b   :  { %9785 = vrot.lane.b32.xlu1 %v9487_v28, %s12510_s12  ;;  %v9592_v49 = vpop.permute.xlu0 %9591 }
0x196c   :  { %v9610_v11 = vadd.f32 %v9592_v49, %v9432_v37 }
0x196e   :  { %9663 = vrot.lane.b32.xlu0 %v9566_v22, %s12510_s12 }
0x196f   :  { %9789 = vrot.lane.b32.xlu1 %v9489_v44, %s12510_s12  ;;  %v9596_v47 = vpop.permute.xlu0 %9595 }
0x1972   :  { %9667 = vrot.lane.b32.xlu0 %v9568_v61, %s12510_s12 }
0x1973   :  { %9665 = vrot.lane.b32.xlu1 %v9567_v18, %s12510_s12 }
0x1976   :  { %9671 = vrot.lane.b32.xlu0 %v9570_v33, %s12510_s12 }
0x1977   :  { %9673 = vrot.lane.b32.xlu1 %v9571_v41, %s12510_s12 }
0x197a   :  { %9675 = vrot.lane.b32.xlu0 %v9572_v45, %s12510_s12 }
0x197e   :  { %9783 = vrot.lane.b32.xlu0 %v9486_v34, %s12510_s12 }
0x1982   :  { %9787 = vrot.lane.b32.xlu0 %v9488_v17, %s12510_s12 }
0x1986   :  { %9791 = vrot.lane.b32.xlu0 %v9490_v27, %s12510_s12 }
0x19af   :  { %v9702_v23 = vpop.permute.xlu1 %9701 }
0x19b0   :  { %v9725_v58 = vadd.f32 %v9702_v23, %v14629_v56  ;;  %v9433_v56 = vmul.f32 %v14618_v3, %v14582_v1  ;;  %v9428_v1 = vmul.f32 %v14618_v3, %v14559_v5 }
0x19b2   :  { %9741 = vrot.lane.b32.xlu1 %v9725_v58, %s12508_s29  ;;  %v9611_v12 = vadd.f32 %v9594_v20, %v9433_v56  ;;  %v9606_v9 = vadd.f32 %v9584_v55, %v9428_v1 }
0x19b5   :  { %v9710_v24 = vpop.permute.xlu1 %9709 }
0x19b6   :  { %v9729_v10 = vadd.f32 %v9710_v24, %v14640_v2  ;;  %v9434_v2 = vmul.f32 %v14618_v3, %v14579_v31 }
0x19b8   :  { %v9708_v25 = vpop.permute.xlu0 %9707  ;;  %9749 = vrot.lane.b32.xlu1 %v9729_v10, %s12508_s29  ;;  %v9612_v32 = vadd.f32 %v9596_v47, %v9434_v2 }
0x19b9   :  { %v9728_v53 = vadd.f32 %v9708_v25, %v9608_v30  ;;  %v9706_v51 = vpop.permute.xlu1 %9705 }
0x19ba   :  { %v9727_v8 = vadd.f32 %v9706_v51, %v9607_v39 }
0x19bb   :  { %9747 = vrot.lane.b32.xlu0 %v9728_v53, %s12508_s29 }
0x19bc   :  { %9745 = vrot.lane.b32.xlu1 %v9727_v8, %s12508_s29 }
0x19bd   :  { %v9714_v26 = vpop.permute.xlu1 %9713 }
0x19be   :  { %v9731_v50 = vadd.f32 %v9714_v26, %v9611_v12 }
0x19c0   :  { %9753 = vrot.lane.b32.xlu1 %v9731_v50, %s12508_s29 }
0x19c4   :  { %v9716_v28 = vpop.permute.xlu0 %9715  ;;  %9793 = vrot.lane.b32.xlu1 %v14552_v21, %s12510_s12 }
0x19c5   :  { %v9732_v6 = vadd.f32 %v9716_v28, %v9612_v32 }
0x19c7   :  { %9755 = vrot.lane.b32.xlu0 %v9732_v6, %s12508_s29 }
0x19c8   :  { %v9704_v22 = vpop.permute.xlu0 %9703 }
0x19c9   :  { %v9726_v44 = vadd.f32 %v9704_v22, %v9606_v9 }
0x19cb   :  { %9743 = vrot.lane.b32.xlu0 %v9726_v44, %s12508_s29 }
0x19cc   :  { %v9712_v31 = vpop.permute.xlu0 %9711 }
0x19cd   :  { %v9730_v21 = vadd.f32 %v9712_v31, %v9610_v11 }
0x19ce   :  { %12439 = shalt.err (!%p12436_p3)
}
0x19cf   :  { %s12440_s9 = scalar_lea.hbm %s14835_s7, 512 }
0x19d0   :  { %p12441_p4 = scmp.ne.s32.totalorder %s14835_s7, %s12440_s9  ;;  %p12444_p5 = scmp.lt.u32.totalorder %s12440_s9, %s14835_s7 }
0x19d2   :  { %p12446_p6 = pnand %p12444_p5, %p12441_p4 }
0x19d4   :  { %12449 = shalt.err (!%p12446_p6)
}
0x19d5   :  { %9852 = dma.vmem_to_hbm [thread:$0]  %s9847_s27, 512, %s14835_s7, [#allocation10], %s12504_s19, %s12504_s19, %s12505_s20  }
0x19d6   :  { %9751 = vrot.lane.b32.xlu0 %v9730_v21, %s12508_s29  ;;  %s12512_s0 = smov [#allocation11]  }
0x19d7   :  { %s9858_s17 = sshll.u32 %s12512_s0, 4  ;;  %s9859_s17 = int_to_ptr.vmem [resolvable:$true] %s9858_s17 }
0x19d8   :  { %s12450_s18 = scalar_lea.vmem %s9859_s17, 256  ;;  %p12455_p8 = scmp.lt.s32.totalorder %s9859_s17, %s9859_s17 }
0x19d9   :  { %p12451_p7 = scmp.ne.s32.totalorder %s9859_s17, %s12450_s18  ;;  %p12456_p9 = scmp.lt.s32.totalorder %s12450_s18, %s12450_s18 }
0x19db   :  { %p12457_p10 = por %p12456_p9, %p12455_p8 }
0x19dd   :  { %p12458_p11 = pnand %p12457_p10, %p12451_p7 }
0x19df   :  { %12461 = shalt.err (!%p12458_p11)
}
0x19e0   :  { %s12462_s22 = scalar_lea.hbm %s14836_s8, 256 }
0x19e1   :  { %p12463_p12 = scmp.ne.s32.totalorder %s14836_s8, %s12462_s22  ;;  %p12466_p13 = scmp.lt.u32.totalorder %s12462_s22, %s14836_s8 }
0x19e3   :  { %p12468_p0 = pnand %p12466_p13, %p12463_p12 }
0x19e5   :  { %12471 = shalt.err (!%p12468_p0)
}
0x19e6   :  { %9864 = dma.vmem_to_hbm [thread:$0]  %s9859_s17, 256, %s14836_s8, [#allocation10], %s12504_s19, %s12504_s19, %s12505_s20   ;;  %v9502_v5 = vpop.permute.xlu1 %9501  ;;  %v14755_v3 = vpop.permute.xlu0 %9503 }
0x19e7   :  { %9795 = vrot.lane.b32.xlu0 %v14556_v7, %s12510_s12  ;;  %s9957_s8 = sld [smem:[#allocation3 + $0x14]]  ;;  %v6226_v58 = vld [vmem:[%s14830_s2] sm:$0xff]  ;;  %v6229_v32 = vld [vmem:[%s14830_s2 + $0x18] sm:$0xff]  ;;  %v6228_v6 = vld [vmem:[%s14830_s2 + $0x10] sm:$0xff]  ;;  %s12513_s18 = smov [#allocation8]  }
0x19e8   :  { %v6230_v56 = vld [vmem:[%s14830_s2 + $0x20] sm:$0xff]  ;;  %v6232_v21 = vld [vmem:[%s14830_s2 + $0x30] sm:$0xff]  ;;  %s9834_s3 = sshll.u32 %s12513_s18, 4  ;;  %s9835_s3 = int_to_ptr.vmem [resolvable:$true] %s9834_s3 }
0x19e9   :  { %s12472_s21 = scalar_lea.vmem %s9835_s3, 1024  ;;  %p12477_p2 = scmp.lt.s32.totalorder %s9835_s3, %s9835_s3 }
0x19ea   :  { %v9506_v60 = vpop.permute.xlu1 %9505  ;;  %v9508_v42 = vpop.permute.xlu0 %9507  ;;  %p12473_p1 = scmp.ne.s32.totalorder %s9835_s3, %s12472_s21  ;;  %p12478_p3 = scmp.lt.s32.totalorder %s12472_s21, %s12472_s21 }
0x19ec   :  { %p12479_p4 = por %p12478_p3, %p12477_p2 }
0x19ed   :  { %v9378_v35 = vstv %s9957_s8 }
0x19ee   :  { %v9510_v36 = vpop.permute.xlu1 %9509  ;;  %v14757_v18 = vpop.permute.xlu0 %9511  ;;  %v9379_v40 = vmul.f32 %v9378_v35, %v14610_v48  ;;  %v9383_v49 = vmul.f32 %v9378_v35, %v14622_v63  ;;  %v9382_v24 = vmul.f32 %v9378_v35, %v14647_v16  ;;  %v9381_v0 = vmul.f32 %v9378_v35, %v14615_v15  ;;  %p12480_p5 = pnand %p12479_p4, %p12473_p1 }
0x19ef   :  { %v9385_v15 = vmul.f32 %v9378_v35, %v14633_v13 }
0x19f0   :  { %v9525_v55 = vadd.f32 %v9502_v5, %v9379_v40  ;;  %v9529_v47 = vadd.f32 %v9510_v36, %v9383_v49  ;;  %v9528_v39 = vadd.f32 %v9508_v42, %v9382_v24  ;;  %v9527_v53 = vadd.f32 %v9506_v60, %v9381_v0 }
0x19f1   :  { %v9380_v36 = vmul.f32 %v9378_v35, %v14638_v57  ;;  %v6227_v57 = vld [vmem:[%s14830_s2 + $0x8] sm:$0xff] }
0x19f2   :  { %v9514_v61 = vpop.permute.xlu1 %9513  ;;  %v14759_v52 = vpop.permute.xlu0 %9515 }
0x19f3   :  { %v9531_v9 = vadd.f32 %v9514_v61, %v9385_v15 }
0x19f6   :  { %v9662_v46 = vpop.permute.xlu1 %9661  ;;  %v14761_v33 = vpop.permute.xlu0 %9663 }
0x19f7   :  { %v9685_v29 = vadd.f32 %v9662_v46, %v9525_v55  ;;  %v9526_v46 = vadd.f32 %v14755_v3, %v9380_v36 }
0x19fa   :  { %v9670_v43 = vpop.permute.xlu1 %9669  ;;  %v9668_v41 = vpop.permute.xlu0 %9667 }
0x19fb   :  { %v9689_v10 = vadd.f32 %v9670_v43, %v9529_v47  ;;  %v9688_v51 = vadd.f32 %v9668_v41, %v9528_v39  ;;  %v9384_v43 = vmul.f32 %v9378_v35, %v14653_v19 }
0x19fe   :  { %v9782_v62 = vpop.permute.xlu1 %9781  ;;  %v14763_v45 = vpop.permute.xlu0 %9671 }
0x1a02   :  { %v9786_v14 = vpop.permute.xlu1 %9785  ;;  %v14765_v54 = vpop.permute.xlu0 %9675 }
0x1a06   :  { %v9790_v7 = vpop.permute.xlu1 %9789  ;;  %v9784_v17 = vpop.permute.xlu0 %9783 }
0x1a0a   :  { %v9666_v34 = vpop.permute.xlu1 %9665  ;;  %v9788_v59 = vpop.permute.xlu0 %9787 }
0x1a0b   :  { %v9687_v8 = vadd.f32 %v9666_v34, %v9527_v53 }
0x1a0e   :  { %v9674_v27 = vpop.permute.xlu1 %9673  ;;  %v9792_v48 = vpop.permute.xlu0 %9791 }
0x1a0f   :  { %v9691_v11 = vadd.f32 %v9674_v27, %v9531_v9 }
0x1a24   :  { %v9742_v20 = vpop.permute.xlu1 %9741 }
0x1a25   :  { %v9765_v23 = vadd.f32 %v9742_v20, %v9685_v29 }
0x1a27   :  { %v9805_v38 = vadd.f32 %v9782_v62, %v9765_v23  ;;  %v9686_v62 = vadd.f32 %v14761_v33, %v9526_v46 }
0x1a29   :  { %v9813_v30 = vadd.f32 %v9805_v38, %v6226_v58 }
0x1a2a   :  { %v9750_v25 = vpop.permute.xlu1 %9749 }
0x1a2b   :  { %9821 = vst.msk [vmem:[#allocation8] sm:$0xff] %vm390_vm1, %v9813_v30  ;;  %v9769_v63 = vadd.f32 %v9750_v25, %v9689_v10 }
0x1a2d   :  { %v9809_v12 = vadd.f32 %v9790_v7, %v9769_v63  ;;  %v9748_v26 = vpop.permute.xlu0 %9747  ;;  %v9386_v7 = vmul.f32 %v9378_v35, %v14660_v4 }
0x1a2e   :  { %v9768_v16 = vadd.f32 %v9748_v26, %v9688_v51  ;;  %v9746_v50 = vpop.permute.xlu1 %9745 }
0x1a2f   :  { %v9817_v2 = vadd.f32 %v9809_v12, %v6230_v56  ;;  %v9767_v28 = vadd.f32 %v9746_v50, %v9687_v8  ;;  %v9532_v40 = vadd.f32 %v14759_v52, %v9386_v7  ;;  %v6233_v52 = vld [vmem:[%s14830_s2 + $0x38] sm:$0xff] }
0x1a30   :  { %v9808_v1 = vadd.f32 %v9788_v59, %v9768_v16 }
0x1a31   :  { %9825 = vst.msk [vmem:[#allocation8 + $0x20] sm:$0xff] %vm390_vm1, %v9817_v2  ;;  %v9807_v22 = vadd.f32 %v9786_v14, %v9767_v28  ;;  %v9530_v14 = vadd.f32 %v14757_v18, %v9384_v43  ;;  %v9692_v19 = vadd.f32 %v14765_v54, %v9532_v40  ;;  %v6231_v18 = vld [vmem:[%s14830_s2 + $0x28] sm:$0xff] }
0x1a32   :  { %v9816_v37 = vadd.f32 %v9808_v1, %v6229_v32  ;;  %v9754_v44 = vpop.permute.xlu1 %9753 }
0x1a33   :  { %v9815_v31 = vadd.f32 %v9807_v22, %v6228_v6  ;;  %v9771_v13 = vadd.f32 %v9754_v44, %v9691_v11  ;;  %v9690_v3 = vadd.f32 %v14763_v45, %v9530_v14 }
0x1a34   :  { %9824 = vst.msk [vmem:[#allocation8 + $0x18] sm:$0xff] %vm390_vm1, %v9816_v37 }
0x1a35   :  { %9823 = vst.msk [vmem:[#allocation8 + $0x10] sm:$0xff] %vm390_vm1, %v9815_v31 }
0x1a36   :  { %v9794_v5 = vpop.permute.xlu1 %9793 }
0x1a37   :  { %v9811_v60 = vadd.f32 %v9794_v5, %v9771_v13 }
0x1a39   :  { %v9819_v42 = vadd.f32 %v9811_v60, %v6232_v21  ;;  %v9756_v61 = vpop.permute.xlu0 %9755 }
0x1a3a   :  { %v9772_v4 = vadd.f32 %v9756_v61, %v9692_v19 }
0x1a3b   :  { %9827 = vst.msk [vmem:[#allocation8 + $0x30] sm:$0xff] %vm390_vm1, %v9819_v42 }
0x1a3d   :  { %v9744_v41 = vpop.permute.xlu0 %9743 }
0x1a3e   :  { %v9766_v34 = vadd.f32 %v9744_v41, %v9686_v62 }
0x1a40   :  { %v9806_v27 = vadd.f32 %v9784_v17, %v9766_v34 }
0x1a42   :  { %v9814_v29 = vadd.f32 %v9806_v27, %v6227_v57 }
0x1a44   :  { %9822 = vst.msk [vmem:[#allocation8 + $0x8] sm:$0xff] %vm390_vm1, %v9814_v29 }
0x1a48   :  { %v9752_v55 = vpop.permute.xlu0 %9751 }
0x1a49   :  { %v9770_v33 = vadd.f32 %v9752_v55, %v9690_v3 }
0x1a4b   :  { %v9810_v35 = vadd.f32 %v9792_v48, %v9770_v33 }
0x1a4d   :  { %v9818_v45 = vadd.f32 %v9810_v35, %v6231_v18 }
0x1a4f   :  { %9826 = vst.msk [vmem:[#allocation8 + $0x28] sm:$0xff] %vm390_vm1, %v9818_v45 }
0x1a59   :  { %v9796_v59 = vpop.permute.xlu0 %9795 }
0x1a5a   :  { %v9812_v17 = vadd.f32 %v9796_v59, %v9772_v4 }
0x1a5c   :  { %v9820_v54 = vadd.f32 %v9812_v17, %v6233_v52 }
0x1a5e   :  { %9828 = vst.msk [vmem:[#allocation8 + $0x38] sm:$0xff] %vm390_vm1, %v9820_v54 }
0x1a5f   :  { %12483 = shalt.err (!%p12480_p5)
}
0x1a60   :  { %s12484_s23 = scalar_lea.hbm %s14834_s6, 1024 }
0x1a61   :  { %p12485_p6 = scmp.ne.s32.totalorder %s14834_s6, %s12484_s23  ;;  %p12488_p7 = scmp.lt.u32.totalorder %s12484_s23, %s14834_s6 }
0x1a63   :  { %p12490_p8 = pnand %p12488_p7, %p12485_p6 }
0x1a65   :  { %12493 = shalt.err (!%p12490_p8)
}
0x1a66   :  { %9840 = dma.vmem_to_hbm [thread:$0]  %s9835_s3, 1024, %s14834_s6, [#allocation5], %s12504_s19, %s12504_s19, %s12505_s20  }
0x1a67   :  { %12498 = dma.done.wait [#allocation5], 1024  }
0x1a68   :  { %12499 = vsyncadd [#allocation5], 4294966272 }
0x1a69   :  { %12500 = dma.done.wait [#allocation10], 768  }
0x1a6a   :  { %12501 = vsyncadd [#allocation10], 4294966528 }
0x1a6b   :  { %9874 = vsyncpa [#allocation4], 1 }
0x1a6c   :  { %9875 = vsyncpa [#allocation5], 1 }
0x1a6d   :  { %9876 = vsyncpa [#allocation10], 1 }
0x1a6e   :  { %9877 = vsyncpa [#allocation6], 1 }

</bundles_post_ra>
